<compile_context>
chip_gen: v7x
topology: tpu7x:2x2x1
jax: 0.10.0
libtpu: 0.0.40
codegen_flags: <defaults>
</compile_context>

<pallas_src>
import functools

import jax
import jax.numpy as jnp
from jax import lax
from jax.experimental import pallas as pl
from jax.experimental.pallas import tpu as pltpu

C1, C2 = 4, 16          # conv channel counts from the module
HID, HID2 = 128, 64     # head widths
NEG = -1e30             # stands in for -inf in max-pool padding


# --------------------------------------------------------------------------
# Fused kernel: Conv(1->4) -> MaxPool -> Conv(4->16) -> MaxPool -> FC+ReLU
#               -> dueling heads -> masked softmaxes -> combine
# --------------------------------------------------------------------------
def ddqn_kernel(x_ref, mask_ref, colmask_ref,
                w1_ref, b1_ref, w2_ref, b2_ref,
                wfc_ref, bfc_ref, wa1_ref, ba1_ref, wa2_ref, ba2_ref,
                wv1_ref, bv1_ref, wv2_ref, bv2_ref,
                out_ref, padA, padB, *, width, height, action_dim):
    B = x_ref.shape[0]
    P = width * height
    Cdim = height                 # minor spatial dim of the unflattened image
    OFF = Cdim + 1                # flat padding on each side of a row of P
    PP = P + 2 * OFF

    taps = [(di, dj) for di in (-1, 0, 1) for dj in (-1, 0, 1)]

    # Column-validity masks (precomputed in glue): row 0 -> dj=-1, row 1 -> dj=+1
    cm = colmask_ref[...]                           # (2, P) float32
    ok_dj = {-1: cm[0:1, :] > 0.5, 0: None, 1: cm[1:2, :] > 0.5}

    def store_padded(buf, nch, interior, fill):
        # interior: (B, nch, P) -> buf[:, :nch, OFF:OFF+P]; pad strips get `fill`.
        strip = jnp.full((B, nch, OFF), fill, jnp.float32)
        buf[:, 0:nch, 0:OFF] = strip
        buf[:, 0:nch, OFF + P:PP] = strip
        buf[:, 0:nch, OFF:OFF + P] = interior

    def load_taps(buf, nch, fill):
        # Returns 9 arrays (B, nch, P): the 3x3 neighborhood maps.
        pb = buf[:, 0:nch, :]                        # (B, nch, PP)
        outs = []
        for di, dj in taps:
            st = OFF + di * Cdim + dj                # static slice start
            sl = pb[:, :, st:st + P]                 # (B, nch, P)
            m = ok_dj[dj]
            if m is not None:
                sl = jnp.where(m, sl, jnp.float32(fill))
            outs.append(sl)
        return outs

    # ---- stage 0: x / 8, zero-padded --------------------------------------
    store_padded(padA, 1, (x_ref[...] * jnp.float32(0.125))[:, None, :], 0.0)

    # ---- stage 1: conv1 1 -> C1 (C_in == 1: 9-tap FMA on lane-dense data) --
    t1 = load_taps(padA, 1, 0.0)
    acc1 = jnp.zeros((B, C1, P), jnp.float32) + b1_ref[...]           # (C1,1) bcast
    for t in range(9):
        acc1 = acc1 + t1[t] * w1_ref[:, t:t + 1]                       # (B,1,P)*(C1,1)
    store_padded(padB, C1, acc1, NEG)

    # ---- stage 2: maxpool 3x3 / stride 1 / pad 1 ---------------------------
    tp = load_taps(padB, C1, NEG)
    m1 = tp[0]
    for t in range(1, 9):
        m1 = jnp.maximum(m1, tp[t])
    store_padded(padA, C1, m1, 0.0)

    # ---- stage 3: conv2 C1 -> C2 on the MXU (9 tap-matmuls over channels) --
    t2 = load_taps(padA, C1, 0.0)
    acc2 = jnp.zeros((B, C2, P), jnp.float32) + b2_ref[...]           # (C2,1) bcast
    for t in range(9):
        w_t = jnp.broadcast_to(w2_ref[t], (B, C2, C1))                # (B,C2,C1)
        acc2 = acc2 + lax.dot_general(
            w_t, t2[t],
            dimension_numbers=(((2,), (1,)), ((0,), (0,))),
            preferred_element_type=jnp.float32)                       # (B,C2,P)
    store_padded(padB, C2, acc2, NEG)

    # ---- stage 4: maxpool -> feat (B, C2, P); never leaves VMEM ------------
    tp = load_taps(padB, C2, NEG)
    feat = tp[0]
    for t in range(1, 9):
        feat = jnp.maximum(feat, tp[t])

    # ---- Linear(C2*P, 128) + ReLU: lane-dense MXU dots, no in-kernel reshape
    h = jnp.zeros((B, HID), jnp.float32) + bfc_ref[...]
    for c in range(C2):
        h = h + jnp.dot(feat[:, c, :], wfc_ref[c],
                        preferred_element_type=jnp.float32)
    h = jnp.maximum(h, 0.0)

    # ---- dueling heads ------------------------------------------------------
    a = jnp.dot(h, wa1_ref[...], preferred_element_type=jnp.float32) + ba1_ref[...]
    a = jnp.maximum(a, 0.0)
    adv = jnp.dot(a, wa2_ref[...], preferred_element_type=jnp.float32) + ba2_ref[...]

    v = jnp.dot(h, wv1_ref[...], preferred_element_type=jnp.float32) + bv1_ref[...]
    v = jnp.maximum(v, 0.0)
    val = jnp.sum(v * wv2_ref[...], axis=1, keepdims=True) + bv2_ref[...]   # (B, 1)

    # ---- masked softmaxes + combine (padded action lanes have mask == 0) ----
    mask = mask_ref[...]
    eps = jnp.float32(1e-5)
    adv_e = jnp.exp(adv) * mask
    adv_sm = adv_e * pl.reciprocal(jnp.sum(adv_e, axis=1, keepdims=True) + eps,
                                   approx=True)
    val_e = jnp.exp(val) * mask
    val_sm = val_e * pl.reciprocal(jnp.sum(val_e, axis=1, keepdims=True) + eps,
                                   approx=True)

    # advantage.mean() is over the true (B, action_dim) tensor; padded cols are 0.
    mean_adv = jnp.sum(jnp.sum(adv_sm, axis=1, keepdims=True), axis=0, keepdims=True)
    mean_adv = mean_adv * jnp.float32(1.0 / (B * action_dim))

    out_ref[...] = val_sm + adv_sm - mean_adv


def ddqn_pallas(x, mask_p, colmask, packed, *, width, height, action_dim):
    B, P = x.shape
    Apad = mask_p.shape[1]
    PP = P + 2 * (height + 1)
    kernel = functools.partial(ddqn_kernel, width=width, height=height,
                               action_dim=action_dim)
    n_in = 3 + len(packed)
    return pl.pallas_call(
        kernel,
        out_shape=jax.ShapeDtypeStruct((B, Apad), jnp.float32),
        in_specs=[pl.BlockSpec(memory_space=pltpu.MemorySpace.VMEM)] * n_in,
        out_specs=pl.BlockSpec(memory_space=pltpu.MemorySpace.VMEM),
        scratch_shapes=[
            pltpu.VMEM((B, C1, PP), jnp.float32),   # ping buffer (x/8, pool1)
            pltpu.VMEM((B, C2, PP), jnp.float32),   # pong buffer (conv1, conv2)
        ],
    )(x, mask_p, colmask, *packed)


# --------------------------------------------------------------------------
# Glue: parameter packing (tap-major conv weights, padded action dim, etc.)
# --------------------------------------------------------------------------
def pack_params(params, width, height, action_dim, apad):
    P = width * height
    pad_a = apad - action_dim
    # w2[(o, ci, kh, kw)] -> per-tap (C2, C1) matrices, tap index t = kh*3 + kw
    w2t = jnp.transpose(params['w2'], (2, 3, 0, 1)).reshape(9, C2, C1)
    return [
        params['w1'].reshape(C1, 9),
        params['b1'].reshape(C1, 1),
        w2t,
        params['b2'].reshape(C2, 1),
        params['wfc'].reshape(C2, P, HID),
        params['bfc'].reshape(1, HID),
        params['wa1'],
        params['ba1'].reshape(1, HID2),
        jnp.pad(params['wa2'], ((0, 0), (0, pad_a))),
        jnp.pad(params['ba2'], ((0, pad_a),)).reshape(1, apad),
        params['wv1'],
        params['bv1'].reshape(1, HID2),
        params['wv2'].reshape(1, HID2),
        params['bv2'].reshape(1, 1),
    ]


def ddqn_forward(x, mask, params, width, height):
    # x: (B, width*height), mask: (B, action_dim)
    A = mask.shape[1]
    Apad = ((A + 127) // 128) * 128
    P = width * height

    mask_p = jnp.pad(mask.astype(jnp.float32), ((0, 0), (0, Apad - A)))

    col = jnp.arange(P, dtype=jnp.int32) % height
    colmask = jnp.stack([(col >= 1).astype(jnp.float32),
                         (col <= height - 2).astype(jnp.float32)])    # (2, P)

    packed = pack_params(params, width, height, A, Apad)
    out = ddqn_pallas(x.astype(jnp.float32), mask_p, colmask, packed,
                      width=width, height=height, action_dim=A)
    return out[:, :A]


# --------------------------------------------------------------------------
# Pure-JAX reference (for correctness check)
# --------------------------------------------------------------------------
def reference_forward(x, mask, params, width, height):
    B = x.shape[0]
    img = (x / 8.0).reshape(B, 1, width, height)
    dn = ('NCHW', 'OIHW', 'NCHW')
    hp = jax.lax.Precision.HIGHEST
    c1 = lax.conv_general_dilated(img, params['w1'], (1, 1), [(1, 1), (1, 1)],
                                  dimension_numbers=dn, precision=hp) + params['b1'].reshape(1, -1, 1, 1)
    p1 = lax.reduce_window(c1, -jnp.inf, lax.max, (1, 1, 3, 3), (1, 1, 1, 1),
                           [(0, 0), (0, 0), (1, 1), (1, 1)])
    c2 = lax.conv_general_dilated(p1, params['w2'], (1, 1), [(1, 1), (1, 1)],
                                  dimension_numbers=dn, precision=hp) + params['b2'].reshape(1, -1, 1, 1)
    p2 = lax.reduce_window(c2, -jnp.inf, lax.max, (1, 1, 3, 3), (1, 1, 1, 1),
                           [(0, 0), (0, 0), (1, 1), (1, 1)])
    feat = p2.reshape(B, -1)

    def lin(t, w, b):
        return jnp.dot(t, w, precision=hp) + b

    h = jnp.maximum(lin(feat, params['wfc'], params['bfc']), 0.0)
    a = jnp.maximum(lin(h, params['wa1'], params['ba1']), 0.0)
    adv = lin(a, params['wa2'], params['ba2'])
    v = jnp.maximum(lin(h, params['wv1'], params['bv1']), 0.0)
    val = lin(v, params['wv2'], params['bv2'])

    def msm(vec, m):
        e = jnp.exp(vec) * m
        return e / (jnp.sum(e, axis=1, keepdims=True) + 1e-5)

    adv_s = msm(adv, mask)
    val_s = msm(val, mask)
    return val_s + adv_s - jnp.mean(adv_s)


def init_params(key, width, height, action_dim):
    F = C2 * width * height

    def uni(k, shape, fan_in):
        bound = 1.0 / float(fan_in) ** 0.5
        return jax.random.uniform(k, shape, jnp.float32, -bound, bound)

    ks = jax.random.split(key, 14)
    return {
        'w1': uni(ks[0], (C1, 1, 3, 3), 9), 'b1': uni(ks[1], (C1,), 9),
        'w2': uni(ks[2], (C2, C1, 3, 3), 36), 'b2': uni(ks[3], (C2,), 36),
        'wfc': uni(ks[4], (F, HID), F), 'bfc': uni(ks[5], (HID,), F),
        'wa1': uni(ks[6], (HID, HID2), HID), 'ba1': uni(ks[7], (HID2,), HID),
        'wa2': uni(ks[8], (HID2, action_dim), HID2), 'ba2': uni(ks[9], (action_dim,), HID2),
        'wv1': uni(ks[10], (HID, HID2), HID), 'bv1': uni(ks[11], (HID2,), HID),
        'wv2': uni(ks[12], (HID2, 1), HID2), 'bv2': uni(ks[13], (1,), HID2),
    }


if __name__ == "__main__":
    width = height = 16
    action_dim = 4
    B = 2

    key = jax.random.PRNGKey(0)
    kx, km, kp = jax.random.split(key, 3)
    params = init_params(kp, width, height, action_dim)

    x = jax.random.uniform(kx, (B, width * height), jnp.float32, 0.0, 8.0)
    mask = (jax.random.uniform(km, (B, action_dim)) > 0.3).astype(jnp.float32)
    mask = mask.at[:, 0].set(1.0)   # at least one legal action per row

    fwd = jax.jit(functools.partial(ddqn_forward, width=width, height=height))
    out = jax.block_until_ready(fwd(x, mask, params))

    ref = reference_forward(x, mask, params, width, height)
    assert out.shape == (B, action_dim)
    assert jnp.allclose(out, ref, rtol=5e-2, atol=5e-3), (out, ref)
    print("KERNEL_OK")
</pallas_src>

<mosaic_0001>
module attributes {stable_mosaic.version = 11 : i64} {
  func.func @ddqn_kernel(%arg0: memref<2x256xf32, #tpu.memory_space<vmem>>, %arg1: memref<2x128xf32, #tpu.memory_space<vmem>>, %arg2: memref<2x256xf32, #tpu.memory_space<vmem>>, %arg3: memref<4x9xf32, #tpu.memory_space<vmem>>, %arg4: memref<4x1xf32, #tpu.memory_space<vmem>>, %arg5: memref<9x16x4xf32, #tpu.memory_space<vmem>>, %arg6: memref<16x1xf32, #tpu.memory_space<vmem>>, %arg7: memref<16x256x128xf32, #tpu.memory_space<vmem>>, %arg8: memref<1x128xf32, #tpu.memory_space<vmem>>, %arg9: memref<128x64xf32, #tpu.memory_space<vmem>>, %arg10: memref<1x64xf32, #tpu.memory_space<vmem>>, %arg11: memref<64x128xf32, #tpu.memory_space<vmem>>, %arg12: memref<1x128xf32, #tpu.memory_space<vmem>>, %arg13: memref<128x64xf32, #tpu.memory_space<vmem>>, %arg14: memref<1x64xf32, #tpu.memory_space<vmem>>, %arg15: memref<1x64xf32, #tpu.memory_space<vmem>>, %arg16: memref<1x1xf32, #tpu.memory_space<vmem>>, %arg17: memref<2x128xf32, #tpu.memory_space<vmem>>, %arg18: memref<2x4x290xf32, #tpu.memory_space<vmem>>, %arg19: memref<2x16x290xf32, #tpu.memory_space<vmem>>) attributes {dimension_semantics = [], scalar_prefetch = 0 : i64, scratch_operands = 2 : i64, tpu.core_type = #tpu.core_type<tc>} {
    %c0 = arith.constant 0 : index
    %c0_0 = arith.constant 0 : index
    %0 = vector.load %arg2[%c0, %c0_0] : memref<2x256xf32, #tpu.memory_space<vmem>>, vector<2x256xf32>
    %1 = vector.extract_strided_slice %0 {offsets = [0, 0], sizes = [1, 256], strides = [1, 1]} : vector<2x256xf32> to vector<1x256xf32>
    %cst = arith.constant 5.000000e-01 : f32
    %2 = vector.broadcast %cst : f32 to vector<1x256xf32>
    %3 = arith.cmpf ogt, %1, %2 : vector<1x256xf32>
    %4 = vector.extract_strided_slice %0 {offsets = [1, 0], sizes = [1, 256], strides = [1, 1]} : vector<2x256xf32> to vector<1x256xf32>
    %cst_1 = arith.constant 5.000000e-01 : f32
    %5 = vector.broadcast %cst_1 : f32 to vector<1x256xf32>
    %6 = arith.cmpf ogt, %4, %5 : vector<1x256xf32>
    %c0_2 = arith.constant 0 : index
    %c0_3 = arith.constant 0 : index
    %7 = vector.load %arg0[%c0_2, %c0_3] : memref<2x256xf32, #tpu.memory_space<vmem>>, vector<2x256xf32>
    %cst_4 = arith.constant 1.250000e-01 : f32
    %8 = vector.broadcast %cst_4 : f32 to vector<2x256xf32>
    %9 = arith.mulf %7, %8 : vector<2x256xf32>
    %10 = vector.shape_cast %9 : vector<2x256xf32> to vector<2x1x256xf32>
    %cst_5 = arith.constant 0.000000e+00 : f32
    %11 = vector.broadcast %cst_5 : f32 to vector<2x1x17xf32>
    %c0_6 = arith.constant 0 : index
    %c0_7 = arith.constant 0 : index
    %c0_8 = arith.constant 0 : index
    %12 = vector.load %arg18[%c0_6, %c0_7, %c0_8] : memref<2x4x290xf32, #tpu.memory_space<vmem>>, vector<2x1x17xf32>
    tpu.vector_store %arg18[%c0_6, %c0_7, %c0_8], %11 {strides = array<i32>} : memref<2x4x290xf32, #tpu.memory_space<vmem>>, vector<2x1x17xf32>,
    %c0_9 = arith.constant 0 : index
    %c0_10 = arith.constant 0 : index
    %c273 = arith.constant 273 : index
    %13 = vector.load %arg18[%c0_9, %c0_10, %c273] : memref<2x4x290xf32, #tpu.memory_space<vmem>>, vector<2x1x17xf32>
    tpu.vector_store %arg18[%c0_9, %c0_10, %c273], %11 {strides = array<i32>} : memref<2x4x290xf32, #tpu.memory_space<vmem>>, vector<2x1x17xf32>,
    %c0_11 = arith.constant 0 : index
    %c0_12 = arith.constant 0 : index
    %c17 = arith.constant 17 : index
    %14 = vector.load %arg18[%c0_11, %c0_12, %c17] : memref<2x4x290xf32, #tpu.memory_space<vmem>>, vector<2x1x256xf32>
    tpu.vector_store %arg18[%c0_11, %c0_12, %c17], %10 {strides = array<i32>} : memref<2x4x290xf32, #tpu.memory_space<vmem>>, vector<2x1x256xf32>,
    %c0_13 = arith.constant 0 : index
    %c0_14 = arith.constant 0 : index
    %c0_15 = arith.constant 0 : index
    %15 = vector.load %arg18[%c0_13, %c0_14, %c0_15] : memref<2x4x290xf32, #tpu.memory_space<vmem>>, vector<2x1x290xf32>
    %16 = vector.extract_strided_slice %15 {offsets = [0, 0, 0], sizes = [2, 1, 256], strides = [1, 1, 1]} : vector<2x1x290xf32> to vector<2x1x256xf32>
    %cst_16 = arith.constant 0.000000e+00 : f32
    %17 = vector.shape_cast %3 : vector<1x256xi1> to vector<1x1x256xi1>
    %18 = vector.broadcast %17 : vector<1x1x256xi1> to vector<2x1x256xi1>
    %19 = vector.broadcast %cst_16 : f32 to vector<2x1x256xf32>
    %20 = arith.select %18, %16, %19 : vector<2x1x256xi1>, vector<2x1x256xf32>
    %21 = vector.extract_strided_slice %15 {offsets = [0, 0, 1], sizes = [2, 1, 256], strides = [1, 1, 1]} : vector<2x1x290xf32> to vector<2x1x256xf32>
    %22 = vector.extract_strided_slice %15 {offsets = [0, 0, 2], sizes = [2, 1, 256], strides = [1, 1, 1]} : vector<2x1x290xf32> to vector<2x1x256xf32>
    %cst_17 = arith.constant 0.000000e+00 : f32
    %23 = vector.shape_cast %6 : vector<1x256xi1> to vector<1x1x256xi1>
    %24 = vector.broadcast %23 : vector<1x1x256xi1> to vector<2x1x256xi1>
    %25 = vector.broadcast %cst_17 : f32 to vector<2x1x256xf32>
    %26 = arith.select %24, %22, %25 : vector<2x1x256xi1>, vector<2x1x256xf32>
    %27 = vector.extract_strided_slice %15 {offsets = [0, 0, 16], sizes = [2, 1, 256], strides = [1, 1, 1]} : vector<2x1x290xf32> to vector<2x1x256xf32>
    %cst_18 = arith.constant 0.000000e+00 : f32
    %28 = vector.shape_cast %3 : vector<1x256xi1> to vector<1x1x256xi1>
    %29 = vector.broadcast %28 : vector<1x1x256xi1> to vector<2x1x256xi1>
    %30 = vector.broadcast %cst_18 : f32 to vector<2x1x256xf32>
    %31 = arith.select %29, %27, %30 : vector<2x1x256xi1>, vector<2x1x256xf32>
    %32 = vector.extract_strided_slice %15 {offsets = [0, 0, 17], sizes = [2, 1, 256], strides = [1, 1, 1]} : vector<2x1x290xf32> to vector<2x1x256xf32>
    %33 = vector.extract_strided_slice %15 {offsets = [0, 0, 18], sizes = [2, 1, 256], strides = [1, 1, 1]} : vector<2x1x290xf32> to vector<2x1x256xf32>
    %cst_19 = arith.constant 0.000000e+00 : f32
    %34 = vector.shape_cast %6 : vector<1x256xi1> to vector<1x1x256xi1>
    %35 = vector.broadcast %34 : vector<1x1x256xi1> to vector<2x1x256xi1>
    %36 = vector.broadcast %cst_19 : f32 to vector<2x1x256xf32>
    %37 = arith.select %35, %33, %36 : vector<2x1x256xi1>, vector<2x1x256xf32>
    %38 = vector.extract_strided_slice %15 {offsets = [0, 0, 32], sizes = [2, 1, 256], strides = [1, 1, 1]} : vector<2x1x290xf32> to vector<2x1x256xf32>
    %cst_20 = arith.constant 0.000000e+00 : f32
    %39 = vector.shape_cast %3 : vector<1x256xi1> to vector<1x1x256xi1>
    %40 = vector.broadcast %39 : vector<1x1x256xi1> to vector<2x1x256xi1>
    %41 = vector.broadcast %cst_20 : f32 to vector<2x1x256xf32>
    %42 = arith.select %40, %38, %41 : vector<2x1x256xi1>, vector<2x1x256xf32>
    %43 = vector.extract_strided_slice %15 {offsets = [0, 0, 33], sizes = [2, 1, 256], strides = [1, 1, 1]} : vector<2x1x290xf32> to vector<2x1x256xf32>
    %44 = vector.extract_strided_slice %15 {offsets = [0, 0, 34], sizes = [2, 1, 256], strides = [1, 1, 1]} : vector<2x1x290xf32> to vector<2x1x256xf32>
    %cst_21 = arith.constant 0.000000e+00 : f32
    %45 = vector.shape_cast %6 : vector<1x256xi1> to vector<1x1x256xi1>
    %46 = vector.broadcast %45 : vector<1x1x256xi1> to vector<2x1x256xi1>
    %47 = vector.broadcast %cst_21 : f32 to vector<2x1x256xf32>
    %48 = arith.select %46, %44, %47 : vector<2x1x256xi1>, vector<2x1x256xf32>
    %cst_22 = arith.constant 0.000000e+00 : f32
    %49 = vector.broadcast %cst_22 : f32 to vector<2x4x256xf32>
    %c0_23 = arith.constant 0 : index
    %c0_24 = arith.constant 0 : index
    %50 = vector.load %arg4[%c0_23, %c0_24] : memref<4x1xf32, #tpu.memory_space<vmem>>, vector<4x1xf32>
    %51 = vector.shape_cast %50 : vector<4x1xf32> to vector<1x4x1xf32>
    %52 = vector.broadcast %51 : vector<1x4x1xf32> to vector<2x4x256xf32>
    %53 = arith.addf %49, %52 : vector<2x4x256xf32>
    %c0_25 = arith.constant 0 : index
    %c0_26 = arith.constant 0 : index
    %54 = vector.load %arg3[%c0_25, %c0_26] : memref<4x9xf32, #tpu.memory_space<vmem>>, vector<4x1xf32>
    %55 = vector.shape_cast %54 : vector<4x1xf32> to vector<1x4x1xf32>
    %56 = vector.broadcast %20 : vector<2x1x256xf32> to vector<2x4x256xf32>
    %57 = vector.broadcast %55 : vector<1x4x1xf32> to vector<2x4x256xf32>
    %58 = arith.mulf %56, %57 : vector<2x4x256xf32>
    %59 = arith.addf %53, %58 : vector<2x4x256xf32>
    %c0_27 = arith.constant 0 : index
    %c1 = arith.constant 1 : index
    %60 = vector.load %arg3[%c0_27, %c1] : memref<4x9xf32, #tpu.memory_space<vmem>>, vector<4x1xf32>
    %61 = vector.shape_cast %60 : vector<4x1xf32> to vector<1x4x1xf32>
    %62 = vector.broadcast %21 : vector<2x1x256xf32> to vector<2x4x256xf32>
    %63 = vector.broadcast %61 : vector<1x4x1xf32> to vector<2x4x256xf32>
    %64 = arith.mulf %62, %63 : vector<2x4x256xf32>
    %65 = arith.addf %59, %64 : vector<2x4x256xf32>
    %c0_28 = arith.constant 0 : index
    %c2 = arith.constant 2 : index
    %66 = vector.load %arg3[%c0_28, %c2] : memref<4x9xf32, #tpu.memory_space<vmem>>, vector<4x1xf32>
    %67 = vector.shape_cast %66 : vector<4x1xf32> to vector<1x4x1xf32>
    %68 = vector.broadcast %26 : vector<2x1x256xf32> to vector<2x4x256xf32>
    %69 = vector.broadcast %67 : vector<1x4x1xf32> to vector<2x4x256xf32>
    %70 = arith.mulf %68, %69 : vector<2x4x256xf32>
    %71 = arith.addf %65, %70 : vector<2x4x256xf32>
    %c0_29 = arith.constant 0 : index
    %c3 = arith.constant 3 : index
    %72 = vector.load %arg3[%c0_29, %c3] : memref<4x9xf32, #tpu.memory_space<vmem>>, vector<4x1xf32>
    %73 = vector.shape_cast %72 : vector<4x1xf32> to vector<1x4x1xf32>
    %74 = vector.broadcast %31 : vector<2x1x256xf32> to vector<2x4x256xf32>
    %75 = vector.broadcast %73 : vector<1x4x1xf32> to vector<2x4x256xf32>
    %76 = arith.mulf %74, %75 : vector<2x4x256xf32>
    %77 = arith.addf %71, %76 : vector<2x4x256xf32>
    %c0_30 = arith.constant 0 : index
    %c4 = arith.constant 4 : index
    %78 = vector.load %arg3[%c0_30, %c4] : memref<4x9xf32, #tpu.memory_space<vmem>>, vector<4x1xf32>
    %79 = vector.shape_cast %78 : vector<4x1xf32> to vector<1x4x1xf32>
    %80 = vector.broadcast %32 : vector<2x1x256xf32> to vector<2x4x256xf32>
    %81 = vector.broadcast %79 : vector<1x4x1xf32> to vector<2x4x256xf32>
    %82 = arith.mulf %80, %81 : vector<2x4x256xf32>
    %83 = arith.addf %77, %82 : vector<2x4x256xf32>
    %c0_31 = arith.constant 0 : index
    %c5 = arith.constant 5 : index
    %84 = vector.load %arg3[%c0_31, %c5] : memref<4x9xf32, #tpu.memory_space<vmem>>, vector<4x1xf32>
    %85 = vector.shape_cast %84 : vector<4x1xf32> to vector<1x4x1xf32>
    %86 = vector.broadcast %37 : vector<2x1x256xf32> to vector<2x4x256xf32>
    %87 = vector.broadcast %85 : vector<1x4x1xf32> to vector<2x4x256xf32>
    %88 = arith.mulf %86, %87 : vector<2x4x256xf32>
    %89 = arith.addf %83, %88 : vector<2x4x256xf32>
    %c0_32 = arith.constant 0 : index
    %c6 = arith.constant 6 : index
    %90 = vector.load %arg3[%c0_32, %c6] : memref<4x9xf32, #tpu.memory_space<vmem>>, vector<4x1xf32>
    %91 = vector.shape_cast %90 : vector<4x1xf32> to vector<1x4x1xf32>
    %92 = vector.broadcast %42 : vector<2x1x256xf32> to vector<2x4x256xf32>
    %93 = vector.broadcast %91 : vector<1x4x1xf32> to vector<2x4x256xf32>
    %94 = arith.mulf %92, %93 : vector<2x4x256xf32>
    %95 = arith.addf %89, %94 : vector<2x4x256xf32>
    %c0_33 = arith.constant 0 : index
    %c7 = arith.constant 7 : index
    %96 = vector.load %arg3[%c0_33, %c7] : memref<4x9xf32, #tpu.memory_space<vmem>>, vector<4x1xf32>
    %97 = vector.shape_cast %96 : vector<4x1xf32> to vector<1x4x1xf32>
    %98 = vector.broadcast %43 : vector<2x1x256xf32> to vector<2x4x256xf32>
    %99 = vector.broadcast %97 : vector<1x4x1xf32> to vector<2x4x256xf32>
    %100 = arith.mulf %98, %99 : vector<2x4x256xf32>
    %101 = arith.addf %95, %100 : vector<2x4x256xf32>
    %c0_34 = arith.constant 0 : index
    %c8 = arith.constant 8 : index
    %102 = vector.load %arg3[%c0_34, %c8] : memref<4x9xf32, #tpu.memory_space<vmem>>, vector<4x1xf32>
    %103 = vector.shape_cast %102 : vector<4x1xf32> to vector<1x4x1xf32>
    %104 = vector.broadcast %48 : vector<2x1x256xf32> to vector<2x4x256xf32>
    %105 = vector.broadcast %103 : vector<1x4x1xf32> to vector<2x4x256xf32>
    %106 = arith.mulf %104, %105 : vector<2x4x256xf32>
    %107 = arith.addf %101, %106 : vector<2x4x256xf32>
    %cst_35 = arith.constant -1.000000e+30 : f32
    %108 = vector.broadcast %cst_35 : f32 to vector<2x4x17xf32>
    %c0_36 = arith.constant 0 : index
    %c0_37 = arith.constant 0 : index
    %c0_38 = arith.constant 0 : index
    %109 = vector.load %arg19[%c0_36, %c0_37, %c0_38] : memref<2x16x290xf32, #tpu.memory_space<vmem>>, vector<2x4x17xf32>
    tpu.vector_store %arg19[%c0_36, %c0_37, %c0_38], %108 {strides = array<i32>} : memref<2x16x290xf32, #tpu.memory_space<vmem>>, vector<2x4x17xf32>,
    %c0_39 = arith.constant 0 : index
    %c0_40 = arith.constant 0 : index
    %c273_41 = arith.constant 273 : index
    %110 = vector.load %arg19[%c0_39, %c0_40, %c273_41] : memref<2x16x290xf32, #tpu.memory_space<vmem>>, vector<2x4x17xf32>
    tpu.vector_store %arg19[%c0_39, %c0_40, %c273_41], %108 {strides = array<i32>} : memref<2x16x290xf32, #tpu.memory_space<vmem>>, vector<2x4x17xf32>,
    %c0_42 = arith.constant 0 : index
    %c0_43 = arith.constant 0 : index
    %c17_44 = arith.constant 17 : index
    %111 = vector.load %arg19[%c0_42, %c0_43, %c17_44] : memref<2x16x290xf32, #tpu.memory_space<vmem>>, vector<2x4x256xf32>
    tpu.vector_store %arg19[%c0_42, %c0_43, %c17_44], %107 {strides = array<i32>} : memref<2x16x290xf32, #tpu.memory_space<vmem>>, vector<2x4x256xf32>,
    %c0_45 = arith.constant 0 : index
    %c0_46 = arith.constant 0 : index
    %c0_47 = arith.constant 0 : index
    %112 = vector.load %arg19[%c0_45, %c0_46, %c0_47] : memref<2x16x290xf32, #tpu.memory_space<vmem>>, vector<2x4x290xf32>
    %113 = vector.extract_strided_slice %112 {offsets = [0, 0, 0], sizes = [2, 4, 256], strides = [1, 1, 1]} : vector<2x4x290xf32> to vector<2x4x256xf32>
    %cst_48 = arith.constant -1.000000e+30 : f32
    %114 = vector.shape_cast %3 : vector<1x256xi1> to vector<1x1x256xi1>
    %115 = vector.broadcast %114 : vector<1x1x256xi1> to vector<2x4x256xi1>
    %116 = vector.broadcast %cst_48 : f32 to vector<2x4x256xf32>
    %117 = arith.select %115, %113, %116 : vector<2x4x256xi1>, vector<2x4x256xf32>
    %118 = vector.extract_strided_slice %112 {offsets = [0, 0, 1], sizes = [2, 4, 256], strides = [1, 1, 1]} : vector<2x4x290xf32> to vector<2x4x256xf32>
    %119 = vector.extract_strided_slice %112 {offsets = [0, 0, 2], sizes = [2, 4, 256], strides = [1, 1, 1]} : vector<2x4x290xf32> to vector<2x4x256xf32>
    %cst_49 = arith.constant -1.000000e+30 : f32
    %120 = vector.shape_cast %6 : vector<1x256xi1> to vector<1x1x256xi1>
    %121 = vector.broadcast %120 : vector<1x1x256xi1> to vector<2x4x256xi1>
    %122 = vector.broadcast %cst_49 : f32 to vector<2x4x256xf32>
    %123 = arith.select %121, %119, %122 : vector<2x4x256xi1>, vector<2x4x256xf32>
    %124 = vector.extract_strided_slice %112 {offsets = [0, 0, 16], sizes = [2, 4, 256], strides = [1, 1, 1]} : vector<2x4x290xf32> to vector<2x4x256xf32>
    %cst_50 = arith.constant -1.000000e+30 : f32
    %125 = vector.shape_cast %3 : vector<1x256xi1> to vector<1x1x256xi1>
    %126 = vector.broadcast %125 : vector<1x1x256xi1> to vector<2x4x256xi1>
    %127 = vector.broadcast %cst_50 : f32 to vector<2x4x256xf32>
    %128 = arith.select %126, %124, %127 : vector<2x4x256xi1>, vector<2x4x256xf32>
    %129 = vector.extract_strided_slice %112 {offsets = [0, 0, 17], sizes = [2, 4, 256], strides = [1, 1, 1]} : vector<2x4x290xf32> to vector<2x4x256xf32>
    %130 = vector.extract_strided_slice %112 {offsets = [0, 0, 18], sizes = [2, 4, 256], strides = [1, 1, 1]} : vector<2x4x290xf32> to vector<2x4x256xf32>
    %cst_51 = arith.constant -1.000000e+30 : f32
    %131 = vector.shape_cast %6 : vector<1x256xi1> to vector<1x1x256xi1>
    %132 = vector.broadcast %131 : vector<1x1x256xi1> to vector<2x4x256xi1>
    %133 = vector.broadcast %cst_51 : f32 to vector<2x4x256xf32>
    %134 = arith.select %132, %130, %133 : vector<2x4x256xi1>, vector<2x4x256xf32>
    %135 = vector.extract_strided_slice %112 {offsets = [0, 0, 32], sizes = [2, 4, 256], strides = [1, 1, 1]} : vector<2x4x290xf32> to vector<2x4x256xf32>
    %cst_52 = arith.constant -1.000000e+30 : f32
    %136 = vector.shape_cast %3 : vector<1x256xi1> to vector<1x1x256xi1>
    %137 = vector.broadcast %136 : vector<1x1x256xi1> to vector<2x4x256xi1>
    %138 = vector.broadcast %cst_52 : f32 to vector<2x4x256xf32>
    %139 = arith.select %137, %135, %138 : vector<2x4x256xi1>, vector<2x4x256xf32>
    %140 = vector.extract_strided_slice %112 {offsets = [0, 0, 33], sizes = [2, 4, 256], strides = [1, 1, 1]} : vector<2x4x290xf32> to vector<2x4x256xf32>
    %141 = vector.extract_strided_slice %112 {offsets = [0, 0, 34], sizes = [2, 4, 256], strides = [1, 1, 1]} : vector<2x4x290xf32> to vector<2x4x256xf32>
    %cst_53 = arith.constant -1.000000e+30 : f32
    %142 = vector.shape_cast %6 : vector<1x256xi1> to vector<1x1x256xi1>
    %143 = vector.broadcast %142 : vector<1x1x256xi1> to vector<2x4x256xi1>
    %144 = vector.broadcast %cst_53 : f32 to vector<2x4x256xf32>
    %145 = arith.select %143, %141, %144 : vector<2x4x256xi1>, vector<2x4x256xf32>
    %146 = arith.maximumf %117, %118 : vector<2x4x256xf32>
    %147 = arith.maximumf %146, %123 : vector<2x4x256xf32>
    %148 = arith.maximumf %147, %128 : vector<2x4x256xf32>
    %149 = arith.maximumf %148, %129 : vector<2x4x256xf32>
    %150 = arith.maximumf %149, %134 : vector<2x4x256xf32>
    %151 = arith.maximumf %150, %139 : vector<2x4x256xf32>
    %152 = arith.maximumf %151, %140 : vector<2x4x256xf32>
    %153 = arith.maximumf %152, %145 : vector<2x4x256xf32>
    %cst_54 = arith.constant 0.000000e+00 : f32
    %154 = vector.broadcast %cst_54 : f32 to vector<2x4x17xf32>
    %c0_55 = arith.constant 0 : index
    %c0_56 = arith.constant 0 : index
    %c0_57 = arith.constant 0 : index
    %155 = vector.load %arg18[%c0_55, %c0_56, %c0_57] : memref<2x4x290xf32, #tpu.memory_space<vmem>>, vector<2x4x17xf32>
    tpu.vector_store %arg18[%c0_55, %c0_56, %c0_57], %154 {strides = array<i32>} : memref<2x4x290xf32, #tpu.memory_space<vmem>>, vector<2x4x17xf32>,
    %c0_58 = arith.constant 0 : index
    %c0_59 = arith.constant 0 : index
    %c273_60 = arith.constant 273 : index
    %156 = vector.load %arg18[%c0_58, %c0_59, %c273_60] : memref<2x4x290xf32, #tpu.memory_space<vmem>>, vector<2x4x17xf32>
    tpu.vector_store %arg18[%c0_58, %c0_59, %c273_60], %154 {strides = array<i32>} : memref<2x4x290xf32, #tpu.memory_space<vmem>>, vector<2x4x17xf32>,
    %c0_61 = arith.constant 0 : index
    %c0_62 = arith.constant 0 : index
    %c17_63 = arith.constant 17 : index
    %157 = vector.load %arg18[%c0_61, %c0_62, %c17_63] : memref<2x4x290xf32, #tpu.memory_space<vmem>>, vector<2x4x256xf32>
    tpu.vector_store %arg18[%c0_61, %c0_62, %c17_63], %153 {strides = array<i32>} : memref<2x4x290xf32, #tpu.memory_space<vmem>>, vector<2x4x256xf32>,
    %c0_64 = arith.constant 0 : index
    %c0_65 = arith.constant 0 : index
    %c0_66 = arith.constant 0 : index
    %158 = vector.load %arg18[%c0_64, %c0_65, %c0_66] : memref<2x4x290xf32, #tpu.memory_space<vmem>>, vector<2x4x290xf32>
    %159 = vector.extract_strided_slice %158 {offsets = [0, 0, 0], sizes = [2, 4, 256], strides = [1, 1, 1]} : vector<2x4x290xf32> to vector<2x4x256xf32>
    %cst_67 = arith.constant 0.000000e+00 : f32
    %160 = vector.shape_cast %3 : vector<1x256xi1> to vector<1x1x256xi1>
    %161 = vector.broadcast %160 : vector<1x1x256xi1> to vector<2x4x256xi1>
    %162 = vector.broadcast %cst_67 : f32 to vector<2x4x256xf32>
    %163 = arith.select %161, %159, %162 : vector<2x4x256xi1>, vector<2x4x256xf32>
    %164 = vector.extract_strided_slice %158 {offsets = [0, 0, 1], sizes = [2, 4, 256], strides = [1, 1, 1]} : vector<2x4x290xf32> to vector<2x4x256xf32>
    %165 = vector.extract_strided_slice %158 {offsets = [0, 0, 2], sizes = [2, 4, 256], strides = [1, 1, 1]} : vector<2x4x290xf32> to vector<2x4x256xf32>
    %cst_68 = arith.constant 0.000000e+00 : f32
    %166 = vector.shape_cast %6 : vector<1x256xi1> to vector<1x1x256xi1>
    %167 = vector.broadcast %166 : vector<1x1x256xi1> to vector<2x4x256xi1>
    %168 = vector.broadcast %cst_68 : f32 to vector<2x4x256xf32>
    %169 = arith.select %167, %165, %168 : vector<2x4x256xi1>, vector<2x4x256xf32>
    %170 = vector.extract_strided_slice %158 {offsets = [0, 0, 16], sizes = [2, 4, 256], strides = [1, 1, 1]} : vector<2x4x290xf32> to vector<2x4x256xf32>
    %cst_69 = arith.constant 0.000000e+00 : f32
    %171 = vector.shape_cast %3 : vector<1x256xi1> to vector<1x1x256xi1>
    %172 = vector.broadcast %171 : vector<1x1x256xi1> to vector<2x4x256xi1>
    %173 = vector.broadcast %cst_69 : f32 to vector<2x4x256xf32>
    %174 = arith.select %172, %170, %173 : vector<2x4x256xi1>, vector<2x4x256xf32>
    %175 = vector.extract_strided_slice %158 {offsets = [0, 0, 17], sizes = [2, 4, 256], strides = [1, 1, 1]} : vector<2x4x290xf32> to vector<2x4x256xf32>
    %176 = vector.extract_strided_slice %158 {offsets = [0, 0, 18], sizes = [2, 4, 256], strides = [1, 1, 1]} : vector<2x4x290xf32> to vector<2x4x256xf32>
    %cst_70 = arith.constant 0.000000e+00 : f32
    %177 = vector.shape_cast %6 : vector<1x256xi1> to vector<1x1x256xi1>
    %178 = vector.broadcast %177 : vector<1x1x256xi1> to vector<2x4x256xi1>
    %179 = vector.broadcast %cst_70 : f32 to vector<2x4x256xf32>
    %180 = arith.select %178, %176, %179 : vector<2x4x256xi1>, vector<2x4x256xf32>
    %181 = vector.extract_strided_slice %158 {offsets = [0, 0, 32], sizes = [2, 4, 256], strides = [1, 1, 1]} : vector<2x4x290xf32> to vector<2x4x256xf32>
    %cst_71 = arith.constant 0.000000e+00 : f32
    %182 = vector.shape_cast %3 : vector<1x256xi1> to vector<1x1x256xi1>
    %183 = vector.broadcast %182 : vector<1x1x256xi1> to vector<2x4x256xi1>
    %184 = vector.broadcast %cst_71 : f32 to vector<2x4x256xf32>
    %185 = arith.select %183, %181, %184 : vector<2x4x256xi1>, vector<2x4x256xf32>
    %186 = vector.extract_strided_slice %158 {offsets = [0, 0, 33], sizes = [2, 4, 256], strides = [1, 1, 1]} : vector<2x4x290xf32> to vector<2x4x256xf32>
    %187 = vector.extract_strided_slice %158 {offsets = [0, 0, 34], sizes = [2, 4, 256], strides = [1, 1, 1]} : vector<2x4x290xf32> to vector<2x4x256xf32>
    %cst_72 = arith.constant 0.000000e+00 : f32
    %188 = vector.shape_cast %6 : vector<1x256xi1> to vector<1x1x256xi1>
    %189 = vector.broadcast %188 : vector<1x1x256xi1> to vector<2x4x256xi1>
    %190 = vector.broadcast %cst_72 : f32 to vector<2x4x256xf32>
    %191 = arith.select %189, %187, %190 : vector<2x4x256xi1>, vector<2x4x256xf32>
    %cst_73 = arith.constant 0.000000e+00 : f32
    %192 = vector.broadcast %cst_73 : f32 to vector<2x16x256xf32>
    %c0_74 = arith.constant 0 : index
    %c0_75 = arith.constant 0 : index
    %193 = vector.load %arg6[%c0_74, %c0_75] : memref<16x1xf32, #tpu.memory_space<vmem>>, vector<16x1xf32>
    %194 = vector.shape_cast %193 : vector<16x1xf32> to vector<1x16x1xf32>
    %195 = vector.broadcast %194 : vector<1x16x1xf32> to vector<2x16x256xf32>
    %196 = arith.addf %192, %195 : vector<2x16x256xf32>
    %c0_76 = arith.constant 0 : index
    %c0_77 = arith.constant 0 : index
    %c0_78 = arith.constant 0 : index
    %197 = vector.load %arg5[%c0_76, %c0_77, %c0_78] : memref<9x16x4xf32, #tpu.memory_space<vmem>>, vector<1x16x4xf32>
    %198 = vector.shape_cast %197 : vector<1x16x4xf32> to vector<16x4xf32>
    %199 = vector.shape_cast %198 : vector<16x4xf32> to vector<1x16x4xf32>
    %200 = vector.broadcast %199 : vector<1x16x4xf32> to vector<2x16x4xf32>
    %cst_79 = arith.constant dense<0.000000e+00> : vector<2x16x256xf32>
    %201 = tpu.matmul %200, %163, %cst_79 {dimension_numbers = #tpu.dot_dimension_numbers<[2], [1], [1], [2], [0, 0, 0, 1, 1, 2], [0], [0]>} : vector<2x16x4xf32>, vector<2x4x256xf32>, vector<2x16x256xf32> -> vector<2x16x256xf32>
    %202 = arith.addf %196, %201 : vector<2x16x256xf32>
    %c1_80 = arith.constant 1 : index
    %c0_81 = arith.constant 0 : index
    %c0_82 = arith.constant 0 : index
    %203 = vector.load %arg5[%c1_80, %c0_81, %c0_82] : memref<9x16x4xf32, #tpu.memory_space<vmem>>, vector<1x16x4xf32>
    %204 = vector.shape_cast %203 : vector<1x16x4xf32> to vector<16x4xf32>
    %205 = vector.shape_cast %204 : vector<16x4xf32> to vector<1x16x4xf32>
    %206 = vector.broadcast %205 : vector<1x16x4xf32> to vector<2x16x4xf32>
    %cst_83 = arith.constant dense<0.000000e+00> : vector<2x16x256xf32>
    %207 = tpu.matmul %206, %164, %cst_83 {dimension_numbers = #tpu.dot_dimension_numbers<[2], [1], [1], [2], [0, 0, 0, 1, 1, 2], [0], [0]>} : vector<2x16x4xf32>, vector<2x4x256xf32>, vector<2x16x256xf32> -> vector<2x16x256xf32>
    %208 = arith.addf %202, %207 : vector<2x16x256xf32>
    %c2_84 = arith.constant 2 : index
    %c0_85 = arith.constant 0 : index
    %c0_86 = arith.constant 0 : index
    %209 = vector.load %arg5[%c2_84, %c0_85, %c0_86] : memref<9x16x4xf32, #tpu.memory_space<vmem>>, vector<1x16x4xf32>
    %210 = vector.shape_cast %209 : vector<1x16x4xf32> to vector<16x4xf32>
    %211 = vector.shape_cast %210 : vector<16x4xf32> to vector<1x16x4xf32>
    %212 = vector.broadcast %211 : vector<1x16x4xf32> to vector<2x16x4xf32>
    %cst_87 = arith.constant dense<0.000000e+00> : vector<2x16x256xf32>
    %213 = tpu.matmul %212, %169, %cst_87 {dimension_numbers = #tpu.dot_dimension_numbers<[2], [1], [1], [2], [0, 0, 0, 1, 1, 2], [0], [0]>} : vector<2x16x4xf32>, vector<2x4x256xf32>, vector<2x16x256xf32> -> vector<2x16x256xf32>
    %214 = arith.addf %208, %213 : vector<2x16x256xf32>
    %c3_88 = arith.constant 3 : index
    %c0_89 = arith.constant 0 : index
    %c0_90 = arith.constant 0 : index
    %215 = vector.load %arg5[%c3_88, %c0_89, %c0_90] : memref<9x16x4xf32, #tpu.memory_space<vmem>>, vector<1x16x4xf32>
    %216 = vector.shape_cast %215 : vector<1x16x4xf32> to vector<16x4xf32>
    %217 = vector.shape_cast %216 : vector<16x4xf32> to vector<1x16x4xf32>
    %218 = vector.broadcast %217 : vector<1x16x4xf32> to vector<2x16x4xf32>
    %cst_91 = arith.constant dense<0.000000e+00> : vector<2x16x256xf32>
    %219 = tpu.matmul %218, %174, %cst_91 {dimension_numbers = #tpu.dot_dimension_numbers<[2], [1], [1], [2], [0, 0, 0, 1, 1, 2], [0], [0]>} : vector<2x16x4xf32>, vector<2x4x256xf32>, vector<2x16x256xf32> -> vector<2x16x256xf32>
    %220 = arith.addf %214, %219 : vector<2x16x256xf32>
    %c4_92 = arith.constant 4 : index
    %c0_93 = arith.constant 0 : index
    %c0_94 = arith.constant 0 : index
    %221 = vector.load %arg5[%c4_92, %c0_93, %c0_94] : memref<9x16x4xf32, #tpu.memory_space<vmem>>, vector<1x16x4xf32>
    %222 = vector.shape_cast %221 : vector<1x16x4xf32> to vector<16x4xf32>
    %223 = vector.shape_cast %222 : vector<16x4xf32> to vector<1x16x4xf32>
    %224 = vector.broadcast %223 : vector<1x16x4xf32> to vector<2x16x4xf32>
    %cst_95 = arith.constant dense<0.000000e+00> : vector<2x16x256xf32>
    %225 = tpu.matmul %224, %175, %cst_95 {dimension_numbers = #tpu.dot_dimension_numbers<[2], [1], [1], [2], [0, 0, 0, 1, 1, 2], [0], [0]>} : vector<2x16x4xf32>, vector<2x4x256xf32>, vector<2x16x256xf32> -> vector<2x16x256xf32>
    %226 = arith.addf %220, %225 : vector<2x16x256xf32>
    %c5_96 = arith.constant 5 : index
    %c0_97 = arith.constant 0 : index
    %c0_98 = arith.constant 0 : index
    %227 = vector.load %arg5[%c5_96, %c0_97, %c0_98] : memref<9x16x4xf32, #tpu.memory_space<vmem>>, vector<1x16x4xf32>
    %228 = vector.shape_cast %227 : vector<1x16x4xf32> to vector<16x4xf32>
    %229 = vector.shape_cast %228 : vector<16x4xf32> to vector<1x16x4xf32>
    %230 = vector.broadcast %229 : vector<1x16x4xf32> to vector<2x16x4xf32>
    %cst_99 = arith.constant dense<0.000000e+00> : vector<2x16x256xf32>
    %231 = tpu.matmul %230, %180, %cst_99 {dimension_numbers = #tpu.dot_dimension_numbers<[2], [1], [1], [2], [0, 0, 0, 1, 1, 2], [0], [0]>} : vector<2x16x4xf32>, vector<2x4x256xf32>, vector<2x16x256xf32> -> vector<2x16x256xf32>
    %232 = arith.addf %226, %231 : vector<2x16x256xf32>
    %c6_100 = arith.constant 6 : index
    %c0_101 = arith.constant 0 : index
    %c0_102 = arith.constant 0 : index
    %233 = vector.load %arg5[%c6_100, %c0_101, %c0_102] : memref<9x16x4xf32, #tpu.memory_space<vmem>>, vector<1x16x4xf32>
    %234 = vector.shape_cast %233 : vector<1x16x4xf32> to vector<16x4xf32>
    %235 = vector.shape_cast %234 : vector<16x4xf32> to vector<1x16x4xf32>
    %236 = vector.broadcast %235 : vector<1x16x4xf32> to vector<2x16x4xf32>
    %cst_103 = arith.constant dense<0.000000e+00> : vector<2x16x256xf32>
    %237 = tpu.matmul %236, %185, %cst_103 {dimension_numbers = #tpu.dot_dimension_numbers<[2], [1], [1], [2], [0, 0, 0, 1, 1, 2], [0], [0]>} : vector<2x16x4xf32>, vector<2x4x256xf32>, vector<2x16x256xf32> -> vector<2x16x256xf32>
    %238 = arith.addf %232, %237 : vector<2x16x256xf32>
    %c7_104 = arith.constant 7 : index
    %c0_105 = arith.constant 0 : index
    %c0_106 = arith.constant 0 : index
    %239 = vector.load %arg5[%c7_104, %c0_105, %c0_106] : memref<9x16x4xf32, #tpu.memory_space<vmem>>, vector<1x16x4xf32>
    %240 = vector.shape_cast %239 : vector<1x16x4xf32> to vector<16x4xf32>
    %241 = vector.shape_cast %240 : vector<16x4xf32> to vector<1x16x4xf32>
    %242 = vector.broadcast %241 : vector<1x16x4xf32> to vector<2x16x4xf32>
    %cst_107 = arith.constant dense<0.000000e+00> : vector<2x16x256xf32>
    %243 = tpu.matmul %242, %186, %cst_107 {dimension_numbers = #tpu.dot_dimension_numbers<[2], [1], [1], [2], [0, 0, 0, 1, 1, 2], [0], [0]>} : vector<2x16x4xf32>, vector<2x4x256xf32>, vector<2x16x256xf32> -> vector<2x16x256xf32>
    %244 = arith.addf %238, %243 : vector<2x16x256xf32>
    %c8_108 = arith.constant 8 : index
    %c0_109 = arith.constant 0 : index
    %c0_110 = arith.constant 0 : index
    %245 = vector.load %arg5[%c8_108, %c0_109, %c0_110] : memref<9x16x4xf32, #tpu.memory_space<vmem>>, vector<1x16x4xf32>
    %246 = vector.shape_cast %245 : vector<1x16x4xf32> to vector<16x4xf32>
    %247 = vector.shape_cast %246 : vector<16x4xf32> to vector<1x16x4xf32>
    %248 = vector.broadcast %247 : vector<1x16x4xf32> to vector<2x16x4xf32>
    %cst_111 = arith.constant dense<0.000000e+00> : vector<2x16x256xf32>
    %249 = tpu.matmul %248, %191, %cst_111 {dimension_numbers = #tpu.dot_dimension_numbers<[2], [1], [1], [2], [0, 0, 0, 1, 1, 2], [0], [0]>} : vector<2x16x4xf32>, vector<2x4x256xf32>, vector<2x16x256xf32> -> vector<2x16x256xf32>
    %250 = arith.addf %244, %249 : vector<2x16x256xf32>
    %cst_112 = arith.constant -1.000000e+30 : f32
    %251 = vector.broadcast %cst_112 : f32 to vector<2x16x17xf32>
    %c0_113 = arith.constant 0 : index
    %c0_114 = arith.constant 0 : index
    %c0_115 = arith.constant 0 : index
    %252 = vector.load %arg19[%c0_113, %c0_114, %c0_115] : memref<2x16x290xf32, #tpu.memory_space<vmem>>, vector<2x16x17xf32>
    tpu.vector_store %arg19[%c0_113, %c0_114, %c0_115], %251 {strides = array<i32>} : memref<2x16x290xf32, #tpu.memory_space<vmem>>, vector<2x16x17xf32>,
    %c0_116 = arith.constant 0 : index
    %c0_117 = arith.constant 0 : index
    %c273_118 = arith.constant 273 : index
    %253 = vector.load %arg19[%c0_116, %c0_117, %c273_118] : memref<2x16x290xf32, #tpu.memory_space<vmem>>, vector<2x16x17xf32>
    tpu.vector_store %arg19[%c0_116, %c0_117, %c273_118], %251 {strides = array<i32>} : memref<2x16x290xf32, #tpu.memory_space<vmem>>, vector<2x16x17xf32>,
    %c0_119 = arith.constant 0 : index
    %c0_120 = arith.constant 0 : index
    %c17_121 = arith.constant 17 : index
    %254 = vector.load %arg19[%c0_119, %c0_120, %c17_121] : memref<2x16x290xf32, #tpu.memory_space<vmem>>, vector<2x16x256xf32>
    tpu.vector_store %arg19[%c0_119, %c0_120, %c17_121], %250 {strides = array<i32>} : memref<2x16x290xf32, #tpu.memory_space<vmem>>, vector<2x16x256xf32>,
    %c0_122 = arith.constant 0 : index
    %c0_123 = arith.constant 0 : index
    %c0_124 = arith.constant 0 : index
    %255 = vector.load %arg19[%c0_122, %c0_123, %c0_124] : memref<2x16x290xf32, #tpu.memory_space<vmem>>, vector<2x16x290xf32>
    %256 = vector.extract_strided_slice %255 {offsets = [0, 0, 0], sizes = [2, 16, 256], strides = [1, 1, 1]} : vector<2x16x290xf32> to vector<2x16x256xf32>
    %cst_125 = arith.constant -1.000000e+30 : f32
    %257 = vector.shape_cast %3 : vector<1x256xi1> to vector<1x1x256xi1>
    %258 = vector.broadcast %257 : vector<1x1x256xi1> to vector<2x16x256xi1>
    %259 = vector.broadcast %cst_125 : f32 to vector<2x16x256xf32>
    %260 = arith.select %258, %256, %259 : vector<2x16x256xi1>, vector<2x16x256xf32>
    %261 = vector.extract_strided_slice %255 {offsets = [0, 0, 1], sizes = [2, 16, 256], strides = [1, 1, 1]} : vector<2x16x290xf32> to vector<2x16x256xf32>
    %262 = vector.extract_strided_slice %255 {offsets = [0, 0, 2], sizes = [2, 16, 256], strides = [1, 1, 1]} : vector<2x16x290xf32> to vector<2x16x256xf32>
    %cst_126 = arith.constant -1.000000e+30 : f32
    %263 = vector.shape_cast %6 : vector<1x256xi1> to vector<1x1x256xi1>
    %264 = vector.broadcast %263 : vector<1x1x256xi1> to vector<2x16x256xi1>
    %265 = vector.broadcast %cst_126 : f32 to vector<2x16x256xf32>
    %266 = arith.select %264, %262, %265 : vector<2x16x256xi1>, vector<2x16x256xf32>
    %267 = vector.extract_strided_slice %255 {offsets = [0, 0, 16], sizes = [2, 16, 256], strides = [1, 1, 1]} : vector<2x16x290xf32> to vector<2x16x256xf32>
    %cst_127 = arith.constant -1.000000e+30 : f32
    %268 = vector.shape_cast %3 : vector<1x256xi1> to vector<1x1x256xi1>
    %269 = vector.broadcast %268 : vector<1x1x256xi1> to vector<2x16x256xi1>
    %270 = vector.broadcast %cst_127 : f32 to vector<2x16x256xf32>
    %271 = arith.select %269, %267, %270 : vector<2x16x256xi1>, vector<2x16x256xf32>
    %272 = vector.extract_strided_slice %255 {offsets = [0, 0, 17], sizes = [2, 16, 256], strides = [1, 1, 1]} : vector<2x16x290xf32> to vector<2x16x256xf32>
    %273 = vector.extract_strided_slice %255 {offsets = [0, 0, 18], sizes = [2, 16, 256], strides = [1, 1, 1]} : vector<2x16x290xf32> to vector<2x16x256xf32>
    %cst_128 = arith.constant -1.000000e+30 : f32
    %274 = vector.shape_cast %6 : vector<1x256xi1> to vector<1x1x256xi1>
    %275 = vector.broadcast %274 : vector<1x1x256xi1> to vector<2x16x256xi1>
    %276 = vector.broadcast %cst_128 : f32 to vector<2x16x256xf32>
    %277 = arith.select %275, %273, %276 : vector<2x16x256xi1>, vector<2x16x256xf32>
    %278 = vector.extract_strided_slice %255 {offsets = [0, 0, 32], sizes = [2, 16, 256], strides = [1, 1, 1]} : vector<2x16x290xf32> to vector<2x16x256xf32>
    %cst_129 = arith.constant -1.000000e+30 : f32
    %279 = vector.shape_cast %3 : vector<1x256xi1> to vector<1x1x256xi1>
    %280 = vector.broadcast %279 : vector<1x1x256xi1> to vector<2x16x256xi1>
    %281 = vector.broadcast %cst_129 : f32 to vector<2x16x256xf32>
    %282 = arith.select %280, %278, %281 : vector<2x16x256xi1>, vector<2x16x256xf32>
    %283 = vector.extract_strided_slice %255 {offsets = [0, 0, 33], sizes = [2, 16, 256], strides = [1, 1, 1]} : vector<2x16x290xf32> to vector<2x16x256xf32>
    %284 = vector.extract_strided_slice %255 {offsets = [0, 0, 34], sizes = [2, 16, 256], strides = [1, 1, 1]} : vector<2x16x290xf32> to vector<2x16x256xf32>
    %cst_130 = arith.constant -1.000000e+30 : f32
    %285 = vector.shape_cast %6 : vector<1x256xi1> to vector<1x1x256xi1>
    %286 = vector.broadcast %285 : vector<1x1x256xi1> to vector<2x16x256xi1>
    %287 = vector.broadcast %cst_130 : f32 to vector<2x16x256xf32>
    %288 = arith.select %286, %284, %287 : vector<2x16x256xi1>, vector<2x16x256xf32>
    %289 = arith.maximumf %260, %261 : vector<2x16x256xf32>
    %290 = arith.maximumf %289, %266 : vector<2x16x256xf32>
    %291 = arith.maximumf %290, %271 : vector<2x16x256xf32>
    %292 = arith.maximumf %291, %272 : vector<2x16x256xf32>
    %293 = arith.maximumf %292, %277 : vector<2x16x256xf32>
    %294 = arith.maximumf %293, %282 : vector<2x16x256xf32>
    %295 = arith.maximumf %294, %283 : vector<2x16x256xf32>
    %296 = arith.maximumf %295, %288 : vector<2x16x256xf32>
    %cst_131 = arith.constant 0.000000e+00 : f32
    %297 = vector.broadcast %cst_131 : f32 to vector<2x128xf32>
    %c0_132 = arith.constant 0 : index
    %c0_133 = arith.constant 0 : index
    %298 = vector.load %arg8[%c0_132, %c0_133] : memref<1x128xf32, #tpu.memory_space<vmem>>, vector<1x128xf32>
    %299 = vector.broadcast %298 : vector<1x128xf32> to vector<2x128xf32>
    %300 = arith.addf %297, %299 : vector<2x128xf32>
    %301 = vector.extract_strided_slice %296 {offsets = [0, 0, 0], sizes = [2, 1, 256], strides = [1, 1, 1]} : vector<2x16x256xf32> to vector<2x1x256xf32>
    %302 = vector.shape_cast %301 : vector<2x1x256xf32> to vector<2x256xf32>
    %c0_134 = arith.constant 0 : index
    %c0_135 = arith.constant 0 : index
    %c0_136 = arith.constant 0 : index
    %303 = vector.load %arg7[%c0_134, %c0_135, %c0_136] : memref<16x256x128xf32, #tpu.memory_space<vmem>>, vector<1x256x128xf32>
    %304 = vector.shape_cast %303 : vector<1x256x128xf32> to vector<256x128xf32>
    %cst_137 = arith.constant dense<0.000000e+00> : vector<2x128xf32>
    %305 = tpu.matmul %302, %304, %cst_137 {dimension_numbers = #tpu.dot_dimension_numbers<[1], [0], [0], [1], [0, 0, 1, 1], [], []>} : vector<2x256xf32>, vector<256x128xf32>, vector<2x128xf32> -> vector<2x128xf32>
    %306 = arith.addf %300, %305 : vector<2x128xf32>
    %307 = vector.extract_strided_slice %296 {offsets = [0, 1, 0], sizes = [2, 1, 256], strides = [1, 1, 1]} : vector<2x16x256xf32> to vector<2x1x256xf32>
    %308 = vector.shape_cast %307 : vector<2x1x256xf32> to vector<2x256xf32>
    %c1_138 = arith.constant 1 : index
    %c0_139 = arith.constant 0 : index
    %c0_140 = arith.constant 0 : index
    %309 = vector.load %arg7[%c1_138, %c0_139, %c0_140] : memref<16x256x128xf32, #tpu.memory_space<vmem>>, vector<1x256x128xf32>
    %310 = vector.shape_cast %309 : vector<1x256x128xf32> to vector<256x128xf32>
    %cst_141 = arith.constant dense<0.000000e+00> : vector<2x128xf32>
    %311 = tpu.matmul %308, %310, %cst_141 {dimension_numbers = #tpu.dot_dimension_numbers<[1], [0], [0], [1], [0, 0, 1, 1], [], []>} : vector<2x256xf32>, vector<256x128xf32>, vector<2x128xf32> -> vector<2x128xf32>
    %312 = arith.addf %306, %311 : vector<2x128xf32>
    %313 = vector.extract_strided_slice %296 {offsets = [0, 2, 0], sizes = [2, 1, 256], strides = [1, 1, 1]} : vector<2x16x256xf32> to vector<2x1x256xf32>
    %314 = vector.shape_cast %313 : vector<2x1x256xf32> to vector<2x256xf32>
    %c2_142 = arith.constant 2 : index
    %c0_143 = arith.constant 0 : index
    %c0_144 = arith.constant 0 : index
    %315 = vector.load %arg7[%c2_142, %c0_143, %c0_144] : memref<16x256x128xf32, #tpu.memory_space<vmem>>, vector<1x256x128xf32>
    %316 = vector.shape_cast %315 : vector<1x256x128xf32> to vector<256x128xf32>
    %cst_145 = arith.constant dense<0.000000e+00> : vector<2x128xf32>
    %317 = tpu.matmul %314, %316, %cst_145 {dimension_numbers = #tpu.dot_dimension_numbers<[1], [0], [0], [1], [0, 0, 1, 1], [], []>} : vector<2x256xf32>, vector<256x128xf32>, vector<2x128xf32> -> vector<2x128xf32>
    %318 = arith.addf %312, %317 : vector<2x128xf32>
    %319 = vector.extract_strided_slice %296 {offsets = [0, 3, 0], sizes = [2, 1, 256], strides = [1, 1, 1]} : vector<2x16x256xf32> to vector<2x1x256xf32>
    %320 = vector.shape_cast %319 : vector<2x1x256xf32> to vector<2x256xf32>
    %c3_146 = arith.constant 3 : index
    %c0_147 = arith.constant 0 : index
    %c0_148 = arith.constant 0 : index
    %321 = vector.load %arg7[%c3_146, %c0_147, %c0_148] : memref<16x256x128xf32, #tpu.memory_space<vmem>>, vector<1x256x128xf32>
    %322 = vector.shape_cast %321 : vector<1x256x128xf32> to vector<256x128xf32>
    %cst_149 = arith.constant dense<0.000000e+00> : vector<2x128xf32>
    %323 = tpu.matmul %320, %322, %cst_149 {dimension_numbers = #tpu.dot_dimension_numbers<[1], [0], [0], [1], [0, 0, 1, 1], [], []>} : vector<2x256xf32>, vector<256x128xf32>, vector<2x128xf32> -> vector<2x128xf32>
    %324 = arith.addf %318, %323 : vector<2x128xf32>
    %325 = vector.extract_strided_slice %296 {offsets = [0, 4, 0], sizes = [2, 1, 256], strides = [1, 1, 1]} : vector<2x16x256xf32> to vector<2x1x256xf32>
    %326 = vector.shape_cast %325 : vector<2x1x256xf32> to vector<2x256xf32>
    %c4_150 = arith.constant 4 : index
    %c0_151 = arith.constant 0 : index
    %c0_152 = arith.constant 0 : index
    %327 = vector.load %arg7[%c4_150, %c0_151, %c0_152] : memref<16x256x128xf32, #tpu.memory_space<vmem>>, vector<1x256x128xf32>
    %328 = vector.shape_cast %327 : vector<1x256x128xf32> to vector<256x128xf32>
    %cst_153 = arith.constant dense<0.000000e+00> : vector<2x128xf32>
    %329 = tpu.matmul %326, %328, %cst_153 {dimension_numbers = #tpu.dot_dimension_numbers<[1], [0], [0], [1], [0, 0, 1, 1], [], []>} : vector<2x256xf32>, vector<256x128xf32>, vector<2x128xf32> -> vector<2x128xf32>
    %330 = arith.addf %324, %329 : vector<2x128xf32>
    %331 = vector.extract_strided_slice %296 {offsets = [0, 5, 0], sizes = [2, 1, 256], strides = [1, 1, 1]} : vector<2x16x256xf32> to vector<2x1x256xf32>
    %332 = vector.shape_cast %331 : vector<2x1x256xf32> to vector<2x256xf32>
    %c5_154 = arith.constant 5 : index
    %c0_155 = arith.constant 0 : index
    %c0_156 = arith.constant 0 : index
    %333 = vector.load %arg7[%c5_154, %c0_155, %c0_156] : memref<16x256x128xf32, #tpu.memory_space<vmem>>, vector<1x256x128xf32>
    %334 = vector.shape_cast %333 : vector<1x256x128xf32> to vector<256x128xf32>
    %cst_157 = arith.constant dense<0.000000e+00> : vector<2x128xf32>
    %335 = tpu.matmul %332, %334, %cst_157 {dimension_numbers = #tpu.dot_dimension_numbers<[1], [0], [0], [1], [0, 0, 1, 1], [], []>} : vector<2x256xf32>, vector<256x128xf32>, vector<2x128xf32> -> vector<2x128xf32>
    %336 = arith.addf %330, %335 : vector<2x128xf32>
    %337 = vector.extract_strided_slice %296 {offsets = [0, 6, 0], sizes = [2, 1, 256], strides = [1, 1, 1]} : vector<2x16x256xf32> to vector<2x1x256xf32>
    %338 = vector.shape_cast %337 : vector<2x1x256xf32> to vector<2x256xf32>
    %c6_158 = arith.constant 6 : index
    %c0_159 = arith.constant 0 : index
    %c0_160 = arith.constant 0 : index
    %339 = vector.load %arg7[%c6_158, %c0_159, %c0_160] : memref<16x256x128xf32, #tpu.memory_space<vmem>>, vector<1x256x128xf32>
    %340 = vector.shape_cast %339 : vector<1x256x128xf32> to vector<256x128xf32>
    %cst_161 = arith.constant dense<0.000000e+00> : vector<2x128xf32>
    %341 = tpu.matmul %338, %340, %cst_161 {dimension_numbers = #tpu.dot_dimension_numbers<[1], [0], [0], [1], [0, 0, 1, 1], [], []>} : vector<2x256xf32>, vector<256x128xf32>, vector<2x128xf32> -> vector<2x128xf32>
    %342 = arith.addf %336, %341 : vector<2x128xf32>
    %343 = vector.extract_strided_slice %296 {offsets = [0, 7, 0], sizes = [2, 1, 256], strides = [1, 1, 1]} : vector<2x16x256xf32> to vector<2x1x256xf32>
    %344 = vector.shape_cast %343 : vector<2x1x256xf32> to vector<2x256xf32>
    %c7_162 = arith.constant 7 : index
    %c0_163 = arith.constant 0 : index
    %c0_164 = arith.constant 0 : index
    %345 = vector.load %arg7[%c7_162, %c0_163, %c0_164] : memref<16x256x128xf32, #tpu.memory_space<vmem>>, vector<1x256x128xf32>
    %346 = vector.shape_cast %345 : vector<1x256x128xf32> to vector<256x128xf32>
    %cst_165 = arith.constant dense<0.000000e+00> : vector<2x128xf32>
    %347 = tpu.matmul %344, %346, %cst_165 {dimension_numbers = #tpu.dot_dimension_numbers<[1], [0], [0], [1], [0, 0, 1, 1], [], []>} : vector<2x256xf32>, vector<256x128xf32>, vector<2x128xf32> -> vector<2x128xf32>
    %348 = arith.addf %342, %347 : vector<2x128xf32>
    %349 = vector.extract_strided_slice %296 {offsets = [0, 8, 0], sizes = [2, 1, 256], strides = [1, 1, 1]} : vector<2x16x256xf32> to vector<2x1x256xf32>
    %350 = vector.shape_cast %349 : vector<2x1x256xf32> to vector<2x256xf32>
    %c8_166 = arith.constant 8 : index
    %c0_167 = arith.constant 0 : index
    %c0_168 = arith.constant 0 : index
    %351 = vector.load %arg7[%c8_166, %c0_167, %c0_168] : memref<16x256x128xf32, #tpu.memory_space<vmem>>, vector<1x256x128xf32>
    %352 = vector.shape_cast %351 : vector<1x256x128xf32> to vector<256x128xf32>
    %cst_169 = arith.constant dense<0.000000e+00> : vector<2x128xf32>
    %353 = tpu.matmul %350, %352, %cst_169 {dimension_numbers = #tpu.dot_dimension_numbers<[1], [0], [0], [1], [0, 0, 1, 1], [], []>} : vector<2x256xf32>, vector<256x128xf32>, vector<2x128xf32> -> vector<2x128xf32>
    %354 = arith.addf %348, %353 : vector<2x128xf32>
    %355 = vector.extract_strided_slice %296 {offsets = [0, 9, 0], sizes = [2, 1, 256], strides = [1, 1, 1]} : vector<2x16x256xf32> to vector<2x1x256xf32>
    %356 = vector.shape_cast %355 : vector<2x1x256xf32> to vector<2x256xf32>
    %c9 = arith.constant 9 : index
    %c0_170 = arith.constant 0 : index
    %c0_171 = arith.constant 0 : index
    %357 = vector.load %arg7[%c9, %c0_170, %c0_171] : memref<16x256x128xf32, #tpu.memory_space<vmem>>, vector<1x256x128xf32>
    %358 = vector.shape_cast %357 : vector<1x256x128xf32> to vector<256x128xf32>
    %cst_172 = arith.constant dense<0.000000e+00> : vector<2x128xf32>
    %359 = tpu.matmul %356, %358, %cst_172 {dimension_numbers = #tpu.dot_dimension_numbers<[1], [0], [0], [1], [0, 0, 1, 1], [], []>} : vector<2x256xf32>, vector<256x128xf32>, vector<2x128xf32> -> vector<2x128xf32>
    %360 = arith.addf %354, %359 : vector<2x128xf32>
    %361 = vector.extract_strided_slice %296 {offsets = [0, 10, 0], sizes = [2, 1, 256], strides = [1, 1, 1]} : vector<2x16x256xf32> to vector<2x1x256xf32>
    %362 = vector.shape_cast %361 : vector<2x1x256xf32> to vector<2x256xf32>
    %c10 = arith.constant 10 : index
    %c0_173 = arith.constant 0 : index
    %c0_174 = arith.constant 0 : index
    %363 = vector.load %arg7[%c10, %c0_173, %c0_174] : memref<16x256x128xf32, #tpu.memory_space<vmem>>, vector<1x256x128xf32>
    %364 = vector.shape_cast %363 : vector<1x256x128xf32> to vector<256x128xf32>
    %cst_175 = arith.constant dense<0.000000e+00> : vector<2x128xf32>
    %365 = tpu.matmul %362, %364, %cst_175 {dimension_numbers = #tpu.dot_dimension_numbers<[1], [0], [0], [1], [0, 0, 1, 1], [], []>} : vector<2x256xf32>, vector<256x128xf32>, vector<2x128xf32> -> vector<2x128xf32>
    %366 = arith.addf %360, %365 : vector<2x128xf32>
    %367 = vector.extract_strided_slice %296 {offsets = [0, 11, 0], sizes = [2, 1, 256], strides = [1, 1, 1]} : vector<2x16x256xf32> to vector<2x1x256xf32>
    %368 = vector.shape_cast %367 : vector<2x1x256xf32> to vector<2x256xf32>
    %c11 = arith.constant 11 : index
    %c0_176 = arith.constant 0 : index
    %c0_177 = arith.constant 0 : index
    %369 = vector.load %arg7[%c11, %c0_176, %c0_177] : memref<16x256x128xf32, #tpu.memory_space<vmem>>, vector<1x256x128xf32>
    %370 = vector.shape_cast %369 : vector<1x256x128xf32> to vector<256x128xf32>
    %cst_178 = arith.constant dense<0.000000e+00> : vector<2x128xf32>
    %371 = tpu.matmul %368, %370, %cst_178 {dimension_numbers = #tpu.dot_dimension_numbers<[1], [0], [0], [1], [0, 0, 1, 1], [], []>} : vector<2x256xf32>, vector<256x128xf32>, vector<2x128xf32> -> vector<2x128xf32>
    %372 = arith.addf %366, %371 : vector<2x128xf32>
    %373 = vector.extract_strided_slice %296 {offsets = [0, 12, 0], sizes = [2, 1, 256], strides = [1, 1, 1]} : vector<2x16x256xf32> to vector<2x1x256xf32>
    %374 = vector.shape_cast %373 : vector<2x1x256xf32> to vector<2x256xf32>
    %c12 = arith.constant 12 : index
    %c0_179 = arith.constant 0 : index
    %c0_180 = arith.constant 0 : index
    %375 = vector.load %arg7[%c12, %c0_179, %c0_180] : memref<16x256x128xf32, #tpu.memory_space<vmem>>, vector<1x256x128xf32>
    %376 = vector.shape_cast %375 : vector<1x256x128xf32> to vector<256x128xf32>
    %cst_181 = arith.constant dense<0.000000e+00> : vector<2x128xf32>
    %377 = tpu.matmul %374, %376, %cst_181 {dimension_numbers = #tpu.dot_dimension_numbers<[1], [0], [0], [1], [0, 0, 1, 1], [], []>} : vector<2x256xf32>, vector<256x128xf32>, vector<2x128xf32> -> vector<2x128xf32>
    %378 = arith.addf %372, %377 : vector<2x128xf32>
    %379 = vector.extract_strided_slice %296 {offsets = [0, 13, 0], sizes = [2, 1, 256], strides = [1, 1, 1]} : vector<2x16x256xf32> to vector<2x1x256xf32>
    %380 = vector.shape_cast %379 : vector<2x1x256xf32> to vector<2x256xf32>
    %c13 = arith.constant 13 : index
    %c0_182 = arith.constant 0 : index
    %c0_183 = arith.constant 0 : index
    %381 = vector.load %arg7[%c13, %c0_182, %c0_183] : memref<16x256x128xf32, #tpu.memory_space<vmem>>, vector<1x256x128xf32>
    %382 = vector.shape_cast %381 : vector<1x256x128xf32> to vector<256x128xf32>
    %cst_184 = arith.constant dense<0.000000e+00> : vector<2x128xf32>
    %383 = tpu.matmul %380, %382, %cst_184 {dimension_numbers = #tpu.dot_dimension_numbers<[1], [0], [0], [1], [0, 0, 1, 1], [], []>} : vector<2x256xf32>, vector<256x128xf32>, vector<2x128xf32> -> vector<2x128xf32>
    %384 = arith.addf %378, %383 : vector<2x128xf32>
    %385 = vector.extract_strided_slice %296 {offsets = [0, 14, 0], sizes = [2, 1, 256], strides = [1, 1, 1]} : vector<2x16x256xf32> to vector<2x1x256xf32>
    %386 = vector.shape_cast %385 : vector<2x1x256xf32> to vector<2x256xf32>
    %c14 = arith.constant 14 : index
    %c0_185 = arith.constant 0 : index
    %c0_186 = arith.constant 0 : index
    %387 = vector.load %arg7[%c14, %c0_185, %c0_186] : memref<16x256x128xf32, #tpu.memory_space<vmem>>, vector<1x256x128xf32>
    %388 = vector.shape_cast %387 : vector<1x256x128xf32> to vector<256x128xf32>
    %cst_187 = arith.constant dense<0.000000e+00> : vector<2x128xf32>
    %389 = tpu.matmul %386, %388, %cst_187 {dimension_numbers = #tpu.dot_dimension_numbers<[1], [0], [0], [1], [0, 0, 1, 1], [], []>} : vector<2x256xf32>, vector<256x128xf32>, vector<2x128xf32> -> vector<2x128xf32>
    %390 = arith.addf %384, %389 : vector<2x128xf32>
    %391 = vector.extract_strided_slice %296 {offsets = [0, 15, 0], sizes = [2, 1, 256], strides = [1, 1, 1]} : vector<2x16x256xf32> to vector<2x1x256xf32>
    %392 = vector.shape_cast %391 : vector<2x1x256xf32> to vector<2x256xf32>
    %c15 = arith.constant 15 : index
    %c0_188 = arith.constant 0 : index
    %c0_189 = arith.constant 0 : index
    %393 = vector.load %arg7[%c15, %c0_188, %c0_189] : memref<16x256x128xf32, #tpu.memory_space<vmem>>, vector<1x256x128xf32>
    %394 = vector.shape_cast %393 : vector<1x256x128xf32> to vector<256x128xf32>
    %cst_190 = arith.constant dense<0.000000e+00> : vector<2x128xf32>
    %395 = tpu.matmul %392, %394, %cst_190 {dimension_numbers = #tpu.dot_dimension_numbers<[1], [0], [0], [1], [0, 0, 1, 1], [], []>} : vector<2x256xf32>, vector<256x128xf32>, vector<2x128xf32> -> vector<2x128xf32>
    %396 = arith.addf %390, %395 : vector<2x128xf32>
    %cst_191 = arith.constant 0.000000e+00 : f32
    %397 = vector.broadcast %cst_191 : f32 to vector<2x128xf32>
    %398 = arith.maximumf %396, %397 : vector<2x128xf32>
    %c0_192 = arith.constant 0 : index
    %c0_193 = arith.constant 0 : index
    %399 = vector.load %arg9[%c0_192, %c0_193] : memref<128x64xf32, #tpu.memory_space<vmem>>, vector<128x64xf32>
    %cst_194 = arith.constant dense<0.000000e+00> : vector<2x64xf32>
    %400 = tpu.matmul %398, %399, %cst_194 {dimension_numbers = #tpu.dot_dimension_numbers<[1], [0], [0], [1], [0, 0, 1, 1], [], []>} : vector<2x128xf32>, vector<128x64xf32>, vector<2x64xf32> -> vector<2x64xf32>
    %c0_195 = arith.constant 0 : index
    %c0_196 = arith.constant 0 : index
    %401 = vector.load %arg10[%c0_195, %c0_196] : memref<1x64xf32, #tpu.memory_space<vmem>>, vector<1x64xf32>
    %402 = vector.broadcast %401 : vector<1x64xf32> to vector<2x64xf32>
    %403 = arith.addf %400, %402 : vector<2x64xf32>
    %cst_197 = arith.constant 0.000000e+00 : f32
    %404 = vector.broadcast %cst_197 : f32 to vector<2x64xf32>
    %405 = arith.maximumf %403, %404 : vector<2x64xf32>
    %c0_198 = arith.constant 0 : index
    %c0_199 = arith.constant 0 : index
    %406 = vector.load %arg11[%c0_198, %c0_199] : memref<64x128xf32, #tpu.memory_space<vmem>>, vector<64x128xf32>
    %cst_200 = arith.constant dense<0.000000e+00> : vector<2x128xf32>
    %407 = tpu.matmul %405, %406, %cst_200 {dimension_numbers = #tpu.dot_dimension_numbers<[1], [0], [0], [1], [0, 0, 1, 1], [], []>} : vector<2x64xf32>, vector<64x128xf32>, vector<2x128xf32> -> vector<2x128xf32>
    %c0_201 = arith.constant 0 : index
    %c0_202 = arith.constant 0 : index
    %408 = vector.load %arg12[%c0_201, %c0_202] : memref<1x128xf32, #tpu.memory_space<vmem>>, vector<1x128xf32>
    %409 = vector.broadcast %408 : vector<1x128xf32> to vector<2x128xf32>
    %410 = arith.addf %407, %409 : vector<2x128xf32>
    %c0_203 = arith.constant 0 : index
    %c0_204 = arith.constant 0 : index
    %411 = vector.load %arg13[%c0_203, %c0_204] : memref<128x64xf32, #tpu.memory_space<vmem>>, vector<128x64xf32>
    %cst_205 = arith.constant dense<0.000000e+00> : vector<2x64xf32>
    %412 = tpu.matmul %398, %411, %cst_205 {dimension_numbers = #tpu.dot_dimension_numbers<[1], [0], [0], [1], [0, 0, 1, 1], [], []>} : vector<2x128xf32>, vector<128x64xf32>, vector<2x64xf32> -> vector<2x64xf32>
    %c0_206 = arith.constant 0 : index
    %c0_207 = arith.constant 0 : index
    %413 = vector.load %arg14[%c0_206, %c0_207] : memref<1x64xf32, #tpu.memory_space<vmem>>, vector<1x64xf32>
    %414 = vector.broadcast %413 : vector<1x64xf32> to vector<2x64xf32>
    %415 = arith.addf %412, %414 : vector<2x64xf32>
    %cst_208 = arith.constant 0.000000e+00 : f32
    %416 = vector.broadcast %cst_208 : f32 to vector<2x64xf32>
    %417 = arith.maximumf %415, %416 : vector<2x64xf32>
    %c0_209 = arith.constant 0 : index
    %c0_210 = arith.constant 0 : index
    %418 = vector.load %arg15[%c0_209, %c0_210] : memref<1x64xf32, #tpu.memory_space<vmem>>, vector<1x64xf32>
    %419 = vector.broadcast %418 : vector<1x64xf32> to vector<2x64xf32>
    %420 = arith.mulf %417, %419 : vector<2x64xf32>
    %cst_211 = arith.constant dense<0.000000e+00> : vector<2xf32>
    %421 = vector.multi_reduction <add>, %420, %cst_211 [1] : vector<2x64xf32> to vector<2xf32>
    %422 = vector.shape_cast %421 : vector<2xf32> to vector<2x1xf32>
    %c0_212 = arith.constant 0 : index
    %c0_213 = arith.constant 0 : index
    %423 = vector.load %arg16[%c0_212, %c0_213] : memref<1x1xf32, #tpu.memory_space<vmem>>, vector<1x1xf32>
    %424 = vector.broadcast %423 : vector<1x1xf32> to vector<2x1xf32>
    %425 = arith.addf %422, %424 : vector<2x1xf32>
    %c0_214 = arith.constant 0 : index
    %c0_215 = arith.constant 0 : index
    %426 = vector.load %arg1[%c0_214, %c0_215] : memref<2x128xf32, #tpu.memory_space<vmem>>, vector<2x128xf32>
    %427 = math.exp %410 : vector<2x128xf32>
    %428 = arith.mulf %427, %426 : vector<2x128xf32>
    %cst_216 = arith.constant dense<0.000000e+00> : vector<2xf32>
    %429 = vector.multi_reduction <add>, %428, %cst_216 [1] : vector<2x128xf32> to vector<2xf32>
    %430 = vector.shape_cast %429 : vector<2xf32> to vector<2x1xf32>
    %cst_217 = arith.constant 9.99999974E-6 : f32
    %431 = vector.broadcast %cst_217 : f32 to vector<2x1xf32>
    %432 = arith.addf %430, %431 : vector<2x1xf32>
    %433 = tpu.reciprocal %432 {approx = true} : vector<2x1xf32> -> vector<2x1xf32>
    %434 = vector.broadcast %433 : vector<2x1xf32> to vector<2x128xf32>
    %435 = arith.mulf %428, %434 : vector<2x128xf32>
    %436 = math.exp %425 : vector<2x1xf32>
    %437 = vector.broadcast %436 : vector<2x1xf32> to vector<2x128xf32>
    %438 = arith.mulf %437, %426 : vector<2x128xf32>
    %cst_218 = arith.constant dense<0.000000e+00> : vector<2xf32>
    %439 = vector.multi_reduction <add>, %438, %cst_218 [1] : vector<2x128xf32> to vector<2xf32>
    %440 = vector.shape_cast %439 : vector<2xf32> to vector<2x1xf32>
    %cst_219 = arith.constant 9.99999974E-6 : f32
    %441 = vector.broadcast %cst_219 : f32 to vector<2x1xf32>
    %442 = arith.addf %440, %441 : vector<2x1xf32>
    %443 = tpu.reciprocal %442 {approx = true} : vector<2x1xf32> -> vector<2x1xf32>
    %444 = vector.broadcast %443 : vector<2x1xf32> to vector<2x128xf32>
    %445 = arith.mulf %438, %444 : vector<2x128xf32>
    %cst_220 = arith.constant dense<0.000000e+00> : vector<2xf32>
    %446 = vector.multi_reduction <add>, %435, %cst_220 [1] : vector<2x128xf32> to vector<2xf32>
    %447 = vector.shape_cast %446 : vector<2xf32> to vector<2x1xf32>
    %cst_221 = arith.constant dense<0.000000e+00> : vector<1xf32>
    %448 = vector.multi_reduction <add>, %447, %cst_221 [0] : vector<2x1xf32> to vector<1xf32>
    %449 = vector.shape_cast %448 : vector<1xf32> to vector<1x1xf32>
    %cst_222 = arith.constant 1.250000e-01 : f32
    %450 = vector.broadcast %cst_222 : f32 to vector<1x1xf32>
    %451 = arith.mulf %449, %450 : vector<1x1xf32>
    %452 = arith.addf %445, %435 : vector<2x128xf32>
    %453 = vector.broadcast %451 : vector<1x1xf32> to vector<2x128xf32>
    %454 = arith.subf %452, %453 : vector<2x128xf32>
    %c0_223 = arith.constant 0 : index
    %c0_224 = arith.constant 0 : index
    %455 = vector.load %arg17[%c0_223, %c0_224] : memref<2x128xf32, #tpu.memory_space<vmem>>, vector<2x128xf32>
    tpu.vector_store %arg17[%c0_223, %c0_224], %454 {strides = array<i32>} : memref<2x128xf32, #tpu.memory_space<vmem>>, vector<2x128xf32>,
    return
  }
}

</mosaic_0001>

<bundles_post_ra>
// kernel: ddqn_forward.1
= control target key start
LH: loop header
LB: loop body
LE: loop exit
PB: predicated region body
PF: predicated region fallthrough
CT: control target
= control target key end

     0   :  { %s9487_s0 = inlined_call_operand.hbm [shape: f32[2,256], index: 0, kind: input, shape index: {}]   ;;  %s9488_s1 = inlined_call_operand.vmem [shape: f32[2,128], index: 1, kind: input, shape index: {}]   ;;  %s9489_s2 = inlined_call_operand.vmem [shape: f32[2,256], index: 2, kind: input, shape index: {}]   ;;  %s9490_s3 = inlined_call_operand.vmem [shape: f32[4,9], index: 3, kind: input, shape index: {}]   ;;  %s9491_s4 = inlined_call_operand.vmem [shape: f32[4,1], index: 4, kind: input, shape index: {}]   ;;  %s9492_s5 = inlined_call_operand.vmem [shape: f32[9,16,4], index: 5, kind: input, shape index: {}]   ;;  %s9493_s6 = inlined_call_operand.vmem [shape: f32[16,1], index: 6, kind: input, shape index: {}]   ;;  %s9494_s7 = inlined_call_operand.hbm [shape: f32[16,256,128], index: 7, kind: input, shape index: {}]   ;;  %s9495_s8 = inlined_call_operand.hbm [shape: f32[1,128], index: 8, kind: input, shape index: {}]   ;;  %s9496_s9 = inlined_call_operand.vmem [shape: f32[128,64], index: 9, kind: input, shape index: {}]   ;;  %s9497_s10 = inlined_call_operand.hbm [shape: f32[1,64], index: 10, kind: input, shape index: {}]   ;;  %s9498_s11 = inlined_call_operand.vmem [shape: f32[64,128], index: 11, kind: input, shape index: {}]   ;;  %s9499_s12 = inlined_call_operand.vmem [shape: f32[1,128], index: 12, kind: input, shape index: {}]   ;;  %s9500_s13 = inlined_call_operand.vmem [shape: f32[128,64], index: 13, kind: input, shape index: {}]   ;;  %s9501_s14 = inlined_call_operand.hbm [shape: f32[1,64], index: 14, kind: input, shape index: {}]   ;;  %s9502_s15 = inlined_call_operand.hbm [shape: f32[1,64], index: 15, kind: input, shape index: {}]   ;;  %s9503_s16 = inlined_call_operand.<no memory space> [shape: f32[1,1], index: 16, kind: input, shape index: {}]   ;;  %s9504_s17 = inlined_call_operand.hbm [shape: f32[2,128], index: 17, kind: output, shape index: {}]  }
   0x1   :  { %9508 = sst [smem:[#allocation22_spill]] %s9487_s0  ;;  %v22_v0 = vstv %s9503_s16 }
   0x2   :  { %9509 = sst [smem:[#allocation23_spill]] %s9488_s1  ;;  %23 = vst [vmem:[#allocation4] sm:$0x1] %v22_v0 }
   0x3   :  { %24 = vsyncpa [#allocation6], 0 }
   0x4   :  { %25 = vsyncpa [#allocation9], 0 }
   0x5   :  { %26 = vsyncpa [#allocation12], 0 }
   0x6   :  { %27 = vsyncpa [#allocation15], 0 }
   0x7   :  { %28 = vsyncpa [#allocation7], 0  ;;  %s7441_s26 = smov [#allocation8]   ;;  %s7277_s0 = scalar_lea.hbm %s9494_s7, 65536 }
   0x8   :  { %s56_s27 = sshll.u32 %s7441_s26, 4  ;;  %p7278_p0 = scmp.ne.s32.totalorder %s9494_s7, %s7277_s0  ;;  %s57_s27 = int_to_ptr.vmem [resolvable:$true] %s56_s27 }
   0x9   :  { %p7281_p1 = scmp.lt.u32.totalorder %s7277_s0, %s9494_s7 }
   0xb   :  { %p7283_p2 = pnand %p7281_p1, %p7278_p0 }
   0xd   :  { %7286 = shalt.err (!%p7283_p2)
}
   0xe   :  { %s7287_s16 = scalar_lea.vmem %s57_s27, 65536  ;;  %p7292_p4 = scmp.lt.s32.totalorder %s57_s27, %s57_s27 }
   0xf   :  { %p7288_p3 = scmp.ne.s32.totalorder %s57_s27, %s7287_s16  ;;  %p7293_p5 = scmp.lt.s32.totalorder %s7287_s16, %s7287_s16 }
  0x11   :  { %p7294_p6 = por %p7293_p5, %p7292_p4 }
  0x13   :  { %p7295_p7 = pnand %p7294_p6, %p7288_p3 }
  0x15   :  { %7298 = shalt.err (!%p7295_p7)
}
  0x16   :  { %s7442_s20 = smov 128   ;;  %s7443_s21 = smov 8  }
  0x17   :  { %62 = dma.hbm_to_vmem [thread:$0]  %s9494_s7, 65536, %s57_s27, [#allocation9], %s7442_s20, %s7442_s20, %s7443_s21  }
  0x18   :  { %s7444_s24 = smov [#allocation11]   ;;  %s7445_s26 = smov [#allocation5]  }
  0x19   :  { %s81_s25 = sshll.u32 %s7444_s24, 4  ;;  %s35_s28 = sshll.u32 %s7445_s26, 4  ;;  %s82_s25 = int_to_ptr.vmem [resolvable:$true] %s81_s25  ;;  %s36_s28 = int_to_ptr.vmem [resolvable:$true] %s35_s28 }
  0x1a   :  { %s7299_s30 = scalar_lea.hbm %s9497_s10, 16 }
  0x1b   :  { %p7300_p8 = scmp.ne.s32.totalorder %s9497_s10, %s7299_s30  ;;  %p7303_p9 = scmp.lt.u32.totalorder %s7299_s30, %s9497_s10 }
  0x1d   :  { %p7305_p10 = pnand %p7303_p9, %p7300_p8 }
  0x1f   :  { %7308 = shalt.err (!%p7305_p10)
}
  0x20   :  { %s7309_s7 = scalar_lea.vmem %s82_s25, 16  ;;  %s7313_s27 = scalar_lea.vmem %s82_s25, 32 }
  0x21   :  { %p7310_p11 = scmp.ne.s32.totalorder %s82_s25, %s7309_s7  ;;  %p7314_p12 = scmp.lt.s32.totalorder %s82_s25, %s82_s25 }
  0x22   :  { %p7315_p13 = scmp.lt.s32.totalorder %s7313_s27, %s7309_s7 }
  0x24   :  { %p7316_p0 = por %p7315_p13, %p7314_p12 }
  0x26   :  { %p7317_p1 = pnand %p7316_p0, %p7310_p11 }
  0x28   :  { %7320 = shalt.err (!%p7317_p1)
}
  0x29   :  { %84 = dma.hbm_to_vmem [thread:$0]  %s9497_s10, 16, %s82_s25, [#allocation12]  }
  0x2a   :  { %s9510_s24 = sld [smem:[#allocation22_spill]] }
  0x30   :  { %s7321_s26 = scalar_lea.hbm %s9510_s24, 64 }
  0x31   :  { %p7322_p2 = scmp.ne.s32.totalorder %s9510_s24, %s7321_s26  ;;  %p7325_p3 = scmp.lt.u32.totalorder %s7321_s26, %s9510_s24 }
  0x33   :  { %p7327_p4 = pnand %p7325_p3, %p7322_p2 }
  0x35   :  { %7330 = shalt.err (!%p7327_p4)
}
  0x36   :  { %s7331_s19 = scalar_lea.vmem %s36_s28, 64  ;;  %p7336_p6 = scmp.lt.s32.totalorder %s36_s28, %s36_s28 }
  0x37   :  { %p7332_p5 = scmp.ne.s32.totalorder %s36_s28, %s7331_s19  ;;  %p7337_p7 = scmp.lt.s32.totalorder %s7331_s19, %s7331_s19 }
  0x39   :  { %p7338_p8 = por %p7337_p7, %p7336_p6 }
  0x3b   :  { %p7339_p9 = pnand %p7338_p8, %p7332_p5 }
  0x3d   :  { %7342 = shalt.err (!%p7339_p9)
}
  0x3e   :  { %38 = dma.hbm_to_vmem [thread:$0]  %s9510_s24, 64, %s36_s28, [#allocation6]  }
  0x3f   :  { %s7446_s1 = smov [#allocation10]   ;;  %s7447_s7 = smov [#allocation13]  }
  0x40   :  { %s69_s16 = sshll.u32 %s7446_s1, 4  ;;  %s97_s27 = sshll.u32 %s7447_s7, 4  ;;  %s70_s16 = int_to_ptr.vmem [resolvable:$true] %s69_s16  ;;  %s98_s27 = int_to_ptr.vmem [resolvable:$true] %s97_s27 }
  0x41   :  { %s7343_s22 = scalar_lea.hbm %s9495_s8, 16 }
  0x42   :  { %p7344_p10 = scmp.ne.s32.totalorder %s9495_s8, %s7343_s22  ;;  %p7347_p11 = scmp.lt.u32.totalorder %s7343_s22, %s9495_s8 }
  0x44   :  { %p7349_p12 = pnand %p7347_p11, %p7344_p10 }
  0x46   :  { %7352 = shalt.err (!%p7349_p12)
}
  0x47   :  { %s7353_s28 = scalar_lea.vmem %s70_s16, 16  ;;  %s7357_s24 = scalar_lea.vmem %s70_s16, 32 }
  0x48   :  { %p7354_p13 = scmp.ne.s32.totalorder %s70_s16, %s7353_s28  ;;  %p7358_p0 = scmp.lt.s32.totalorder %s70_s16, %s70_s16 }
  0x49   :  { %p7359_p1 = scmp.lt.s32.totalorder %s7357_s24, %s7353_s28 }
  0x4b   :  { %p7360_p2 = por %p7359_p1, %p7358_p0 }
  0x4d   :  { %p7361_p3 = pnand %p7360_p2, %p7354_p13 }
  0x4f   :  { %7364 = shalt.err (!%p7361_p3)
}
  0x50   :  { %72 = dma.hbm_to_vmem [thread:$0]  %s9495_s8, 16, %s70_s16, [#allocation9]  }
  0x51   :  { %s7365_s25 = scalar_lea.hbm %s9501_s14, 16 }
  0x52   :  { %p7366_p4 = scmp.ne.s32.totalorder %s9501_s14, %s7365_s25  ;;  %p7369_p5 = scmp.lt.u32.totalorder %s7365_s25, %s9501_s14 }
  0x54   :  { %p7371_p6 = pnand %p7369_p5, %p7366_p4 }
  0x56   :  { %7374 = shalt.err (!%p7371_p6)
}
  0x57   :  { %s7375_s22 = scalar_lea.vmem %s98_s27, 16  ;;  %s7379_s23 = scalar_lea.vmem %s98_s27, 32 }
  0x58   :  { %p7376_p7 = scmp.ne.s32.totalorder %s98_s27, %s7375_s22  ;;  %p7380_p8 = scmp.lt.s32.totalorder %s98_s27, %s98_s27 }
  0x59   :  { %p7381_p9 = scmp.lt.s32.totalorder %s7379_s23, %s7375_s22 }
  0x5b   :  { %p7382_p10 = por %p7381_p9, %p7380_p8 }
  0x5d   :  { %p7383_p11 = pnand %p7382_p10, %p7376_p7 }
  0x5f   :  { %7386 = shalt.err (!%p7383_p11)
}
  0x60   :  { %100 = dma.hbm_to_vmem [thread:$0]  %s9501_s14, 16, %s98_s27, [#allocation12]  }
  0x61   :  { %s7448_s26 = smov [#allocation14]   ;;  %s7387_s24 = scalar_lea.hbm %s9502_s15, 16 }
  0x62   :  { %s107_s29 = sshll.u32 %s7448_s26, 4  ;;  %p7388_p12 = scmp.ne.s32.totalorder %s9502_s15, %s7387_s24  ;;  %s108_s29 = int_to_ptr.vmem [resolvable:$true] %s107_s29 }
  0x63   :  { %p7391_p13 = scmp.lt.u32.totalorder %s7387_s24, %s9502_s15 }
  0x65   :  { %p7393_p0 = pnand %p7391_p13, %p7388_p12 }
  0x67   :  { %7396 = shalt.err (!%p7393_p0)
}
  0x68   :  { %s7397_s25 = scalar_lea.vmem %s108_s29, 16  ;;  %s7401_s14 = scalar_lea.vmem %s108_s29, 32 }
  0x69   :  { %p7398_p1 = scmp.ne.s32.totalorder %s108_s29, %s7397_s25  ;;  %p7402_p2 = scmp.lt.s32.totalorder %s108_s29, %s108_s29 }
  0x6a   :  { %p7403_p3 = scmp.lt.s32.totalorder %s7401_s14, %s7397_s25 }
  0x6c   :  { %p7404_p4 = por %p7403_p3, %p7402_p2 }
  0x6e   :  { %p7405_p5 = pnand %p7404_p4, %p7398_p1 }
  0x70   :  { %7408 = shalt.err (!%p7405_p5)
}
  0x71   :  { %110 = dma.hbm_to_vmem [thread:$0]  %s9502_s15, 16, %s108_s29, [#allocation15]  }
  0x72   :  { %7431 = dma.done.wait [#allocation6], 64  }
  0x73   :  { %7432 = vsyncadd [#allocation6], 4294967232 }
  0x74   :  { %7433 = dma.done.wait [#allocation9], 65552  }
  0x75   :  { %7434 = vsyncadd [#allocation9], 4294901744 }
  0x76   :  { %7435 = dma.done.wait [#allocation12], 32  }
  0x77   :  { %7436 = vsyncadd [#allocation12], 4294967264 }
  0x78   :  { %7437 = dma.done.wait [#allocation15], 16  }
  0x79   :  { %7438 = vsyncadd [#allocation15], 4294967280  ;;  %v139_v1 = vlaneseq  ;;  %v7449_v2 = vmov 1   ;;  %v7450_v3 = vmov 1966171168   ;;  %v7451_v6 = vmov 7  }
  0x7a   :  { %7015 = vset.pattern.permute.xlu1 %v7449_v2  ;;  %v137_v4 = vunpack.c.l.s4 %v7450_v3  ;;  %7017 = vset.pattern.permute.xlu0 %v7451_v6  ;;  %vm144_vm0 = vcmask 131072   ;;  %v7452_v8 = vmov 0.0   ;;  %vm147_vm1 = vcmask 270472   ;;  %v264_v10 = vld [vmem:[%s9490_s3] sm:$0xf]  ;;  %s7454_s20 = smov 17  }
  0x7b   :  { %v7639_v5 = vshrl.u32 %v139_v1, 7  ;;  %146 = vst.msk [vmem:[#allocation2 + $0xc] sm:$0x1] %vm144_vm0, %v7452_v8  ;;  %145 = vst.msk [vmem:[#allocation2] sm:$0x1] %vm144_vm0, %v7452_v8  ;;  %1274 = vmatprep.mubr.f32.mxu0 %v7452_v8  ;;  %1552 = vmatprep.mubr.f32.mxu1 %v7452_v8  ;;  %v7453_v14 = vmov 4  }
  0x7c   :  { %v138_v7 = vunpack.c.0.s8 %v137_v4  ;;  %149 = vst.msk [vmem:[#allocation2 + $0x14] sm:$0x1] %vm147_vm1, %v7452_v8  ;;  %148 = vst.msk [vmem:[#allocation2 + $0x8] sm:$0x1] %vm147_vm1, %v7452_v8  ;;  %v133_v11 = vld [vmem:[#allocation5] sm:$0xf]  ;;  %347 = vperm.xlu1 %7015, %v264_v10  }
  0x7d   :  { %v134_v12 = vmul.f32 0.125, %v133_v11  ;;  %v7455_v16 = vmov 0   ;;  %v257_v17 = vld [vmem:[%s9491_s4] sm:$0xf]  ;;  %v7456_v18 = vmov 2   ;;  %v7457_v19 = vmov 3  }
  0x7e   :  { %v141_v9 = vsub.s32 %v138_v7, %v7639_v5  ;;  %v7458_v20 = vmov 5   ;;  %v7459_v21 = vmov 6   ;;  %v7460_v22 = vmov 8   ;;  %s7462_s3 = smov 112   ;;  %s7463_s4 = smov 126  }
  0x7f   :  { %vm162_vm2 = vcmp.ge.s32.totalorder %v139_v1, 17  ;;  %vm163_vm3 = vcmp.lt.s32.totalorder %v139_v1, 273  ;;  %vm156_vm4 = vcmask 138240   ;;  %v7461_v28 = vmov 857870592   ;;  %s7464_s23 = smov 110  }
  0x80   :  { %v142_v13 = vrot.slane %v134_v12, %v141_v9  ;;  %7016 = vset.pattern.permute.xlu1 %v7453_v14  ;;  %vm164_vm5 = vmand %vm162_vm2, %vm163_vm3  ;;  %v175_v29 = vunpack.c.l.s4 %v7461_v28  ;;  %vm719_vm6 = vcmask 134144   ;;  %v7678_v37 = vsub.s32 1, %v7639_v5  ;;  %s7465_s8 = smov 96   ;;  %s7466_s16 = smov 94  }
  0x81   :  { %488 = vperm.xlu1 %7016, %v264_v10   ;;  %v7688_v39 = vsub.s32 0, %v7639_v5  ;;  %v7697_v43 = vsub.s32 2, %v7639_v5  ;;  %s7467_s26 = smov 127   ;;  %s7468_s29 = smov 111   ;;  %vm722_vm7 = vcmask 273544   ;;  %vm198_vm9 = vcmask 1031168  }
  0x82   :  { %v143_v15 = vcombine.high %v142_v13, %v142_v13  ;;  %v176_v31 = vunpack.c.0.s8 %v175_v29  ;;  %s7469_s0 = smov 95   ;;  %v7470_v2 = vmov -1e+30   ;;  %vm211_vm10 = vcmask 916480  }
  0x83   :  { %723 = vst.msk [vmem:[#allocation3 + $0x10] sm:$0xf] %vm722_vm7, %v7470_v2  ;;  %724 = vst.msk [vmem:[#allocation3 + $0x40] sm:$0xf] %vm722_vm7, %v7470_v2  ;;  %vm224_vm11 = vcmask 900096   ;;  %vm9507_vm12 = vcmask 785408  }
  0x84   :  { %152 = vrot.lane.b32.xlu0 %v143_v15, %s7454_s20  ;;  %v179_v33 = vsub.s32 %v176_v31, %v7639_v5  ;;  %720 = vst.msk [vmem:[#allocation3] sm:$0xf] %vm719_vm6, %v7470_v2  ;;  %721 = vst.msk [vmem:[#allocation3 + $0x30] sm:$0xf] %vm719_vm6, %v7470_v2  ;;  %vm250_vm13 = vcmask 769024   ;;  %vm374_vm14 = vcmask 1039360  }
  0x85   :  { %7018 = vset.pattern.permute.xlu1 %v7455_v16  ;;  %2879 = vst.msk [vmem:[#allocation3 + $0x18] sm:$0xff] %vm156_vm4, %v7470_v2  ;;  %2881 = vst.msk [vmem:[#allocation3 + $0x48] sm:$0xff] %vm156_vm4, %v7470_v2  ;;  %vm515_vm15 = vcmask 908288   ;;  %vm9506_vm0 = vcmask 777216   ;;  %vm745_vm1 = vcmask 1043592  }
  0x86   :  { %305 = vperm.xlu1 %7018, %v264_v10  }
  0x88   :  { %150 = vrot.lane.b32.xlu0 %v142_v13, %s7454_s20 }
  0x8a   :  { %260 = vperm.xlu1 %7018, %v257_v17  }
  0x8c   :  { %629 = vperm.xlu0 %7017, %v264_v10  }
  0x8e   :  { %7019 = vset.pattern.permute.xlu1 %v7456_v18 }
  0x8f   :  { %426 = vperm.xlu1 %7019, %v264_v10  }
  0x90   :  { %7020 = vset.pattern.permute.xlu0 %v7457_v19 }
  0x91   :  { %476 = vperm.xlu0 %7020, %v264_v10  }
  0x93   :  { %7021 = vset.pattern.permute.xlu1 %v7458_v20  ;;  %v7758_v20 = vld [vmem:[%s9489_s2] sm:$0xf] }
  0x94   :  { %567 = vperm.xlu1 %7021, %v264_v10   ;;  %vm132_vm8 = vcmp.gt.f32.partialorder %v7758_v20, 0.5 }
  0x95   :  { %7024 = vset.pattern.permute.xlu0 %v7455_v16 }
  0x98   :  { %7022 = vset.pattern.permute.xlu1 %v7459_v21 }
  0x99   :  { %617 = vperm.xlu1 %7022, %v264_v10  }
  0x9d   :  { %7023 = vset.pattern.permute.xlu1 %v7460_v22 }
  0x9e   :  { %708 = vperm.xlu1 %7023, %v264_v10  }
  0xf6   :  { %v153_v23 = vpop.permute.xlu0 %152 }
  0xf7   :  { %v155_v24 = vrot.slane %v153_v23, 7 }
  0xf9   :  { %v158_v25 = vsel %vm156_vm4, %v155_v24, %v153_v23 }
  0xfa   :  { %167 = vst.msk [vmem:[#allocation2 + $0xc] ss:$4 sm:$0x7] %vm164_vm5, %v158_v25  ;;  %v151_v26 = vpop.permute.xlu0 %150 }
  0xfb   :  { %v154_v27 = vrot.slane %v151_v26, 7  ;;  %v348_v40 = vpop.permute.xlu1 %347 }
  0xfd   :  { %v157_v30 = vsel %vm156_vm4, %v154_v27, %v151_v26 }
  0xfe   :  { %165 = vst.msk [vmem:[#allocation2] ss:$4 sm:$0x7] %vm164_vm5, %v157_v30 }
 0x100   :  { %v489_v46 = vpop.permute.xlu1 %488 }
 0x101   :  { %v169_v32 = vld [vmem:[#allocation2 + $0xc] ss:$4 sm:$0x7] }
 0x102   :  { %1017 = vst.msk [vmem:[#allocation2 + $0xc] sm:$0xf] %vm719_vm6, %v7452_v8  ;;  %v7671_v36 = vrot.slane %v169_v32, %v179_v33  ;;  %v335_v51 = vrot.slane %v169_v32, %v7678_v37  ;;  %v331_v52 = vrot.slane %v169_v32, %v7688_v39  ;;  %v339_v55 = vrot.slane %v169_v32, %v7697_v43 }
 0x103   :  { %1019 = vst.msk [vmem:[#allocation2 + $0x14] sm:$0xf] %vm722_vm7, %v7452_v8 }
 0x104   :  { %v354_v53 = vmul.f32 %v348_v40, %v335_v51  ;;  %v353_v54 = vmul.f32 %v348_v40, %v331_v52  ;;  %v355_v57 = vmul.f32 %v348_v40, %v339_v55  ;;  %v494_v59 = vmul.f32 %v489_v46, %v331_v52 }
 0x105   :  { %v168_v34 = vld [vmem:[#allocation2] ss:$4 sm:$0x7]  ;;  %v495_v60 = vmul.f32 %v489_v46, %v335_v51  ;;  %v496_v61 = vmul.f32 %v489_v46, %v339_v55  ;;  %v306_v4 = vpop.permute.xlu1 %305  ;;  %v191_v23 = vsel %vm132_vm8, %v7671_v36, 0.0 }
 0x106   :  { %1016 = vst.msk [vmem:[#allocation2] sm:$0xf] %vm719_vm6, %v7452_v8  ;;  %v7665_v35 = vrot.slane %v168_v34, %v179_v33  ;;  %v7685_v38 = vrot.slane %v168_v34, %v7678_v37  ;;  %v319_v42 = vrot.slane %v168_v34, %v7688_v39  ;;  %v327_v45 = vrot.slane %v168_v34, %v7697_v43 }
 0x107   :  { %1018 = vst.msk [vmem:[#allocation2 + $0x8] sm:$0xf] %vm722_vm7, %v7452_v8  ;;  %v278_v29 = vrot.slane %v191_v23, %v7688_v39  ;;  %v282_v30 = vrot.slane %v191_v23, %v7697_v43 }
 0x108   :  { %205 = vrot.lane.b32.xlu1 %v7665_v35, %s7462_s3  ;;  %192 = vrot.lane.b32.xlu0 %v7665_v35, %s7463_s4  ;;  %v351_v41 = vmul.f32 %v348_v40, %v7685_v38  ;;  %v350_v44 = vmul.f32 %v348_v40, %v319_v42  ;;  %v491_v47 = vmul.f32 %v489_v46, %v319_v42  ;;  %v190_v26 = vsel %vm132_vm8, %v7665_v35, 0.0 }
 0x109   :  { %v352_v48 = vmul.f32 %v348_v40, %v327_v45  ;;  %v493_v49 = vmul.f32 %v489_v46, %v327_v45  ;;  %v492_v50 = vmul.f32 %v489_v46, %v7685_v38  ;;  %v7739_v6 = vpop.permute.xlu1 %260  ;;  %v270_v31 = vrot.slane %v190_v26, %v7688_v39 }
 0x10a   :  { %v274_v32 = vrot.slane %v190_v26, %v7697_v43  ;;  %v298_v40 = vrot.slane %v278_v29, %v7688_v39  ;;  %v7786_v46 = vsub.s32 3, %v7639_v5 }
 0x10b   :  { %v630_v56 = vpop.permute.xlu0 %629 }
 0x10c   :  { %207 = vrot.lane.b32.xlu1 %v7671_v36, %s7462_s3  ;;  %218 = vrot.lane.b32.xlu0 %v7665_v35, %s7464_s23  ;;  %v632_v58 = vmul.f32 %v630_v56, %v319_v42  ;;  %v636_v62 = vmul.f32 %v630_v56, %v335_v51  ;;  %v635_v63 = vmul.f32 %v630_v56, %v331_v52 }
 0x10d   :  { %v634_v0 = vmul.f32 %v630_v56, %v327_v45  ;;  %v637_v1 = vmul.f32 %v630_v56, %v339_v55  ;;  %v633_v3 = vmul.f32 %v630_v56, %v7685_v38  ;;  %v294_v45 = vrot.slane %v274_v32, %v7688_v39 }
 0x10e   :  { %v7741_v7 = vpop.permute.xlu1 %426 }
 0x110   :  { %220 = vrot.lane.b32.xlu1 %v7671_v36, %s7464_s23  ;;  %231 = vrot.lane.b32.xlu0 %v7665_v35, %s7465_s8  ;;  %v7749_v12 = vpop.permute.xlu0 %476 }
 0x113   :  { %v7743_v9 = vpop.permute.xlu1 %567 }
 0x114   :  { %233 = vrot.lane.b32.xlu1 %v7671_v36, %s7465_s8  ;;  %244 = vrot.lane.b32.xlu0 %v7665_v35, %s7466_s16 }
 0x118   :  { %364 = vrot.lane.b32.xlu1 %v351_v41, %s7467_s26  ;;  %194 = vrot.lane.b32.xlu0 %v7671_v36, %s7463_s4  ;;  %v7745_v10 = vpop.permute.xlu1 %617  ;;  %v302_v41 = vrot.slane %v282_v30, %v7688_v39 }
 0x11c   :  { %246 = vrot.lane.b32.xlu1 %v7671_v36, %s7466_s16  ;;  %362 = vrot.lane.b32.xlu0 %v350_v44, %s7467_s26  ;;  %v290_v44 = vrot.slane %v270_v31, %v7688_v39 }
 0x11d   :  { %v7747_v11 = vpop.permute.xlu1 %708 }
 0x11e   :  { %v308_v56 = vmul.f32 %v306_v4, %v290_v44 }
 0x120   :  { %503 = vrot.lane.b32.xlu1 %v491_v47, %s7468_s29  ;;  %366 = vrot.lane.b32.xlu0 %v352_v48, %s7467_s26  ;;  %v312_v23 = vadd.f32 %v308_v56, %v7739_v6 }
 0x124   :  { %507 = vrot.lane.b32.xlu1 %v493_v49, %s7468_s29  ;;  %505 = vrot.lane.b32.xlu0 %v492_v50, %s7468_s29 }
 0x128   :  { %370 = vrot.lane.b32.xlu1 %v354_v53, %s7467_s26  ;;  %368 = vrot.lane.b32.xlu0 %v353_v54, %s7467_s26  ;;  %v310_v53 = vmul.f32 %v306_v4, %v298_v40  ;;  %v311_v54 = vmul.f32 %v306_v4, %v302_v41 }
 0x12c   :  { %372 = vrot.lane.b32.xlu0 %v355_v57, %s7467_s26  ;;  %644 = vrot.lane.b32.xlu1 %v632_v58, %s7469_s0  ;;  %v309_v57 = vmul.f32 %v306_v4, %v294_v45 }
 0x130   :  { %509 = vrot.lane.b32.xlu0 %v494_v59, %s7468_s29  ;;  %511 = vrot.lane.b32.xlu1 %v495_v60, %s7468_s29 }
 0x134   :  { %513 = vrot.lane.b32.xlu0 %v496_v61, %s7468_s29  ;;  %652 = vrot.lane.b32.xlu1 %v636_v62, %s7469_s0 }
 0x138   :  { %650 = vrot.lane.b32.xlu0 %v635_v63, %s7469_s0  ;;  %648 = vrot.lane.b32.xlu1 %v634_v0, %s7469_s0 }
 0x13c   :  { %654 = vrot.lane.b32.xlu0 %v637_v1, %s7469_s0 }
 0x140   :  { %646 = vrot.lane.b32.xlu0 %v633_v3, %s7469_s0 }
 0x17a   :  { %v206_v13 = vpop.permute.xlu1 %205  ;;  %v193_v14 = vpop.permute.xlu0 %192 }
 0x17b   :  { %v196_v27 = vrot.slane %v193_v14, 2  ;;  %v209_v28 = vrot.slane %v206_v13, 2 }
 0x17d   :  { %v199_v36 = vsel %vm198_vm9, %v193_v14, %v196_v27  ;;  %v212_v38 = vsel %vm211_vm10, %v206_v13, %v209_v28  ;;  %v314_v13 = vadd.f32 %v310_v53, %v7739_v6  ;;  %v315_v14 = vadd.f32 %v311_v54, %v7739_v6 }
 0x17e   :  { %v208_v15 = vpop.permute.xlu1 %207  ;;  %v219_v17 = vpop.permute.xlu0 %218  ;;  %v203_v47 = vsel %vm132_vm8, %v199_v36, 0.0  ;;  %v216_v51 = vsel %vm132_vm8, %v212_v38, 0.0 }
 0x17f   :  { %v210_v35 = vrot.slane %v208_v15, 2  ;;  %v222_v42 = vrot.slane %v219_v17, 2  ;;  %v392_v55 = vrot.slane %v203_v47, %v7678_v37  ;;  %v442_v58 = vrot.slane %v216_v51, %v7688_v39 }
 0x180   :  { %v446_v59 = vrot.slane %v216_v51, %v7697_v43  ;;  %v396_v60 = vrot.slane %v203_v47, %v7786_v46 }
 0x181   :  { %v213_v52 = vsel %vm211_vm10, %v208_v15, %v210_v35  ;;  %v225_v5 = vsel %vm224_vm11, %v219_v17, %v222_v42  ;;  %v412_v15 = vrot.slane %v392_v55, %v7678_v37  ;;  %v462_v26 = vrot.slane %v442_v58, %v7688_v39 }
 0x182   :  { %v7751_v18 = vpop.permute.xlu1 %220  ;;  %v7753_v19 = vpop.permute.xlu0 %231  ;;  %v217_v0 = vsel %vm132_vm8, %v213_v52, 0.0  ;;  %v229_v3 = vsel %vm132_vm8, %v225_v5, 0.0  ;;  %v466_v27 = vrot.slane %v446_v59, %v7688_v39  ;;  %v416_v28 = vrot.slane %v396_v60, %v7678_v37 }
 0x183   :  { %v223_v1 = vrot.slane %v7751_v18, 2  ;;  %v235_v4 = vrot.slane %v7753_v19, 2  ;;  %v450_v29 = vrot.slane %v217_v0, %v7688_v39  ;;  %v454_v32 = vrot.slane %v217_v0, %v7697_v43 }
 0x184   :  { %v533_v36 = vrot.slane %v229_v3, %v7678_v37  ;;  %v537_v44 = vrot.slane %v229_v3, %v7786_v46  ;;  %v429_v47 = vmul.f32 %v7741_v7, %v412_v15  ;;  %v430_v51 = vmul.f32 %v7741_v7, %v416_v28 }
 0x185   :  { %v226_v38 = vsel %vm224_vm11, %v7751_v18, %v223_v1  ;;  %v238_v35 = vsel %vm9507_vm12, %v7753_v19, %v235_v4  ;;  %v474_v53 = vrot.slane %v454_v32, %v7688_v39  ;;  %v480_v28 = vmul.f32 %v7749_v12, %v466_v27 }
 0x186   :  { %v7761_v21 = vpop.permute.xlu1 %233  ;;  %v7763_v22 = vpop.permute.xlu0 %244  ;;  %v230_v19 = vsel %vm132_vm8, %v226_v38, 0.0  ;;  %v242_v54 = vsel %vm132_vm8, %v238_v35, 0.0  ;;  %v553_v59 = vrot.slane %v533_v36, %v7678_v37  ;;  %v479_v36 = vmul.f32 %v7749_v12, %v462_v26 }
 0x187   :  { %v236_v40 = vrot.slane %v7761_v21, 2  ;;  %v248_v45 = vrot.slane %v7763_v22, 2  ;;  %v541_v60 = vrot.slane %v230_v19, %v7678_v37  ;;  %v587_v32 = vrot.slane %v242_v54, %v7697_v43 }
 0x189   :  { %v251_v0 = vsel %vm250_vm13, %v7763_v22, %v248_v45 }
 0x18a   :  { %v7768_v24 = vpop.permute.xlu1 %364  ;;  %v195_v25 = vpop.permute.xlu0 %194 }
 0x18b   :  { %v197_v48 = vrot.slane %v195_v25, 2 }
 0x18d   :  { %v200_v61 = vsel %vm198_vm9, %v195_v25, %v197_v48  ;;  %v313_v25 = vadd.f32 %v309_v57, %v7739_v6  ;;  %v470_v48 = vrot.slane %v450_v29, %v7688_v39  ;;  %v255_v29 = vsel %vm132_vm8, %v251_v0, 0.0 }
 0x18e   :  { %v7777_v33 = vpop.permute.xlu1 %246  ;;  %v363_v34 = vpop.permute.xlu0 %362  ;;  %v204_v17 = vsel %vm132_vm8, %v200_v61, 0.0  ;;  %v545_v61 = vrot.slane %v230_v19, %v7786_v46  ;;  %v678_v26 = vrot.slane %v255_v29, %v7786_v46 }
 0x18f   :  { %v400_v41 = vrot.slane %v204_v17, %v7678_v37  ;;  %v404_v42 = vrot.slane %v204_v17, %v7786_v46  ;;  %v375_v18 = vsel %vm374_vm14, %v363_v34, %v7768_v24  ;;  %v239_v34 = vsel %vm9507_vm12, %v7761_v21, %v236_v40 }
 0x190   :  { %v383_v57 = vadd.f32 %v375_v18, %v312_v23  ;;  %v249_v1 = vrot.slane %v7777_v33, 2  ;;  %v557_v17 = vrot.slane %v537_v44, %v7678_v37  ;;  %v583_v23 = vrot.slane %v242_v54, %v7688_v39 }
 0x191   :  { %v420_v5 = vrot.slane %v400_v41, %v7678_v37  ;;  %v424_v56 = vrot.slane %v404_v42, %v7678_v37  ;;  %v674_v44 = vrot.slane %v255_v29, %v7678_v37 }
 0x192   :  { %v7790_v49 = vpop.permute.xlu1 %503  ;;  %v367_v50 = vpop.permute.xlu0 %366  ;;  %v252_v38 = vsel %vm250_vm13, %v7777_v33, %v249_v1  ;;  %v481_v33 = vmul.f32 %v7749_v12, %v470_v48  ;;  %v603_v48 = vrot.slane %v583_v23, %v7688_v39 }
 0x193   :  { %v376_v6 = vsel %vm374_vm14, %v7768_v24, %v367_v50  ;;  %v431_v22 = vmul.f32 %v7741_v7, %v420_v5  ;;  %v256_v19 = vsel %vm132_vm8, %v252_v38, 0.0  ;;  %v571_v5 = vmul.f32 %v7743_v9, %v557_v17 }
 0x194   :  { %v384_v50 = vadd.f32 %v376_v6, %v313_v25  ;;  %v243_v25 = vsel %vm132_vm8, %v239_v34, 0.0  ;;  %v694_v0 = vrot.slane %v674_v44, %v7678_v37  ;;  %v682_v1 = vrot.slane %v256_v19, %v7678_v37 }
 0x195   :  { %v591_v42 = vrot.slane %v243_v25, %v7688_v39 }
 0x196   :  { %v7801_v62 = vpop.permute.xlu1 %507  ;;  %v7803_v63 = vpop.permute.xlu0 %505  ;;  %v434_v3 = vadd.f32 %v430_v51, %v384_v50 }
 0x197   :  { %v516_v45 = vsel %vm515_vm15, %v7790_v49, %v7803_v63  ;;  %v517_v50 = vsel %vm515_vm15, %v7803_v63, %v7801_v62 }
 0x198   :  { %v484_v27 = vadd.f32 %v480_v28, %v434_v3  ;;  %v686_v3 = vrot.slane %v256_v19, %v7786_v46  ;;  %v620_v28 = vmul.f32 %v7745_v10, %v603_v48 }
 0x19a   :  { %v371_v30 = vpop.permute.xlu1 %370  ;;  %v369_v31 = vpop.permute.xlu0 %368  ;;  %v525_v49 = vadd.f32 %v517_v50, %v484_v27  ;;  %v711_v27 = vmul.f32 %v7747_v11, %v694_v0 }
 0x19b   :  { %v377_v55 = vsel %vm374_vm14, %v369_v31, %v371_v30  ;;  %v432_v31 = vmul.f32 %v7741_v7, %v424_v56  ;;  %v595_v7 = vrot.slane %v243_v25, %v7697_v43  ;;  %v611_v56 = vrot.slane %v591_v42, %v7688_v39 }
 0x19c   :  { %v385_v21 = vadd.f32 %v377_v55, %v314_v13  ;;  %v561_v13 = vrot.slane %v541_v60, %v7678_v37 }
 0x19e   :  { %v373_v52 = vpop.permute.xlu0 %372  ;;  %v7851_v58 = vpop.permute.xlu1 %644  ;;  %v435_v6 = vadd.f32 %v431_v22, %v385_v21  ;;  %v572_v63 = vmul.f32 %v7743_v9, %v561_v13  ;;  %v698_v21 = vrot.slane %v678_v26, %v7678_v37  ;;  %v706_v22 = vrot.slane %v686_v3, %v7678_v37 }
 0x19f   :  { %v378_v24 = vsel %vm374_vm14, %v371_v30, %v373_v52  ;;  %v433_v30 = vadd.f32 %v429_v47, %v383_v57  ;;  %v482_v47 = vmul.f32 %v7749_v12, %v474_v53  ;;  %v607_v12 = vrot.slane %v587_v32, %v7688_v39 }
 0x1a0   :  { %v386_v4 = vadd.f32 %v378_v24, %v315_v14  ;;  %v565_v14 = vrot.slane %v545_v61, %v7678_v37  ;;  %v485_v55 = vadd.f32 %v481_v33, %v435_v6  ;;  %v570_v53 = vmul.f32 %v7743_v9, %v553_v59 }
 0x1a1   :  { %v483_v18 = vadd.f32 %v479_v36, %v433_v30  ;;  %v615_v61 = vrot.slane %v595_v7, %v7688_v39  ;;  %v621_v29 = vmul.f32 %v7745_v10, %v607_v12  ;;  %v702_v30 = vrot.slane %v682_v1, %v7678_v37 }
 0x1a2   :  { %v510_v15 = vpop.permute.xlu0 %509  ;;  %v436_v35 = vadd.f32 %v432_v31, %v386_v4  ;;  %v512_v40 = vpop.permute.xlu1 %511  ;;  %v575_v4 = vadd.f32 %v571_v5, %v525_v49  ;;  %v622_v31 = vmul.f32 %v7745_v10, %v611_v56 }
 0x1a3   :  { %v518_v51 = vsel %vm515_vm15, %v510_v15, %v512_v40  ;;  %v524_v54 = vadd.f32 %v516_v45, %v483_v18  ;;  %v573_v15 = vmul.f32 %v7743_v9, %v565_v14  ;;  %v623_v13 = vmul.f32 %v7745_v10, %v615_v61 }
 0x1a4   :  { %v486_v24 = vadd.f32 %v482_v47, %v436_v35  ;;  %v526_v62 = vadd.f32 %v518_v51, %v485_v55  ;;  %v625_v9 = vadd.f32 %v621_v29, %v575_v4  ;;  %v712_v14 = vmul.f32 %v7747_v11, %v698_v21 }
 0x1a5   :  { %v574_v59 = vadd.f32 %v570_v53, %v524_v54  ;;  %v714_v47 = vmul.f32 %v7747_v11, %v706_v22  ;;  %v713_v19 = vmul.f32 %v7747_v11, %v702_v30 }
 0x1a6   :  { %v514_v41 = vpop.permute.xlu0 %513  ;;  %v653_v57 = vpop.permute.xlu1 %652  ;;  %v576_v23 = vadd.f32 %v572_v63, %v526_v62 }
 0x1a7   :  { %v519_v52 = vsel %vm515_vm15, %v512_v40, %v514_v41  ;;  %v624_v38 = vadd.f32 %v620_v28, %v574_v59 }
 0x1a8   :  { %v527_v60 = vadd.f32 %v519_v52, %v486_v24  ;;  %v626_v42 = vadd.f32 %v622_v31, %v576_v23 }
 0x1aa   :  { %v651_v34 = vpop.permute.xlu0 %650  ;;  %v577_v25 = vadd.f32 %v573_v15, %v527_v60  ;;  %v649_v32 = vpop.permute.xlu1 %648 }
 0x1ab   :  { %v659_v6 = vsel %vm9506_vm0, %v651_v34, %v653_v57 }
 0x1ac   :  { %v627_v7 = vadd.f32 %v623_v13, %v577_v25  ;;  %v667_v45 = vadd.f32 %v659_v6, %v626_v42 }
 0x1ae   :  { %v655_v17 = vpop.permute.xlu0 %654 }
 0x1af   :  { %v660_v35 = vsel %vm9506_vm0, %v653_v57, %v655_v17 }
 0x1b0   :  { %v668_v26 = vadd.f32 %v660_v35, %v627_v7 }
 0x1b2   :  { %v647_v36 = vpop.permute.xlu0 %646  ;;  %v718_v50 = vadd.f32 %v714_v47, %v668_v26 }
 0x1b3   :  { %v657_v40 = vsel %vm9506_vm0, %v7851_v58, %v647_v36  ;;  %v658_v41 = vsel %vm9506_vm0, %v647_v36, %v649_v32  ;;  %v717_v58 = vadd.f32 %v713_v19, %v667_v45 }
 0x1b4   :  { %v665_v10 = vadd.f32 %v657_v40, %v624_v38  ;;  %v666_v44 = vadd.f32 %v658_v41, %v625_v9 }
 0x1b6   :  { %v716_v18 = vadd.f32 %v712_v14, %v666_v44  ;;  %v715_v33 = vadd.f32 %v711_v27, %v665_v10  ;;  %v170_v14 = vsel %vm132_vm8, 1, %v7455_v16  ;;  %vm1038_vm8 = vcmask 1047556  }
 0x1b7   :  { %v761_v35 = vrot.slane %v170_v14, %v7688_v39  ;;  %v765_v42 = vrot.slane %v170_v14, %v7697_v43  ;;  %v783_v10 = vrot.slane %v170_v14, %v7678_v37  ;;  %v787_v45 = vrot.slane %v170_v14, %v7786_v46 }
 0x1b8   :  { %731 = vrot.lane.b32.xlu1 %v716_v18, %s7454_s20  ;;  %729 = vrot.lane.b32.xlu0 %v715_v33, %s7454_s20 }
 0x1b9   :  { %v8055_v7 = vrot.slane %v761_v35, %v7688_v39  ;;  %v8063_v20 = vrot.slane %v765_v42, %v7688_v39  ;;  %v8068_v26 = vrot.slane %v783_v10, %v7678_v37  ;;  %v8077_v47 = vrot.slane %v787_v45, %v7678_v37 }
 0x1bb   :  { %vm774_vm2 = vcmp.eq.s32.totalorder %v8055_v7, 1  ;;  %vm775_vm3 = vcmp.eq.s32.totalorder %v8063_v20, 1  ;;  %vm796_vm5 = vcmp.eq.s32.totalorder %v8068_v26, 1  ;;  %vm797_vm7 = vcmp.eq.s32.totalorder %v8077_v47, 1 }
 0x1bc   :  { %735 = vrot.lane.b32.xlu1 %v718_v50, %s7454_s20  ;;  %733 = vrot.lane.b32.xlu0 %v717_v58, %s7454_s20 }
 0x22a   :  { %v732_v51 = vpop.permute.xlu1 %731  ;;  %v730_v52 = vpop.permute.xlu0 %729 }
 0x22b   :  { %748 = vst.msk [vmem:[#allocation3 + $0x10] sm:$0xf] %vm719_vm6, %v732_v51  ;;  %v737_v54 = vsel %vm156_vm4, %v730_v52, %v732_v51 }
 0x22c   :  { %746 = vst.msk [vmem:[#allocation3] sm:$0xf] %vm745_vm1, %v730_v52  ;;  %747 = vst [vmem:[#allocation3 + $0x8] sm:$0xf] %v737_v54 }
 0x22e   :  { %v736_v49 = vpop.permute.xlu1 %735  ;;  %v734_v55 = vpop.permute.xlu0 %733 }
 0x22f   :  { %751 = vst.msk [vmem:[#allocation3 + $0x40] sm:$0xf] %vm719_vm6, %v736_v49  ;;  %v738_v11 = vsel %vm156_vm4, %v734_v55, %v736_v49 }
 0x230   :  { %749 = vst.msk [vmem:[#allocation3 + $0x30] sm:$0xf] %vm745_vm1, %v734_v55  ;;  %750 = vst [vmem:[#allocation3 + $0x38] sm:$0xf] %v738_v11 }
 0x232   :  { %v754_v34 = vld [vmem:[#allocation3 + $0x10] sm:$0xf] }
 0x233   :  { %v7927_v24 = vld [vmem:[#allocation3] sm:$0xf]  ;;  %v7951_v12 = vld [vmem:[#allocation3 + $0x8] sm:$0xf] }
 0x234   :  { %804 = vrot.lane.b32.xlu1 %v7927_v24, %s7463_s4  ;;  %2878 = vst.msk [vmem:[#allocation3] sm:$0xff] %vm156_vm4, %v7470_v2  ;;  %924 = vrot.lane.b32.xlu0 %v7927_v24, %s7467_s26  ;;  %v776_v39 = vsel %vm774_vm2, %v7927_v24, -1e+30  ;;  %v777_v52 = vsel %vm775_vm3, %v7951_v12, -1e+30 }
 0x236   :  { %v757_v53 = vld [vmem:[#allocation3 + $0x40] sm:$0xf] }
 0x237   :  { %v7935_v48 = vld [vmem:[#allocation3 + $0x30] sm:$0xf]  ;;  %v7992_v5 = vld [vmem:[#allocation3 + $0x38] sm:$0xf] }
 0x238   :  { %808 = vrot.lane.b32.xlu1 %v754_v34, %s7463_s4  ;;  %928 = vrot.lane.b32.xlu0 %v754_v34, %s7467_s26  ;;  %2880 = vst.msk [vmem:[#allocation3 + $0x30] sm:$0xff] %vm156_vm4, %v7470_v2 }
 0x23c   :  { %828 = vrot.lane.b32.xlu1 %v7927_v24, %s7462_s3  ;;  %956 = vrot.lane.b32.xlu0 %v7927_v24, %s7468_s29 }
 0x240   :  { %832 = vrot.lane.b32.xlu1 %v754_v34, %s7462_s3  ;;  %960 = vrot.lane.b32.xlu0 %v754_v34, %s7468_s29 }
 0x244   :  { %852 = vrot.lane.b32.xlu1 %v7927_v24, %s7464_s23  ;;  %988 = vrot.lane.b32.xlu0 %v7927_v24, %s7469_s0 }
 0x248   :  { %856 = vrot.lane.b32.xlu1 %v754_v34, %s7464_s23  ;;  %806 = vrot.lane.b32.xlu0 %v7951_v12, %s7463_s4 }
 0x24c   :  { %876 = vrot.lane.b32.xlu1 %v7927_v24, %s7465_s8  ;;  %830 = vrot.lane.b32.xlu0 %v7951_v12, %s7462_s3 }
 0x250   :  { %880 = vrot.lane.b32.xlu1 %v754_v34, %s7465_s8  ;;  %854 = vrot.lane.b32.xlu0 %v7951_v12, %s7464_s23 }
 0x254   :  { %878 = vrot.lane.b32.xlu0 %v7951_v12, %s7465_s8  ;;  %926 = vrot.lane.b32.xlu1 %v7951_v12, %s7467_s26 }
 0x258   :  { %958 = vrot.lane.b32.xlu1 %v7951_v12, %s7468_s29  ;;  %930 = vrot.lane.b32.xlu0 %v7935_v48, %s7467_s26 }
 0x25c   :  { %990 = vrot.lane.b32.xlu1 %v7951_v12, %s7469_s0  ;;  %934 = vrot.lane.b32.xlu0 %v757_v53, %s7467_s26 }
 0x260   :  { %810 = vrot.lane.b32.xlu1 %v7935_v48, %s7463_s4  ;;  %834 = vrot.lane.b32.xlu0 %v7935_v48, %s7462_s3 }
 0x264   :  { %814 = vrot.lane.b32.xlu1 %v757_v53, %s7463_s4  ;;  %838 = vrot.lane.b32.xlu0 %v757_v53, %s7462_s3 }
 0x268   :  { %858 = vrot.lane.b32.xlu1 %v7935_v48, %s7464_s23  ;;  %962 = vrot.lane.b32.xlu0 %v7935_v48, %s7468_s29 }
 0x26c   :  { %862 = vrot.lane.b32.xlu1 %v757_v53, %s7464_s23  ;;  %966 = vrot.lane.b32.xlu0 %v757_v53, %s7468_s29 }
 0x270   :  { %906 = vrot.lane.b32.xlu1 %v7935_v48, %s7466_s16  ;;  %882 = vrot.lane.b32.xlu0 %v7935_v48, %s7465_s8 }
 0x274   :  { %910 = vrot.lane.b32.xlu1 %v757_v53, %s7466_s16  ;;  %886 = vrot.lane.b32.xlu0 %v757_v53, %s7465_s8 }
 0x278   :  { %994 = vrot.lane.b32.xlu0 %v7935_v48, %s7469_s0  ;;  %932 = vrot.lane.b32.xlu1 %v7992_v5, %s7467_s26 }
 0x27c   :  { %998 = vrot.lane.b32.xlu0 %v757_v53, %s7469_s0  ;;  %900 = vrot.lane.b32.xlu1 %v7927_v24, %s7466_s16 }
 0x280   :  { %812 = vrot.lane.b32.xlu0 %v7992_v5, %s7463_s4  ;;  %836 = vrot.lane.b32.xlu1 %v7992_v5, %s7462_s3 }
 0x284   :  { %992 = vrot.lane.b32.xlu0 %v754_v34, %s7469_s0  ;;  %964 = vrot.lane.b32.xlu1 %v7992_v5, %s7468_s29 }
 0x288   :  { %860 = vrot.lane.b32.xlu0 %v7992_v5, %s7464_s23  ;;  %884 = vrot.lane.b32.xlu1 %v7992_v5, %s7465_s8 }
 0x28c   :  { %908 = vrot.lane.b32.xlu0 %v7992_v5, %s7466_s16  ;;  %996 = vrot.lane.b32.xlu1 %v7992_v5, %s7469_s0 }
 0x290   :  { %902 = vrot.lane.b32.xlu0 %v7951_v12, %s7466_s16  ;;  %904 = vrot.lane.b32.xlu1 %v754_v34, %s7466_s16 }
 0x2a6   :  { %v805_v56 = vpop.permute.xlu1 %804  ;;  %v925_v62 = vpop.permute.xlu0 %924 }
 0x2aa   :  { %v809_v63 = vpop.permute.xlu1 %808  ;;  %v929_v57 = vpop.permute.xlu0 %928 }
 0x2ae   :  { %v829_v60 = vpop.permute.xlu1 %828  ;;  %v8019_v61 = vpop.permute.xlu0 %956 }
 0x2b2   :  { %v833_v0 = vpop.permute.xlu1 %832  ;;  %v8021_v1 = vpop.permute.xlu0 %960 }
 0x2b6   :  { %v8023_v3 = vpop.permute.xlu1 %852  ;;  %v8025_v21 = vpop.permute.xlu0 %988 }
 0x2ba   :  { %v8027_v59 = vpop.permute.xlu1 %856  ;;  %v807_v4 = vpop.permute.xlu0 %806 }
 0x2bb   :  { %v816_v46 = vsel %vm198_vm9, %v805_v56, %v807_v4  ;;  %v817_v37 = vsel %vm198_vm9, %v807_v4, %v809_v63 }
 0x2bc   :  { %v824_v54 = vsel %vm796_vm5, %v816_v46, -1e+30  ;;  %v825_v53 = vsel %vm797_vm7, %v817_v37, -1e+30 }
 0x2be   :  { %v8029_v15 = vpop.permute.xlu1 %876  ;;  %v831_v17 = vpop.permute.xlu0 %830 }
 0x2bf   :  { %v840_v55 = vsel %vm211_vm10, %v829_v60, %v831_v17  ;;  %v841_v12 = vsel %vm211_vm10, %v831_v17, %v833_v0  ;;  %v778_v0 = vsel %vm774_vm2, %v7935_v48, -1e+30  ;;  %v779_v17 = vsel %vm775_vm3, %v7992_v5, -1e+30 }
 0x2c0   :  { %v848_v56 = vsel %vm774_vm2, %v840_v55, -1e+30  ;;  %v849_v60 = vsel %vm775_vm3, %v841_v12, -1e+30 }
 0x2c2   :  { %v8031_v23 = vpop.permute.xlu1 %880  ;;  %v8033_v25 = vpop.permute.xlu0 %854 }
 0x2c3   :  { %v864_v5 = vsel %vm224_vm11, %v8023_v3, %v8033_v25 }
 0x2c6   :  { %v927_v28 = vpop.permute.xlu1 %926  ;;  %v8035_v29 = vpop.permute.xlu0 %878 }
 0x2c7   :  { %v936_v43 = vsel %vm374_vm14, %v925_v62, %v927_v28  ;;  %v937_v19 = vsel %vm374_vm14, %v927_v28, %v929_v57 }
 0x2c8   :  { %v944_v50 = vmax.f32 %v776_v39, %v936_v43  ;;  %v945_v49 = vmax.f32 %v777_v52, %v937_v19 }
 0x2ca   :  { %v8037_v30 = vpop.permute.xlu1 %958  ;;  %v931_v22 = vpop.permute.xlu0 %930  ;;  %v948_v11 = vmax.f32 %v944_v50, %v824_v54  ;;  %v949_v62 = vmax.f32 %v945_v49, %v825_v53  ;;  %v888_v49 = vsel %vm9507_vm12, %v8029_v15, %v8035_v29 }
 0x2cb   :  { %v968_v28 = vsel %vm515_vm15, %v8019_v61, %v8037_v30 }
 0x2cc   :  { %v952_v57 = vmax.f32 %v948_v11, %v848_v56  ;;  %v953_v45 = vmax.f32 %v949_v62, %v849_v60 }
 0x2ce   :  { %v8039_v31 = vpop.permute.xlu1 %990  ;;  %v935_v13 = vpop.permute.xlu0 %934  ;;  %v976_v39 = vmax.f32 %v952_v57, %v968_v28 }
 0x2d2   :  { %v811_v32 = vpop.permute.xlu1 %810  ;;  %v835_v36 = vpop.permute.xlu0 %834 }
 0x2d6   :  { %v815_v38 = vpop.permute.xlu1 %814  ;;  %v839_v9 = vpop.permute.xlu0 %838 }
 0x2da   :  { %v8044_v27 = vpop.permute.xlu1 %858  ;;  %v8046_v6 = vpop.permute.xlu0 %962 }
 0x2de   :  { %v8049_v40 = vpop.permute.xlu1 %862  ;;  %v8051_v41 = vpop.permute.xlu0 %966 }
 0x2e2   :  { %v8058_v44 = vpop.permute.xlu1 %906  ;;  %v8060_v16 = vpop.permute.xlu0 %882 }
 0x2e6   :  { %v8071_v18 = vpop.permute.xlu1 %910  ;;  %v8073_v33 = vpop.permute.xlu0 %886 }
 0x2ea   :  { %v933_v58 = vpop.permute.xlu1 %932  ;;  %v8085_v51 = vpop.permute.xlu0 %994 }
 0x2eb   :  { %v938_v63 = vsel %vm374_vm14, %v931_v22, %v933_v58  ;;  %v939_v4 = vsel %vm374_vm14, %v933_v58, %v935_v13  ;;  %v969_v58 = vsel %vm515_vm15, %v8037_v30, %v8021_v1 }
 0x2ec   :  { %v946_v35 = vmax.f32 %v778_v0, %v938_v63  ;;  %v947_v43 = vmax.f32 %v779_v17, %v939_v4  ;;  %v896_v63 = vsel %vm774_vm2, %v888_v49, -1e+30 }
 0x2ee   :  { %v8095_v24 = vpop.permute.xlu1 %900  ;;  %v8097_v34 = vpop.permute.xlu0 %998 }
 0x2f2   :  { %v837_v14 = vpop.permute.xlu1 %836  ;;  %v813_v22 = vpop.permute.xlu0 %812 }
 0x2f3   :  { %v842_v13 = vsel %vm211_vm10, %v835_v36, %v837_v14  ;;  %v818_v42 = vsel %vm198_vm9, %v811_v32, %v813_v22  ;;  %v819_v10 = vsel %vm198_vm9, %v813_v22, %v815_v38  ;;  %v843_v61 = vsel %vm211_vm10, %v837_v14, %v839_v9 }
 0x2f4   :  { %v826_v48 = vsel %vm796_vm5, %v818_v42, -1e+30  ;;  %v827_v46 = vsel %vm797_vm7, %v819_v10, -1e+30  ;;  %v865_v32 = vsel %vm224_vm11, %v8033_v25, %v8027_v59  ;;  %v850_v38 = vsel %vm774_vm2, %v842_v13, -1e+30 }
 0x2f5   :  { %v950_v36 = vmax.f32 %v946_v35, %v826_v48  ;;  %v951_v9 = vmax.f32 %v947_v43, %v827_v46  ;;  %v851_v3 = vsel %vm775_vm3, %v843_v61, -1e+30  ;;  %v872_v59 = vsel %vm796_vm5, %v864_v5, -1e+30 }
 0x2f6   :  { %v965_v19 = vpop.permute.xlu1 %964  ;;  %v993_v50 = vpop.permute.xlu0 %992  ;;  %v977_v25 = vmax.f32 %v953_v45, %v969_v58  ;;  %v980_v55 = vmax.f32 %v976_v39, %v872_v59  ;;  %v873_v30 = vsel %vm797_vm7, %v865_v32, -1e+30  ;;  %v1000_v61 = vsel %vm9506_vm0, %v8025_v21, %v8039_v31 }
 0x2f7   :  { %v954_v52 = vmax.f32 %v950_v36, %v850_v38  ;;  %v970_v37 = vsel %vm515_vm15, %v8046_v6, %v965_v19  ;;  %v955_v54 = vmax.f32 %v951_v9, %v851_v3  ;;  %v971_v1 = vsel %vm515_vm15, %v965_v19, %v8051_v41 }
 0x2f8   :  { %v889_v6 = vsel %vm9507_vm12, %v8035_v29, %v8031_v23  ;;  %v981_v57 = vmax.f32 %v977_v25, %v873_v30  ;;  %v984_v4 = vmax.f32 %v980_v55, %v896_v63  ;;  %v1180_v63 = vld [vmem:[%s9493_s6] sm:$0xff] }
 0x2f9   :  { %v978_v11 = vmax.f32 %v954_v52, %v970_v37  ;;  %v979_v23 = vmax.f32 %v955_v54, %v971_v1 }
 0x2fa   :  { %v885_v53 = vpop.permute.xlu1 %884  ;;  %v861_v12 = vpop.permute.xlu0 %860  ;;  %v1008_v5 = vmax.f32 %v984_v4, %v1000_v61  ;;  %v5559_v61 = vld [vmem:[%s9492_s5 + $0x10] sm:$0xff] }
 0x2fb   :  { %v890_v56 = vsel %vm9507_vm12, %v8060_v16, %v885_v53  ;;  %v891_v15 = vsel %vm9507_vm12, %v885_v53, %v8073_v33  ;;  %v866_v62 = vsel %vm224_vm11, %v8044_v27, %v861_v12  ;;  %v867_v41 = vsel %vm224_vm11, %v861_v12, %v8049_v40  ;;  %v1194_v53 = vld [vmem:[%s9492_s5] sm:$0xff] }
 0x2fc   :  { %v874_v29 = vsel %vm796_vm5, %v866_v62, -1e+30  ;;  %v897_v16 = vsel %vm775_vm3, %v889_v6, -1e+30  ;;  %v875_v33 = vsel %vm797_vm7, %v867_v41, -1e+30  ;;  %v1001_v27 = vsel %vm9506_vm0, %v8039_v31, %v993_v50 }
 0x2fd   :  { %v982_v60 = vmax.f32 %v978_v11, %v874_v29  ;;  %v898_v40 = vsel %vm774_vm2, %v890_v56, -1e+30  ;;  %v899_v28 = vsel %vm775_vm3, %v891_v15, -1e+30  ;;  %v983_v0 = vmax.f32 %v979_v23, %v875_v33  ;;  %v1195_v62 = vld [vmem:[%s9492_s5 + $0x8] sm:$0xff] }
 0x2fe   :  { %v997_v17 = vpop.permute.xlu1 %996  ;;  %v909_v14 = vpop.permute.xlu0 %908  ;;  %v985_v10 = vmax.f32 %v981_v57, %v897_v16 }
 0x2ff   :  { %v986_v22 = vmax.f32 %v982_v60, %v898_v40  ;;  %v1002_v35 = vsel %vm9506_vm0, %v8085_v51, %v997_v17  ;;  %v1003_v13 = vsel %vm9506_vm0, %v997_v17, %v8097_v34  ;;  %v914_v42 = vsel %vm250_vm13, %v8058_v44, %v909_v14  ;;  %vm1039_vm0 = vmor %vm1038_vm8, %vm745_vm1 }
 0x300   :  { %v987_v45 = vmax.f32 %v983_v0, %v899_v28  ;;  %v915_v43 = vsel %vm250_vm13, %v909_v14, %v8071_v18  ;;  %v1009_v39 = vmax.f32 %v985_v10, %v1001_v27  ;;  %v922_v51 = vsel %vm796_vm5, %v914_v42, -1e+30 }
 0x301   :  { %v1010_v48 = vmax.f32 %v986_v22, %v1002_v35  ;;  %v923_v44 = vsel %vm797_vm7, %v915_v43, -1e+30  ;;  %vm1203_vm1 = vcmask 1043456  }
 0x302   :  { %v1011_v46 = vmax.f32 %v987_v45, %v1003_v13  ;;  %v905_v34 = vpop.permute.xlu1 %904  ;;  %v903_v36 = vpop.permute.xlu0 %902 }
 0x303   :  { %v1014_v32 = vmax.f32 %v1010_v48, %v922_v51  ;;  %v912_v18 = vsel %vm250_vm13, %v8095_v24, %v903_v36  ;;  %v913_v38 = vsel %vm250_vm13, %v903_v36, %v905_v34 }
 0x304   :  { %v1015_v9 = vmax.f32 %v1011_v46, %v923_v44  ;;  %v920_v21 = vsel %vm796_vm5, %v912_v18, -1e+30  ;;  %v921_v31 = vsel %vm797_vm7, %v913_v38, -1e+30 }
 0x305   :  { %v1012_v19 = vmax.f32 %v1008_v5, %v920_v21  ;;  %v1013_v50 = vmax.f32 %v1009_v39, %v921_v31  ;;  %v5560_v39 = vld [vmem:[%s9492_s5 + $0x18] sm:$0xff]  ;;  %v5569_v31 = vld [vmem:[%s9492_s5 + $0x20] sm:$0xff] }
 0x306   :  { %v1025_v58 = vcombine.low %v1014_v32, %v1015_v9 }
 0x307   :  { %v1024_v3 = vcombine.low %v1012_v19, %v1013_v50 }
 0x308   :  { %1028 = vrot.lane.b32.xlu0 %v1025_v58, %s7454_s20 }
 0x309   :  { %1026 = vrot.lane.b32.xlu1 %v1024_v3, %s7454_s20 }
 0x37a   :  { %v1029_v52 = vpop.permute.xlu0 %1028 }
 0x37b   :  { %v1031_v24 = vrot.slane %v1029_v52, 4  ;;  %v1027_v37 = vpop.permute.xlu1 %1026 }
 0x37c   :  { %v1030_v59 = vrot.slane %v1027_v37, 4 }
 0x37d   :  { %v1033_v25 = vsel %vm156_vm4, %v1031_v24, %v1029_v52  ;;  %1043 = vst.msk [vmem:[#allocation2 + $0x14] sm:$0xf] %vm719_vm6, %v1031_v24 }
 0x37e   :  { %1042 = vst.msk [vmem:[#allocation2 + $0xc] sm:$0xff] %vm1039_vm0, %v1033_v25  ;;  %v1032_v54 = vsel %vm156_vm4, %v1030_v59, %v1027_v37  ;;  %v5570_v37 = vld [vmem:[%s9492_s5 + $0x28] sm:$0xff] }
 0x37f   :  { %1041 = vst.msk [vmem:[#allocation2 + $0x8] sm:$0xf] %vm719_vm6, %v1030_v59  ;;  %vm1196_vm6 = vcmask 31744  }
 0x380   :  { %1040 = vst.msk [vmem:[#allocation2] sm:$0xff] %vm1039_vm0, %v1032_v54  ;;  %vm9511_vm0 = vcmask 777216  }
 0x381   :  { %vm9512_vm8 = vmmov %vm9511_vm0 }
 0x384   :  { %v1047_v41 = vld [vmem:[#allocation2 + $0x14] sm:$0xf] }
 0x385   :  { %v8203_v49 = vld [vmem:[#allocation2 + $0xc] sm:$0xff] }
 0x386   :  { %v8205_v55 = vld [vmem:[#allocation2 + $0x8] sm:$0xf]  ;;  %v1051_v6 = vcombine.high %v8203_v49, %v8203_v49  ;;  %v1056_v15 = vsel %vm774_vm2, %v8203_v49, 0.0 }
 0x387   :  { %1385 = vrot.lane.b32.xlu0 %v8205_v55, %s7467_s26  ;;  %v8209_v1 = vld [vmem:[#allocation2] sm:$0xff] }
 0x388   :  { %1381 = vrot.lane.b32.xlu1 %v8209_v1, %s7467_s26  ;;  %v8215_v30 = vcombine.high %v8209_v1, %v8209_v1  ;;  %v1054_v12 = vsel %vm774_vm2, %v8209_v1, 0.0  ;;  %v1057_v56 = vsel %vm775_vm3, %v1051_v6, 0.0 }
 0x38a   :  { %v1055_v11 = vsel %vm775_vm3, %v8215_v30, 0.0 }
 0x38b   :  { %1064 = vrot.lane.b32.xlu0 %v8205_v55, %s7463_s4  ;;  %5551 = vmatprep.subr.msk.mxu0 %vm1203_vm1, %v1055_v11 }
 0x38c   :  { %1060 = vrot.lane.b32.xlu1 %v8209_v1, %s7463_s4  ;;  %5552 = vmatpush1.msk.msra.mxu0 %vm1203_vm1, %v1054_v12 }
 0x38d   :  { %5555 = vmatprep.subr.msk.mxu0 %vm1203_vm1, %v1057_v56  ;;  %5553 = vmatmul.mubr.msk.f32.vlgmr.msra.gmra.mrb[0].mxu0 %vm1196_vm6, %v1194_v53 }
 0x38e   :  { %5556 = vmatpush1.msk.msra.mxu0 %vm1203_vm1, %v1056_v15  ;;  %1280 = vmatprep.mubr.f32.mxu0 %v7452_v8  ;;  %v5580_v15 = vld [vmem:[%s9492_s5 + $0x38] sm:$0xff] }
 0x38f   :  { %1088 = vrot.lane.b32.xlu0 %v8205_v55, %s7462_s3 }
 0x390   :  { %1084 = vrot.lane.b32.xlu1 %v8209_v1, %s7462_s3 }
 0x391   :  { %5554 = vmatmul.mubr.msk.f32.gmra.mrb[2].mxu0 %vm1196_vm6, %v1195_v62 }
 0x392   :  { %1357 = vmatprep.mubr.f32.mxu0 %v7452_v8 }
 0x393   :  { %1946 = vrot.lane.b32.xlu0 %v8205_v55, %s7468_s29 }
 0x394   :  { %1942 = vrot.lane.b32.xlu1 %v8209_v1, %s7468_s29 }
 0x395   :  { %5557 = vmatmul.mubr.msk.f32.vlgmr.msra.gmra.mrb[4].mxu0 %vm1196_vm6, %v1194_v53  ;;  %v5579_v53 = vld [vmem:[%s9492_s5 + $0x30] sm:$0xff] }
 0x396   :  { %1363 = vmatprep.mubr.f32.mxu0 %v7452_v8 }
 0x397   :  { %1476 = vrot.lane.b32.xlu0 %v8203_v49, %s7467_s26 }
 0x398   :  { %1480 = vrot.lane.b32.xlu1 %v1047_v41, %s7467_s26 }
 0x399   :  { %5558 = vmatmul.mubr.msk.f32.gmra.mrb[6].mxu0 %vm1196_vm6, %v1195_v62 }
 0x39a   :  { %1463 = vmatprep.mubr.f32.mxu0 %v7452_v8 }
 0x39b   :  { %1066 = vrot.lane.b32.xlu0 %v8203_v49, %s7463_s4 }
 0x39c   :  { %1070 = vrot.lane.b32.xlu1 %v1047_v41, %s7463_s4 }
 0x39f   :  { %1090 = vrot.lane.b32.xlu0 %v8203_v49, %s7462_s3 }
 0x3a0   :  { %1094 = vrot.lane.b32.xlu1 %v1047_v41, %s7462_s3 }
 0x3a3   :  { %2037 = vrot.lane.b32.xlu0 %v8203_v49, %s7468_s29 }
 0x3a4   :  { %2041 = vrot.lane.b32.xlu1 %v1047_v41, %s7468_s29 }
 0x3a7   :  { %1478 = vrot.lane.b32.xlu0 %v1051_v6, %s7467_s26 }
 0x3a8   :  { %1118 = vrot.lane.b32.xlu1 %v1047_v41, %s7464_s23 }
 0x3ab   :  { %1114 = vrot.lane.b32.xlu0 %v8203_v49, %s7464_s23 }
 0x3ac   :  { %1383 = vrot.lane.b32.xlu1 %v8215_v30, %s7467_s26 }
 0x3af   :  { %1068 = vrot.lane.b32.xlu0 %v1051_v6, %s7463_s4 }
 0x3b0   :  { %1062 = vrot.lane.b32.xlu1 %v8215_v30, %s7463_s4 }
 0x3b3   :  { %1112 = vrot.lane.b32.xlu0 %v8205_v55, %s7464_s23 }
 0x3b4   :  { %1086 = vrot.lane.b32.xlu1 %v8215_v30, %s7462_s3 }
 0x3b7   :  { %1092 = vrot.lane.b32.xlu0 %v1051_v6, %s7462_s3 }
 0x3b8   :  { %1944 = vrot.lane.b32.xlu1 %v8215_v30, %s7468_s29 }
 0x3bb   :  { %1138 = vrot.lane.b32.xlu0 %v8203_v49, %s7465_s8 }
 0x3bc   :  { %1110 = vrot.lane.b32.xlu1 %v8215_v30, %s7464_s23 }
 0x3bf   :  { %2039 = vrot.lane.b32.xlu0 %v1051_v6, %s7468_s29 }
 0x3c0   :  { %1108 = vrot.lane.b32.xlu1 %v8209_v1, %s7464_s23 }
 0x3c3   :  { %1136 = vrot.lane.b32.xlu0 %v8205_v55, %s7465_s8 }
 0x3c4   :  { %1142 = vrot.lane.b32.xlu1 %v1047_v41, %s7465_s8 }
 0x3c7   :  { %1116 = vrot.lane.b32.xlu0 %v1051_v6, %s7464_s23 }
 0x3c8   :  { %1134 = vrot.lane.b32.xlu1 %v8215_v30, %s7465_s8 }
 0x3cb   :  { %2598 = vrot.lane.b32.xlu0 %v8203_v49, %s7469_s0 }
 0x3cc   :  { %1132 = vrot.lane.b32.xlu1 %v8209_v1, %s7465_s8 }
 0x3cf   :  { %1140 = vrot.lane.b32.xlu0 %v1051_v6, %s7465_s8 }
 0x3d0   :  { %2602 = vrot.lane.b32.xlu1 %v1047_v41, %s7469_s0 }
 0x3d3   :  { %2507 = vrot.lane.b32.xlu0 %v8205_v55, %s7469_s0 }
 0x3d4   :  { %2505 = vrot.lane.b32.xlu1 %v8215_v30, %s7469_s0 }
 0x3d7   :  { %2600 = vrot.lane.b32.xlu0 %v1051_v6, %s7469_s0 }
 0x3d8   :  { %2503 = vrot.lane.b32.xlu1 %v8209_v1, %s7469_s0 }
 0x3db   :  { %1162 = vrot.lane.b32.xlu0 %v8203_v49, %s7466_s16 }
 0x3dc   :  { %1166 = vrot.lane.b32.xlu1 %v1047_v41, %s7466_s16 }
 0x3df   :  { %1164 = vrot.lane.b32.xlu0 %v1051_v6, %s7466_s16 }
 0x3e0   :  { %1158 = vrot.lane.b32.xlu1 %v8215_v30, %s7466_s16 }
 0x3e3   :  { %1160 = vrot.lane.b32.xlu0 %v8205_v55, %s7466_s16 }
 0x3e4   :  { %1156 = vrot.lane.b32.xlu1 %v8209_v1, %s7466_s16 }
 0x3e7   :  { %1184 = vperm.xlu0 %7024, %v1180_v63  }
 0x3f9   :  { %v1386_v57 = vpop.permute.xlu0 %1385 }
 0x3fa   :  { %v1382_v23 = vpop.permute.xlu1 %1381 }
 0x3fd   :  { %v1065_v29 = vpop.permute.xlu0 %1064 }
 0x3fe   :  { %v1061_v16 = vpop.permute.xlu1 %1060 }
 0x401   :  { %v1089_v4 = vpop.permute.xlu0 %1088 }
 0x402   :  { %v1085_v33 = vpop.permute.xlu1 %1084 }
 0x405   :  { %v8327_v60 = vpop.permute.xlu0 %1946 }
 0x406   :  { %v8329_v27 = vpop.permute.xlu1 %1942 }
 0x409   :  { %v1477_v40 = vpop.permute.xlu0 %1476 }
 0x40a   :  { %v1481_v28 = vpop.permute.xlu1 %1480 }
 0x40d   :  { %v1067_v0 = vpop.permute.xlu0 %1066 }
 0x40e   :  { %v1071_v17 = vpop.permute.xlu1 %1070 }
 0x411   :  { %v1091_v14 = vpop.permute.xlu0 %1090 }
 0x412   :  { %v1095_v22 = vpop.permute.xlu1 %1094 }
 0x415   :  { %v8331_v35 = vpop.permute.xlu0 %2037 }
 0x416   :  { %v8333_v13 = vpop.permute.xlu1 %2041 }
 0x419   :  { %v1479_v42 = vpop.permute.xlu0 %1478 }
 0x41a   :  { %v8335_v10 = vpop.permute.xlu1 %1118  ;;  %v1483_v45 = vsel %vm374_vm14, %v1479_v42, %v1481_v28  ;;  %v1482_v43 = vsel %vm374_vm14, %v1477_v40, %v1479_v42  ;;  %v5590_v40 = vld [vmem:[%s9492_s5 + $0x48] sm:$0xff] }
 0x41b   :  { %5565 = vmatprep.subr.msk.mxu1 %vm1203_vm1, %v1483_v45 }
 0x41c   :  { %5566 = vmatpush1.msk.msra.mxu1 %vm1203_vm1, %v1482_v43 }
 0x41d   :  { %v8344_v48 = vpop.permute.xlu0 %1114  ;;  %5567 = vmatmul.mubr.msk.f32.vlgmr.msra.gmra.mrb[0].mxu1 %vm1196_vm6, %v5559_v61 }
 0x41e   :  { %v1384_v5 = vpop.permute.xlu1 %1383  ;;  %1558 = vmatprep.mubr.f32.mxu1 %v7452_v8 }
 0x41f   :  { %v1387_v46 = vsel %vm374_vm14, %v1382_v23, %v1384_v5  ;;  %v1388_v51 = vsel %vm374_vm14, %v1384_v5, %v1386_v57  ;;  %v5600_v5 = vld [vmem:[%s9492_s5 + $0x58] sm:$0xff] }
 0x420   :  { %5561 = vmatprep.subr.msk.mxu0 %vm1203_vm1, %v1388_v51 }
 0x421   :  { %v1069_v34 = vpop.permute.xlu0 %1068  ;;  %5562 = vmatpush1.msk.msra.mxu0 %vm1203_vm1, %v1387_v46  ;;  %5568 = vmatmul.mubr.msk.f32.gmra.mrb[2].mxu1 %vm1196_vm6, %v5560_v39 }
 0x422   :  { %v1074_v36 = vsel %vm198_vm9, %v1067_v0, %v1069_v34  ;;  %v1075_v44 = vsel %vm198_vm9, %v1069_v34, %v1071_v17  ;;  %v1063_v32 = vpop.permute.xlu1 %1062  ;;  %5563 = vmatmul.mubr.msk.f32.vlgmr.msra.gmra.mrb[0].mxu0 %vm1196_vm6, %v5559_v61  ;;  %1735 = vmatprep.mubr.f32.mxu1 %v7452_v8 }
 0x423   :  { %v1082_v18 = vsel %vm796_vm5, %v1074_v36, 0.0  ;;  %v1083_v38 = vsel %vm797_vm7, %v1075_v44, 0.0  ;;  %v1072_v9 = vsel %vm198_vm9, %v1061_v16, %v1063_v32  ;;  %v1073_v21 = vsel %vm198_vm9, %v1063_v32, %v1065_v29  ;;  %1469 = vmatprep.mubr.f32.mxu0 %v7452_v8 }
 0x424   :  { %v1080_v19 = vsel %vm796_vm5, %v1072_v9, 0.0  ;;  %v1081_v50 = vsel %vm797_vm7, %v1073_v21, 0.0  ;;  %5575 = vmatprep.subr.msk.mxu1 %vm1203_vm1, %v1083_v38 }
 0x425   :  { %v1113_v58 = vpop.permute.xlu0 %1112  ;;  %5571 = vmatprep.subr.msk.mxu0 %vm1203_vm1, %v1081_v50  ;;  %5576 = vmatpush1.msk.msra.mxu1 %vm1203_vm1, %v1082_v18  ;;  %v5609_v18 = vld [vmem:[%s9492_s5 + $0x60] sm:$0xff] }
 0x426   :  { %5577 = vmatmul.mubr.msk.f32.vlgmr.msra.gmra.mrb[0].mxu1 %vm1196_vm6, %v5569_v31  ;;  %v1087_v3 = vpop.permute.xlu1 %1086  ;;  %5564 = vmatmul.mubr.msk.f32.gmra.mrb[2].mxu0 %vm1196_vm6, %v5560_v39 }
 0x427   :  { %v1096_v52 = vsel %vm211_vm10, %v1085_v33, %v1087_v3  ;;  %v1097_v24 = vsel %vm211_vm10, %v1087_v3, %v1089_v4  ;;  %5572 = vmatpush1.msk.msra.mxu0 %vm1203_vm1, %v1080_v19  ;;  %1652 = vmatprep.mubr.f32.mxu0 %v7452_v8  ;;  %v5589_v4 = vld [vmem:[%s9492_s5 + $0x40] sm:$0xff] }
 0x428   :  { %v1104_v59 = vsel %vm774_vm2, %v1096_v52, 0.0  ;;  %v1105_v25 = vsel %vm775_vm3, %v1097_v24, 0.0  ;;  %1741 = vmatprep.mubr.f32.mxu1 %v7452_v8  ;;  %v5619_v24 = vld [vmem:[%s9492_s5 + $0x70] sm:$0xff] }
 0x429   :  { %v1093_v54 = vpop.permute.xlu0 %1092  ;;  %5581 = vmatprep.subr.msk.mxu0 %vm1203_vm1, %v1105_v25  ;;  %v5620_v25 = vld [vmem:[%s9492_s5 + $0x78] sm:$0xff] }
 0x42a   :  { %v1098_v49 = vsel %vm211_vm10, %v1091_v14, %v1093_v54  ;;  %v1099_v55 = vsel %vm211_vm10, %v1093_v54, %v1095_v22  ;;  %5578 = vmatmul.mubr.msk.f32.gmra.mrb[2].mxu1 %vm1196_vm6, %v5570_v37  ;;  %v1945_v1 = vpop.permute.xlu1 %1944  ;;  %5573 = vmatmul.mubr.msk.f32.vlgmr.msra.gmra.mrb[0].mxu0 %vm1196_vm6, %v5569_v31  ;;  %v5610_v31 = vld [vmem:[%s9492_s5 + $0x68] sm:$0xff] }
 0x42b   :  { %v1106_v30 = vsel %vm774_vm2, %v1098_v49, 0.0  ;;  %v1107_v6 = vsel %vm775_vm3, %v1099_v55, 0.0  ;;  %v1949_v11 = vsel %vm515_vm15, %v1945_v1, %v8327_v60  ;;  %5582 = vmatpush1.msk.msra.mxu0 %vm1203_vm1, %v1104_v59  ;;  %1658 = vmatprep.mubr.f32.mxu0 %v7452_v8  ;;  %v1948_v63 = vsel %vm515_vm15, %v8329_v27, %v1945_v1 }
 0x42c   :  { %5585 = vmatprep.subr.msk.mxu1 %vm1203_vm1, %v1107_v6  ;;  %5591 = vmatprep.subr.msk.mxu0 %vm1203_vm1, %v1949_v11  ;;  %v5629_v11 = vld [vmem:[%s9492_s5 + $0x80] sm:$0xff] }
 0x42d   :  { %v1139_v12 = vpop.permute.xlu0 %1138  ;;  %5586 = vmatpush1.msk.msra.mxu1 %vm1203_vm1, %v1106_v30  ;;  %1918 = vmatprep.mubr.f32.mxu1 %v7452_v8 }
 0x42e   :  { %5587 = vmatmul.mubr.msk.f32.vlgmr.msra.gmra.mrb[0].mxu1 %vm1196_vm6, %v5579_v53  ;;  %v1111_v56 = vpop.permute.xlu1 %1110  ;;  %5574 = vmatmul.mubr.msk.f32.gmra.mrb[2].mxu0 %vm1196_vm6, %v5570_v37 }
 0x42f   :  { %1835 = vmatprep.mubr.f32.mxu0 %v7452_v8  ;;  %1924 = vmatprep.mubr.f32.mxu1 %v7452_v8  ;;  %v1121_v62 = vsel %vm224_vm11, %v1111_v56, %v1113_v58 }
 0x430   :  { %v1129_v16 = vsel %vm797_vm7, %v1121_v62, 0.0 }
 0x431   :  { %v2040_v41 = vpop.permute.xlu0 %2039 }
 0x432   :  { %v2043_v57 = vsel %vm515_vm15, %v8331_v35, %v2040_v41  ;;  %v2044_v23 = vsel %vm515_vm15, %v2040_v41, %v8333_v13  ;;  %5588 = vmatmul.mubr.msk.f32.gmra.mrb[2].mxu1 %vm1196_vm6, %v5580_v15  ;;  %v1109_v29 = vpop.permute.xlu1 %1108  ;;  %5583 = vmatmul.mubr.msk.f32.vlgmr.msra.gmra.mrb[0].mxu0 %vm1196_vm6, %v5579_v53  ;;  %v5630_v41 = vld [vmem:[%s9492_s5 + $0x88] sm:$0xff] }
 0x433   :  { %5592 = vmatpush1.msk.msra.mxu0 %vm1203_vm1, %v1948_v63  ;;  %5595 = vmatprep.subr.msk.mxu1 %vm1203_vm1, %v2044_v23  ;;  %v1120_v27 = vsel %vm224_vm11, %v1109_v29, %v1111_v56 }
 0x434   :  { %5601 = vmatprep.subr.msk.mxu0 %vm1203_vm1, %v1129_v16  ;;  %5596 = vmatpush1.msk.msra.mxu1 %vm1203_vm1, %v2043_v57  ;;  %v1128_v0 = vsel %vm796_vm5, %v1120_v27, 0.0 }
 0x435   :  { %v1137_v33 = vpop.permute.xlu0 %1136  ;;  %1841 = vmatprep.mubr.f32.mxu0 %v7452_v8  ;;  %2113 = vmatprep.mubr.f32.mxu1 %v7452_v8 }
 0x436   :  { %5597 = vmatmul.mubr.msk.f32.vlgmr.msra.gmra.mrb[0].mxu1 %vm1196_vm6, %v5589_v4  ;;  %v1143_v60 = vpop.permute.xlu1 %1142  ;;  %5584 = vmatmul.mubr.msk.f32.gmra.mrb[2].mxu0 %vm1196_vm6, %v5580_v15 }
 0x437   :  { %2024 = vmatprep.mubr.f32.mxu0 %v7452_v8  ;;  %2119 = vmatprep.mubr.f32.mxu1 %v7452_v8 }
 0x439   :  { %v1117_v28 = vpop.permute.xlu0 %1116 }
 0x43a   :  { %v1122_v17 = vsel %vm224_vm11, %v8344_v48, %v1117_v28  ;;  %v1123_v14 = vsel %vm224_vm11, %v1117_v28, %v8335_v10  ;;  %5598 = vmatmul.mubr.msk.f32.gmra.mrb[2].mxu1 %vm1196_vm6, %v5590_v40  ;;  %v1135_v22 = vpop.permute.xlu1 %1134  ;;  %5593 = vmatmul.mubr.msk.f32.vlgmr.msra.gmra.mrb[0].mxu0 %vm1196_vm6, %v5589_v4  ;;  %v5599_v10 = vld [vmem:[%s9492_s5 + $0x50] sm:$0xff] }
 0x43b   :  { %v1130_v35 = vsel %vm796_vm5, %v1122_v17, 0.0  ;;  %v1131_v13 = vsel %vm797_vm7, %v1123_v14, 0.0  ;;  %v1145_v42 = vsel %vm9507_vm12, %v1135_v22, %v1137_v33  ;;  %5602 = vmatpush1.msk.msra.mxu0 %vm1203_vm1, %v1128_v0  ;;  %2030 = vmatprep.mubr.f32.mxu0 %v7452_v8 }
 0x43c   :  { %v1153_v45 = vsel %vm775_vm3, %v1145_v42, 0.0  ;;  %5605 = vmatprep.subr.msk.mxu1 %vm1203_vm1, %v1131_v13  ;;  %2296 = vmatprep.mubr.f32.mxu1 %v7452_v8 }
 0x43d   :  { %v2599_v43 = vpop.permute.xlu0 %2598  ;;  %5606 = vmatpush1.msk.msra.mxu1 %vm1203_vm1, %v1130_v35  ;;  %5611 = vmatprep.subr.msk.mxu0 %vm1203_vm1, %v1153_v45 }
 0x43e   :  { %5607 = vmatmul.mubr.msk.f32.vlgmr.msra.gmra.mrb[0].mxu1 %vm1196_vm6, %v5599_v10  ;;  %v1133_v61 = vpop.permute.xlu1 %1132  ;;  %5594 = vmatmul.mubr.msk.f32.gmra.mrb[2].mxu0 %vm1196_vm6, %v5590_v40 }
 0x43f   :  { %v1144_v48 = vsel %vm9507_vm12, %v1133_v61, %v1135_v22  ;;  %2213 = vmatprep.mubr.f32.mxu0 %v7452_v8  ;;  %2302 = vmatprep.mubr.f32.mxu1 %v7452_v8 }
 0x440   :  { %v1152_v39 = vsel %vm774_vm2, %v1144_v48, 0.0 }
 0x441   :  { %v1141_v46 = vpop.permute.xlu0 %1140 }
 0x442   :  { %v1146_v51 = vsel %vm9507_vm12, %v1139_v12, %v1141_v46  ;;  %v1147_v34 = vsel %vm9507_vm12, %v1141_v46, %v1143_v60  ;;  %5608 = vmatmul.mubr.msk.f32.gmra.mrb[2].mxu1 %vm1196_vm6, %v5600_v5  ;;  %v2603_v36 = vpop.permute.xlu1 %2602  ;;  %5603 = vmatmul.mubr.msk.f32.vlgmr.msra.gmra.mrb[0].mxu0 %vm1196_vm6, %v5599_v10  ;;  %vm9513_vm12 = vmmov %vm9511_vm0 }
 0x443   :  { %v1154_v44 = vsel %vm774_vm2, %v1146_v51, 0.0  ;;  %v1155_v32 = vsel %vm775_vm3, %v1147_v34, 0.0  ;;  %5612 = vmatpush1.msk.msra.mxu0 %vm1203_vm1, %v1152_v39  ;;  %2219 = vmatprep.mubr.f32.mxu0 %v7452_v8 }
 0x444   :  { %5615 = vmatprep.subr.msk.mxu1 %vm1203_vm1, %v1155_v32  ;;  %2479 = vmatprep.mubr.f32.mxu1 %v7452_v8 }
 0x445   :  { %v2508_v38 = vpop.permute.xlu0 %2507  ;;  %5616 = vmatpush1.msk.msra.mxu1 %vm1203_vm1, %v1154_v44 }
 0x446   :  { %5617 = vmatmul.mubr.msk.f32.vlgmr.msra.gmra.mrb[0].mxu1 %vm1196_vm6, %v5609_v18  ;;  %v2506_v9 = vpop.permute.xlu1 %2505  ;;  %5604 = vmatmul.mubr.msk.f32.gmra.mrb[2].mxu0 %vm1196_vm6, %v5600_v5 }
 0x447   :  { %v2510_v21 = vsel %vm9511_vm0, %v2506_v9, %v2508_v38  ;;  %2396 = vmatprep.mubr.f32.mxu0 %v7452_v8  ;;  %2485 = vmatprep.mubr.f32.mxu1 %v7452_v8 }
 0x448   :  { %5621 = vmatprep.subr.msk.mxu0 %vm1203_vm1, %v2510_v21 }
 0x449   :  { %v2601_v19 = vpop.permute.xlu0 %2600 }
 0x44a   :  { %v2604_v50 = vsel %vm9512_vm8, %v2599_v43, %v2601_v19  ;;  %v2605_v58 = vsel %vm9513_vm12, %v2601_v19, %v2603_v36  ;;  %5618 = vmatmul.mubr.msk.f32.gmra.mrb[2].mxu1 %vm1196_vm6, %v5610_v31  ;;  %v2504_v3 = vpop.permute.xlu1 %2503  ;;  %5613 = vmatmul.mubr.msk.f32.vlgmr.msra.gmra.mrb[0].mxu0 %vm1196_vm6, %v5609_v18  ;;  %vm2882_vm12 = vcmask 277640   ;;  %v3420_v19 = vld [vmem:[#allocation8 + $0x80] sm:$0xff] }
 0x44b   :  { %v2509_v52 = vsel %vm9511_vm0, %v2504_v3, %v2506_v9  ;;  %5625 = vmatprep.subr.msk.mxu1 %vm1203_vm1, %v2605_v58  ;;  %2402 = vmatprep.mubr.f32.mxu0 %v7452_v8  ;;  %2885 = vst.msk [vmem:[#allocation3 + $0x40] sm:$0xff] %vm2882_vm12, %v7470_v2  ;;  %2883 = vst.msk [vmem:[#allocation3 + $0x10] sm:$0xff] %vm2882_vm12, %v7470_v2  ;;  %v3404_v3 = vld [vmem:[#allocation8] sm:$0xff] }
 0x44c   :  { %5622 = vmatpush1.msk.msra.mxu0 %vm1203_vm1, %v2509_v52  ;;  %5626 = vmatpush1.msk.msra.mxu1 %vm1203_vm1, %v2604_v50  ;;  %2884 = vst.msk [vmem:[#allocation3 + $0x28] sm:$0xff] %vm2882_vm12, %v7470_v2  ;;  %2886 = vst.msk [vmem:[#allocation3 + $0x58] sm:$0xff] %vm2882_vm12, %v7470_v2  ;;  %v1181_v2 = vld [vmem:[%s9493_s6 + $0x8] sm:$0xff] }
 0x44d   :  { %v1163_v37 = vpop.permute.xlu0 %1162  ;;  %2674 = vmatprep.mubr.f32.mxu1 %v7452_v8  ;;  %v3421_v50 = vld [vmem:[#allocation8 + $0x88] sm:$0xff] }
 0x44e   :  { %5627 = vmatmul.mubr.msk.f32.vlgmr.msra.gmra.mrb[0].mxu1 %vm1196_vm6, %v5619_v24  ;;  %v1167_v59 = vpop.permute.xlu1 %1166  ;;  %5614 = vmatmul.mubr.msk.f32.gmra.mrb[2].mxu0 %vm1196_vm6, %v5610_v31  ;;  %v6338_v58 = vpack.c.bf16 %v3421_v50, %v3420_v19  ;;  %v3405_v52 = vld [vmem:[#allocation8 + $0x8] sm:$0xff] }
 0x44f   :  { %2585 = vmatprep.mubr.f32.mxu0 %v7452_v8  ;;  %2680 = vmatprep.mubr.f32.mxu1 %v7452_v8 }
 0x451   :  { %v1165_v54 = vpop.permute.xlu0 %1164 }
 0x452   :  { %v1170_v49 = vsel %vm250_vm13, %v1163_v37, %v1165_v54  ;;  %v1171_v55 = vsel %vm250_vm13, %v1165_v54, %v1167_v59  ;;  %5628 = vmatmul.mubr.msk.f32.gmra.mrb[2].mxu1 %vm1196_vm6, %v5620_v25  ;;  %v1159_v1 = vpop.permute.xlu1 %1158  ;;  %5623 = vmatmul.mubr.msk.f32.vlgmr.msra.gmra.mrb[0].mxu0 %vm1196_vm6, %v5619_v24  ;;  %v6340_v24 = vpack.c.bf16 %v3405_v52, %v3404_v3  ;;  %v3535_v37 = vld [vmem:[#allocation8 + $0x180] sm:$0xff]  ;;  %v3536_v59 = vld [vmem:[#allocation8 + $0x188] sm:$0xff] }
 0x453   :  { %v1178_v30 = vsel %vm796_vm5, %v1170_v49, 0.0  ;;  %v1179_v6 = vsel %vm797_vm7, %v1171_v55, 0.0  ;;  %2591 = vmatprep.mubr.f32.mxu0 %v7452_v8  ;;  %2857 = vmatprep.mubr.f32.mxu1 %v7452_v8  ;;  %v6370_v54 = vpack.c.bf16 %v3536_v59, %v3535_v37  ;;  %v3520_v49 = vld [vmem:[#allocation8 + $0x108] sm:$0xff]  ;;  %v3422_v55 = vld [vmem:[#allocation8 + $0x90] sm:$0xff]  ;;  %v3412_v3 = vld [vmem:[#allocation8 + $0x40] sm:$0xff] }
 0x454   :  { %5635 = vmatprep.subr.msk.mxu1 %vm1203_vm1, %v1179_v6  ;;  %v3543_v37 = vld [vmem:[#allocation8 + $0x1c0] sm:$0xff]  ;;  %v3544_v59 = vld [vmem:[#allocation8 + $0x1c8] sm:$0xff] }
 0x455   :  { %v1161_v53 = vpop.permute.xlu0 %1160  ;;  %5636 = vmatpush1.msk.msra.mxu1 %vm1203_vm1, %v1178_v30 }
 0x456   :  { %v1169_v12 = vsel %vm250_vm13, %v1159_v1, %v1161_v53  ;;  %5637 = vmatmul.mubr.msk.f32.vlgmr.msra.gmra.mrb[0].mxu1 %vm1196_vm6, %v5629_v11  ;;  %v1157_v56 = vpop.permute.xlu1 %1156  ;;  %5624 = vmatmul.mubr.msk.f32.gmra.mrb[2].mxu0 %vm1196_vm6, %v5620_v25  ;;  %v3519_v25 = vld [vmem:[#allocation8 + $0x100] sm:$0xff]  ;;  %v3407_v53 = vld [vmem:[#allocation8 + $0x18] sm:$0xff] }
 0x457   :  { %v1177_v15 = vsel %vm797_vm7, %v1169_v12, 0.0  ;;  %v1168_v62 = vsel %vm250_vm13, %v1157_v56, %v1159_v1  ;;  %2774 = vmatprep.mubr.f32.mxu0 %v7452_v8  ;;  %2863 = vmatprep.mubr.f32.mxu1 %v7452_v8  ;;  %v3423_v1 = vld [vmem:[#allocation8 + $0x98] sm:$0xff]  ;;  %v6372_v30 = vpack.c.bf16 %v3520_v49, %v3519_v25  ;;  %v3537_v12 = vld [vmem:[#allocation8 + $0x190] sm:$0xff]  ;;  %v3527_v49 = vld [vmem:[#allocation8 + $0x140] sm:$0xff] }
 0x458   :  { %v1176_v63 = vsel %vm796_vm5, %v1168_v62, 0.0  ;;  %5631 = vmatprep.subr.msk.mxu0 %vm1203_vm1, %v1177_v15  ;;  %v6342_v6 = vpack.c.bf16 %v3423_v1, %v3422_v55  ;;  %6371 = vmatprep.subr.bf16.mxu1 %v6370_v54  ;;  %v3538_v15 = vld [vmem:[#allocation8 + $0x198] sm:$0xff]  ;;  %v3521_v62 = vld [vmem:[#allocation8 + $0x110] sm:$0xff]  ;;  %v6386_v54 = vpack.c.bf16 %v3544_v59, %v3543_v37  ;;  %v3528_v55 = vld [vmem:[#allocation8 + $0x148] sm:$0xff] }
 0x459   :  { %5632 = vmatpush1.msk.msra.mxu0 %vm1203_vm1, %v1176_v63  ;;  %vm2927_vm1 = vcmask 1047688   ;;  %6373 = vmatpush3.bf16.msra.mxu1 %v6372_v30  ;;  %v6374_v63 = vpack.c.bf16 %v3538_v15, %v3537_v12  ;;  %v6388_v1 = vpack.c.bf16 %v3528_v55, %v3527_v49  ;;  %v3430_v30 = vld [vmem:[#allocation8 + $0xd0] sm:$0xff]  ;;  %v3415_v12 = vld [vmem:[#allocation8 + $0x58] sm:$0xff] }
 0x45a   :  { %5633 = vmatmul.mubr.msk.f32.vlgmr.msra.gmra.mrb[0].mxu0 %vm1196_vm6, %v5629_v11  ;;  %5638 = vmatmul.mubr.msk.f32.gmra.mrb[2].mxu1 %vm1196_vm6, %v5630_v41  ;;  %v3406_v11 = vld [vmem:[#allocation8 + $0x10] sm:$0xff] }
 0x45b   :  { %2780 = vmatprep.mubr.f32.mxu0 %v7452_v8  ;;  %6339 = vmatprep.subr.bf16.mxu0 %v6338_v58  ;;  %v6344_v56 = vpack.c.bf16 %v3407_v53, %v3406_v11  ;;  %v3429_v58 = vld [vmem:[#allocation8 + $0xc8] sm:$0xff]  ;;  %v3414_v53 = vld [vmem:[#allocation8 + $0x50] sm:$0xff] }
 0x45c   :  { %6341 = vmatpush3.bf16.msra.mxu0 %v6340_v24  ;;  %6375 = vmatprep.subr.bf16.mxu1 %v6374_v63  ;;  %v3413_v24 = vld [vmem:[#allocation8 + $0x48] sm:$0xff]  ;;  %v3545_v15 = vld [vmem:[#allocation8 + $0x1d0] sm:$0xff] }
 0x45d   :  { %6343 = vmatprep.subr.bf16.mxu0 %v6342_v6  ;;  %v6356_v25 = vpack.c.bf16 %v3413_v24, %v3412_v3  ;;  %v3431_v6 = vld [vmem:[#allocation8 + $0xd8] sm:$0xff] }
 0x45e   :  { %5634 = vmatmul.mubr.msk.f32.gmra.mrb[2].mxu0 %vm1196_vm6, %v5630_v41  ;;  %v3522_v41 = vld [vmem:[#allocation8 + $0x118] sm:$0xff]  ;;  %v6358_v11 = vpack.c.bf16 %v3431_v6, %v3430_v30  ;;  %vm9514_vm6 = vcmask 785408  }
 0x45f   :  { %vm9515_vm8 = vmmov %vm9514_vm6 }
 0x460   :  { %6345 = vmatpush3.bf16.msra.mxu0 %v6344_v56  ;;  %v6360_v56 = vpack.c.bf16 %v3415_v12, %v3414_v53  ;;  %vm9516_vm0 = vmmov %vm9514_vm6 }
 0x461   :  { %vm9517_vm12 = vmmov %vm9516_vm0 }
 0x466   :  { %v1185_v4 = vpop.permute.xlu0 %1184 }
 0x468   :  { %v1359_v57 = vpop.f32.mrb[4].mxu0 }
 0x469   :  { %v1361_v23 = vpop.f32.mrb[5].mxu0  ;;  %v1374_v33 = vadd.f32 %v1359_v57, %v1185_v4  ;;  %v6376_v57 = vpack.c.bf16 %v3522_v41, %v3521_v62  ;;  %v3546_v62 = vld [vmem:[#allocation8 + $0x1d8] sm:$0xff]  ;;  %v3529_v41 = vld [vmem:[#allocation8 + $0x150] sm:$0xff] }
 0x46a   :  { %v1375_v60 = vadd.f32 %v1361_v23, %v1185_v4  ;;  %v3424_v23 = vld [vmem:[#allocation8 + $0xa0] sm:$0xff]  ;;  %v6390_v63 = vpack.c.bf16 %v3546_v62, %v3545_v15 }
 0x46b   :  { %6377 = vmatpush3.bf16.msra.mxu1 %v6376_v57  ;;  %v3530_v57 = vld [vmem:[#allocation8 + $0x158] sm:$0xff] }
 0x46c   :  { %v1365_v29 = vpop.f32.mrb[6].mxu0 }
 0x46d   :  { %v1367_v16 = vpop.f32.mrb[7].mxu0 }
 0x529   :  { %v2859_v27 = vpop.f32.mrb[0].mxu1 }
 0x52a   :  { %v6915_v40 = vadd.f32 %v2859_v27, %v1374_v33  ;;  %v2861_v28 = vpop.f32.mrb[1].mxu1  ;;  %v3409_v33 = vld [vmem:[#allocation8 + $0x28] sm:$0xff] }
 0x52b   :  { %v6917_v0 = vadd.f32 %v2861_v28, %v1375_v60  ;;  %v3539_v60 = vld [vmem:[#allocation8 + $0x1a0] sm:$0xff]  ;;  %v3540_v27 = vld [vmem:[#allocation8 + $0x1a8] sm:$0xff] }
 0x52c   :  { %2903 = vrot.lane.b32.xlu1 %v6915_v40, %s7454_s20 }
 0x52d   :  { %v2776_v17 = vpop.f32.mrb[0].mxu0  ;;  %v2865_v14 = vpop.f32.mrb[2].mxu1 }
 0x52e   :  { %v6910_v22 = vadd.f32 %v2776_v17, %v1185_v4  ;;  %v2778_v35 = vpop.f32.mrb[1].mxu0  ;;  %v2867_v13 = vpop.f32.mrb[3].mxu1  ;;  %v3523_v17 = vld [vmem:[#allocation8 + $0x120] sm:$0xff] }
 0x52f   :  { %v6911_v10 = vadd.f32 %v2778_v35, %v1185_v4  ;;  %v3426_v35 = vld [vmem:[#allocation8 + $0xb0] sm:$0xff] }
 0x530   :  { %2905 = vrot.lane.b32.xlu1 %v6917_v0, %s7454_s20  ;;  %2895 = vrot.lane.b32.xlu0 %v6910_v22, %s7454_s20  ;;  %v6378_v0 = vpack.c.bf16 %v3540_v27, %v3539_v60  ;;  %v3417_v60 = vld [vmem:[#allocation8 + $0x68] sm:$0xff] }
 0x531   :  { %v8566_v42 = vpop.f32.mrb[2].mxu0 }
 0x532   :  { %v8571_v45 = vpop.f32.mrb[3].mxu0  ;;  %6379 = vmatprep.subr.bf16.mxu1 %v6378_v0  ;;  %v3531_v0 = vld [vmem:[#allocation8 + $0x160] sm:$0xff] }
 0x534   :  { %1189 = vperm.xlu0 %7024, %v1181_v2   ;;  %2897 = vrot.lane.b32.xlu1 %v6911_v10, %s7454_s20  ;;  %v3410_v2 = vld [vmem:[#allocation8 + $0x30] sm:$0xff] }
 0x59e   :  { %v2904_v43 = vpop.permute.xlu1 %2903 }
 0x59f   :  { %2934 = vst.msk [vmem:[#allocation3 + $0x30] sm:$0xff] %vm2927_vm1, %v2904_v43 }
 0x5a2   :  { %v2906_v61 = vpop.permute.xlu1 %2905  ;;  %v2896_v48 = vpop.permute.xlu0 %2895 }
 0x5a3   :  { %v8576_v5 = vsel %vm156_vm4, %v2904_v43, %v2906_v61  ;;  %2936 = vst.msk [vmem:[#allocation3 + $0x40] sm:$0xff] %vm156_vm4, %v2906_v61  ;;  %v3411_v43 = vld [vmem:[#allocation8 + $0x38] sm:$0xff]  ;;  %v3541_v61 = vld [vmem:[#allocation8 + $0x1b0] sm:$0xff] }
 0x5a4   :  { %2928 = vst.msk [vmem:[#allocation3] sm:$0xff] %vm2927_vm1, %v2896_v48  ;;  %2935 = vst [vmem:[#allocation3 + $0x38] sm:$0xff] %v8576_v5  ;;  %v8665_v62 = vsel %vm775_vm3, %v8576_v5, -1e+30 }
 0x5a6   :  { %v2898_v39 = vpop.permute.xlu1 %2897  ;;  %v8607_v21 = vld [vmem:[#allocation3 + $0x30] sm:$0xff] }
 0x5a7   :  { %v8582_v46 = vsel %vm156_vm4, %v2896_v48, %v2898_v39  ;;  %2930 = vst.msk [vmem:[#allocation3 + $0x10] sm:$0xff] %vm156_vm4, %v2898_v39  ;;  %v3542_v48 = vld [vmem:[#allocation8 + $0x1b8] sm:$0xff]  ;;  %v6352_v39 = vpack.c.bf16 %v3411_v43, %v3410_v2 }
 0x5a8   :  { %2929 = vst [vmem:[#allocation3 + $0x8] sm:$0xff] %v8582_v46  ;;  %v7060_v31 = vpack.i.bf16 %v8582_v46, %v8607_v21  ;;  %v3419_v43 = vld [vmem:[#allocation8 + $0x78] sm:$0xff] }
 0x5aa   :  { %v2948_v40 = vld [vmem:[#allocation3 + $0x40] sm:$0xff] }
 0x5ab   :  { %v8586_v51 = vld [vmem:[#allocation3] sm:$0xff]  ;;  %v7100_v19 = vpack.i.bf16 %v2948_v40, %v8576_v5  ;;  %v8682_v5 = vsel %vm774_vm2, %v8607_v21, -1e+30 }
 0x5ac   :  { %v3547_v40 = vld [vmem:[#allocation8 + $0x1e0] sm:$0xff] }
 0x5ae   :  { %v2942_v34 = vld [vmem:[#allocation3 + $0x10] sm:$0xff] }
 0x5af   :  { %v8589_v36 = vpack.i.bf16 %v8586_v51, %v2942_v34  ;;  %v6382_v34 = vpack.c.bf16 %v3542_v48, %v3541_v61  ;;  %v3549_v61 = vld [vmem:[#allocation8 + $0x1f0] sm:$0xff] }
 0x5b1   :  { %7031 = vrot.lane.b32.xlu0 %v8589_v36, %s7463_s4  ;;  %7026 = vrot.lane.b32.xlu1 %v8589_v36, %s7467_s26 }
 0x5b3   :  { %v8595_v44 = vpop.permute.xlu0 %1189 }
 0x5b4   :  { %v1376_v32 = vadd.f32 %v1365_v29, %v8595_v44  ;;  %v1377_v18 = vadd.f32 %v1367_v16, %v8595_v44  ;;  %v3425_v29 = vld [vmem:[#allocation8 + $0xa8] sm:$0xff]  ;;  %v3408_v16 = vld [vmem:[#allocation8 + $0x20] sm:$0xff]  ;;  %v6912_v37 = vadd.f32 %v8566_v42, %v8595_v44 }
 0x5b5   :  { %7041 = vrot.lane.b32.xlu0 %v8589_v36, %s7468_s29  ;;  %7036 = vrot.lane.b32.xlu1 %v8589_v36, %s7462_s3  ;;  %v6346_v4 = vpack.c.bf16 %v3425_v29, %v3424_v23  ;;  %v6348_v28 = vpack.c.bf16 %v3409_v33, %v3408_v16  ;;  %v6392_v23 = vpack.c.bf16 %v3530_v57, %v3529_v41  ;;  %v3432_v29 = vld [vmem:[#allocation8 + $0xe0] sm:$0xff]  ;;  %v3433_v16 = vld [vmem:[#allocation8 + $0xe8] sm:$0xff]  ;;  %v2952_v41 = vsel %vm774_vm2, %v8586_v51, -1e+30 }
 0x5b6   :  { %v8603_v38 = vadd.f32 %v2867_v13, %v1377_v18  ;;  %v8605_v9 = vadd.f32 %v2865_v14, %v1376_v32  ;;  %v3524_v14 = vld [vmem:[#allocation8 + $0x128] sm:$0xff]  ;;  %v3427_v13 = vld [vmem:[#allocation8 + $0xb8] sm:$0xff]  ;;  %v3525_v32 = vld [vmem:[#allocation8 + $0x130] sm:$0xff] }
 0x5b7   :  { %6347 = vmatprep.subr.bf16.mxu0 %v6346_v4  ;;  %v6380_v22 = vpack.c.bf16 %v3524_v14, %v3523_v17  ;;  %v6350_v10 = vpack.c.bf16 %v3427_v13, %v3426_v35  ;;  %v3526_v18 = vld [vmem:[#allocation8 + $0x138] sm:$0xff]  ;;  %v6362_v4 = vpack.c.bf16 %v3433_v16, %v3432_v29  ;;  %v3416_v33 = vld [vmem:[#allocation8 + $0x60] sm:$0xff]  ;;  %v3532_v14 = vld [vmem:[#allocation8 + $0x168] sm:$0xff] }
 0x5b8   :  { %6349 = vmatpush3.bf16.msra.mxu0 %v6348_v28  ;;  %v6384_v50 = vpack.c.bf16 %v3526_v18, %v3525_v32  ;;  %v6364_v27 = vpack.c.bf16 %v3417_v60, %v3416_v33  ;;  %v3548_v28 = vld [vmem:[#allocation8 + $0x1e8] sm:$0xff]  ;;  %v3435_v35 = vld [vmem:[#allocation8 + $0xf8] sm:$0xff]  ;;  %v6396_v13 = vpack.c.bf16 %v3532_v14, %v3531_v0  ;;  %v8676_v16 = vld [vmem:[#allocation8 + $0x300] sm:$0xff]  ;;  %v2953_v0 = vsel %vm775_vm3, %v8582_v46, -1e+30 }
 0x5b9   :  { %7051 = vrot.lane.b32.xlu0 %v8589_v36, %s7465_s8  ;;  %7046 = vrot.lane.b32.xlu1 %v8589_v36, %s7464_s23  ;;  %v6394_v17 = vpack.c.bf16 %v3548_v28, %v3547_v40  ;;  %v3534_v32 = vld [vmem:[#allocation8 + $0x178] sm:$0xff]  ;;  %v8674_v29 = vld [vmem:[#allocation8 + $0x208] sm:$0xff] }
 0x5ba   :  { %6381 = vmatpush3.bf16.msra.mxu1 %v6380_v22  ;;  %6351 = vmatprep.subr.bf16.mxu0 %v6350_v10  ;;  %v3434_v22 = vld [vmem:[#allocation8 + $0xf0] sm:$0xff]  ;;  %v8684_v51 = vld [vmem:[#allocation8 + $0x308] sm:$0xff]  ;;  %v8688_v40 = vld [vmem:[#allocation8 + $0x298] sm:$0xff] }
 0x5bb   :  { %6383 = vmatprep.subr.bf16.mxu1 %v6382_v34  ;;  %v6366_v2 = vpack.c.bf16 %v3435_v35, %v3434_v22  ;;  %v3418_v10 = vld [vmem:[#allocation8 + $0x70] sm:$0xff]  ;;  %v8697_v14 = vld [vmem:[#allocation8 + $0x218] sm:$0xff] }
 0x5bc   :  { %6353 = vmatpush3.bf16.msra.mxu0 %v6352_v39  ;;  %v6368_v48 = vpack.c.bf16 %v3419_v43, %v3418_v10  ;;  %v3550_v39 = vld [vmem:[#allocation8 + $0x1f8] sm:$0xff]  ;;  %v3533_v34 = vld [vmem:[#allocation8 + $0x170] sm:$0xff] }
 0x5bd   :  { %7061 = vrot.lane.b32.xlu0 %v7060_v31, %s7463_s4  ;;  %7056 = vrot.lane.b32.xlu1 %v7060_v31, %s7467_s26  ;;  %v6398_v18 = vpack.c.bf16 %v3550_v39, %v3549_v61  ;;  %v8705_v43 = vld [vmem:[#allocation8 + $0x390] sm:$0xff]  ;;  %v8707_v61 = vld [vmem:[#allocation8 + $0x398] sm:$0xff]  ;;  %v6436_v39 = vpack.c.bf16 %v8684_v51, %v8676_v16 }
 0x5be   :  { %6385 = vmatpush3.bf16.msra.mxu1 %v6384_v50  ;;  %v6400_v50 = vpack.c.bf16 %v3534_v32, %v3533_v34 }
 0x5bf   :  { %6387 = vmatprep.subr.bf16.mxu1 %v6386_v54 }
 0x5c1   :  { %7066 = vrot.lane.b32.xlu0 %v7060_v31, %s7462_s3  ;;  %7076 = vrot.lane.b32.xlu1 %v7060_v31, %s7464_s23 }
 0x5c2   :  { %6389 = vmatpush3.bf16.msra.mxu1 %v6388_v1 }
 0x5c3   :  { %6391 = vmatprep.subr.bf16.mxu1 %v6390_v63 }
 0x5c5   :  { %7071 = vrot.lane.b32.xlu0 %v7060_v31, %s7468_s29  ;;  %7081 = vrot.lane.b32.xlu1 %v7060_v31, %s7465_s8 }
 0x5c6   :  { %6393 = vmatpush3.bf16.msra.mxu1 %v6392_v23  ;;  %v8672_v23 = vld [vmem:[#allocation8 + $0x200] sm:$0xff] }
 0x5c7   :  { %6395 = vmatprep.subr.bf16.mxu1 %v6394_v17  ;;  %v8695_v17 = vld [vmem:[#allocation8 + $0x210] sm:$0xff] }
 0x5c9   :  { %7091 = vrot.lane.b32.xlu0 %v7060_v31, %s7466_s16  ;;  %7086 = vrot.lane.b32.xlu1 %v7060_v31, %s7469_s0  ;;  %v3428_v31 = vld [vmem:[#allocation8 + $0xc0] sm:$0xff] }
 0x5ca   :  { %v6354_v52 = vpack.c.bf16 %v3429_v58, %v3428_v31  ;;  %6397 = vmatpush3.bf16.msra.mxu1 %v6396_v13  ;;  %v3645_v31 = vld [vmem:[#allocation8 + $0x280] sm:$0xff]  ;;  %v3646_v58 = vld [vmem:[#allocation8 + $0x288] sm:$0xff] }
 0x5cb   :  { %v6402_v3 = vpack.c.bf16 %v3646_v58, %v3645_v31  ;;  %6399 = vmatprep.subr.bf16.mxu1 %v6398_v18  ;;  %v6408_v31 = vpack.c.bf16 %v8697_v14, %v8695_v17  ;;  %v3653_v17 = vld [vmem:[#allocation8 + $0x2c0] sm:$0xff]  ;;  %v3654_v14 = vld [vmem:[#allocation8 + $0x2c8] sm:$0xff] }
 0x5cc   :  { %6355 = vmatprep.subr.bf16.mxu0 %v6354_v52  ;;  %v3758_v52 = vld [vmem:[#allocation8 + $0x388] sm:$0xff] }
 0x5cd   :  { %7101 = vrot.lane.b32.xlu0 %v7100_v19, %s7463_s4  ;;  %7096 = vrot.lane.b32.xlu1 %v7100_v19, %s7467_s26 }
 0x5ce   :  { %6357 = vmatpush3.bf16.msra.mxu0 %v6356_v25  ;;  %6401 = vmatpush3.bf16.msra.mxu1 %v6400_v50 }
 0x5cf   :  { %6359 = vmatprep.subr.bf16.mxu0 %v6358_v11 }
 0x5d1   :  { %7111 = vrot.lane.b32.xlu0 %v7100_v19, %s7468_s29  ;;  %7106 = vrot.lane.b32.xlu1 %v7100_v19, %s7462_s3 }
 0x5d2   :  { %6361 = vmatpush3.bf16.msra.mxu0 %v6360_v56 }
 0x5d3   :  { %6363 = vmatprep.subr.bf16.mxu0 %v6362_v4 }
 0x5d5   :  { %7121 = vrot.lane.b32.xlu0 %v7100_v19, %s7465_s8  ;;  %7116 = vrot.lane.b32.xlu1 %v7100_v19, %s7464_s23 }
 0x5d6   :  { %6365 = vmatpush3.bf16.msra.mxu0 %v6364_v27  ;;  %v8686_v27 = vld [vmem:[#allocation8 + $0x290] sm:$0xff] }
 0x5d7   :  { %6367 = vmatprep.subr.bf16.mxu0 %v6366_v2  ;;  %v6406_v34 = vpack.c.bf16 %v8688_v40, %v8686_v27 }
 0x5d9   :  { %7136 = vrot.lane.b32.xlu0 %v7100_v19, %s7466_s16  ;;  %7126 = vrot.lane.b32.xlu1 %v7100_v19, %s7469_s0  ;;  %v3757_v19 = vld [vmem:[#allocation8 + $0x380] sm:$0xff] }
 0x5da   :  { %6369 = vmatpush3.bf16.msra.mxu0 %v6368_v48  ;;  %v6434_v24 = vpack.c.bf16 %v3758_v52, %v3757_v19  ;;  %v6404_v48 = vpack.c.bf16 %v8674_v29, %v8672_v23  ;;  %v6438_v52 = vpack.c.bf16 %v8707_v61, %v8705_v43 }
 0x5db   :  { %6403 = vmatprep.subr.bf16.mxu0 %v6402_v3 }
 0x5dc   :  { %6435 = vmatprep.subr.bf16.mxu1 %v6434_v24 }
 0x5dd   :  { %7141 = vrot.lane.b32.xlu0 %v8589_v36, %s7466_s16  ;;  %7131 = vrot.lane.b32.xlu1 %v8589_v36, %s7469_s0  ;;  %v6913_v36 = vadd.f32 %v8571_v45, %v8595_v44 }
 0x5e1   :  { %2909 = vrot.lane.b32.xlu0 %v8603_v38, %s7454_s20  ;;  %2907 = vrot.lane.b32.xlu1 %v8605_v9, %s7454_s20 }
 0x5e5   :  { %2899 = vrot.lane.b32.xlu1 %v6912_v37, %s7454_s20  ;;  %2901 = vrot.lane.b32.xlu0 %v6913_v36, %s7454_s20 }
 0x623   :  { %v7032_v59 = vpop.permute.xlu0 %7031  ;;  %v7027_v25 = vpop.permute.xlu1 %7026 }
 0x624   :  { %v7029_v42 = vunpack.i.h.bf16 %v7027_v25  ;;  %v7034_v44 = vunpack.i.h.bf16 %v7032_v59  ;;  %v7028_v6 = vunpack.i.l.bf16 %v7027_v25  ;;  %v7033_v53 = vunpack.i.l.bf16 %v7032_v59 }
 0x627   :  { %v8646_v54 = vpop.permute.xlu0 %7041  ;;  %v7037_v49 = vpop.permute.xlu1 %7036 }
 0x628   :  { %v7039_v4 = vunpack.i.h.bf16 %v7037_v49  ;;  %v7038_v22 = vunpack.i.l.bf16 %v7037_v49  ;;  %v7044_v24 = vunpack.i.h.bf16 %v8646_v54  ;;  %v7043_v37 = vunpack.i.l.bf16 %v8646_v54 }
 0x62b   :  { %v8648_v55 = vpop.permute.xlu0 %7051  ;;  %v7047_v38 = vpop.permute.xlu1 %7046 }
 0x62c   :  { %v7049_v32 = vunpack.i.h.bf16 %v7047_v38  ;;  %v7048_v58 = vunpack.i.l.bf16 %v7047_v38  ;;  %v7054_v38 = vunpack.i.h.bf16 %v8648_v55 }
 0x62f   :  { %v8650_v1 = vpop.permute.xlu0 %7061  ;;  %v8652_v9 = vpop.permute.xlu1 %7056 }
 0x630   :  { %v7064_v30 = vunpack.i.h.bf16 %v8650_v1  ;;  %v7059_v45 = vunpack.i.h.bf16 %v8652_v9  ;;  %v7058_v54 = vunpack.i.l.bf16 %v8652_v9 }
 0x632   :  { %v3236_v11 = vsel %vm374_vm14, %v7029_v42, %v7059_v45  ;;  %v2996_v12 = vsel %vm198_vm9, %v7034_v44, %v7064_v30  ;;  %v3237_v63 = vsel %vm374_vm14, %v7059_v45, %v7028_v6  ;;  %v2997_v33 = vsel %vm198_vm9, %v7064_v30, %v7033_v53 }
 0x633   :  { %v8658_v56 = vpop.permute.xlu0 %7066  ;;  %v8660_v15 = vpop.permute.xlu1 %7076  ;;  %v3252_v60 = vmax.f32 %v2952_v41, %v3236_v11  ;;  %v3012_v28 = vsel %vm796_vm5, %v2996_v12, -1e+30  ;;  %v3253_v21 = vmax.f32 %v2953_v0, %v3237_v63  ;;  %v3013_v46 = vsel %vm797_vm7, %v2997_v33, -1e+30 }
 0x634   :  { %v7069_v57 = vunpack.i.h.bf16 %v8658_v56  ;;  %v7079_v13 = vunpack.i.h.bf16 %v8660_v15  ;;  %v7053_v42 = vunpack.i.l.bf16 %v8648_v55  ;;  %v7063_v44 = vunpack.i.l.bf16 %v8650_v1 }
 0x635   :  { %v3260_v18 = vmax.f32 %v3252_v60, %v3012_v28  ;;  %v3261_v36 = vmax.f32 %v3253_v21, %v3013_v46  ;;  %v7068_v53 = vunpack.i.l.bf16 %v8658_v56  ;;  %v7078_v55 = vunpack.i.l.bf16 %v8660_v15 }
 0x636   :  { %v3044_v35 = vsel %vm211_vm10, %v7039_v4, %v7069_v57  ;;  %v3045_v50 = vsel %vm211_vm10, %v7069_v57, %v7038_v22  ;;  %v3092_v59 = vsel %vm224_vm11, %v7049_v32, %v7079_v13  ;;  %v3093_v45 = vsel %vm224_vm11, %v7079_v13, %v7048_v58 }
 0x637   :  { %v8701_v2 = vpop.permute.xlu0 %7071  ;;  %v8703_v10 = vpop.permute.xlu1 %7081  ;;  %v3060_v3 = vsel %vm774_vm2, %v3044_v35, -1e+30  ;;  %v3061_v30 = vsel %vm775_vm3, %v3045_v50, -1e+30  ;;  %v8743_v12 = vsel %vm796_vm5, %v3092_v59, -1e+30 }
 0x638   :  { %v7074_v19 = vunpack.i.h.bf16 %v8701_v2  ;;  %v3268_v6 = vmax.f32 %v3260_v18, %v3060_v3  ;;  %v7084_v11 = vunpack.i.h.bf16 %v8703_v10  ;;  %v3269_v63 = vmax.f32 %v3261_v36, %v3061_v30 }
 0x639   :  { %v8749_v57 = vsel %vm797_vm7, %v3093_v45, -1e+30  ;;  %v7073_v1 = vunpack.i.l.bf16 %v8701_v2  ;;  %v7083_v9 = vunpack.i.l.bf16 %v8703_v10 }
 0x63a   :  { %v3300_v41 = vsel %vm515_vm15, %v7044_v24, %v7074_v19  ;;  %v3301_v22 = vsel %vm515_vm15, %v7074_v19, %v7043_v37  ;;  %v3140_v21 = vsel %vm9514_vm6, %v7054_v38, %v7084_v11  ;;  %v3141_v35 = vsel %vm9515_vm8, %v7084_v11, %v7053_v42 }
 0x63b   :  { %v8728_v25 = vpop.permute.xlu0 %7091  ;;  %v8730_v49 = vpop.permute.xlu1 %7086  ;;  %v3316_v15 = vmax.f32 %v3268_v6, %v3300_v41  ;;  %v8766_v24 = vmax.f32 %v3269_v63, %v3301_v22  ;;  %v3156_v37 = vsel %vm774_vm2, %v3140_v21, -1e+30  ;;  %vm3441_vm6 = vcmask 1041409  }
 0x63c   :  { %v7093_v11 = vunpack.i.l.bf16 %v8728_v25  ;;  %vm9518_vm8 = vcmask 777216  }
 0x63d   :  { %v3324_v6 = vmax.f32 %v3316_v15, %v8743_v12  ;;  %v7089_v15 = vunpack.i.h.bf16 %v8730_v49 }
 0x63f   :  { %v7102_v4 = vpop.permute.xlu0 %7101  ;;  %v7097_v33 = vpop.permute.xlu1 %7096 }
 0x640   :  { %v7104_v56 = vunpack.i.h.bf16 %v7102_v4  ;;  %v7103_v60 = vunpack.i.l.bf16 %v7102_v4  ;;  %v7099_v28 = vunpack.i.h.bf16 %v7097_v33  ;;  %v7098_v0 = vunpack.i.l.bf16 %v7097_v33 }
 0x642   :  { %v3000_v13 = vsel %vm198_vm9, %v7063_v44, %v7103_v60  ;;  %v3001_v46 = vsel %vm198_vm9, %v7103_v60, %v7104_v56  ;;  %v3240_v2 = vsel %vm374_vm14, %v7058_v54, %v7098_v0  ;;  %v3241_v10 = vsel %vm374_vm14, %v7098_v0, %v7099_v28 }
 0x643   :  { %v3016_v32 = vsel %vm796_vm5, %v3000_v13, -1e+30  ;;  %v3017_v18 = vsel %vm797_vm7, %v3001_v46, -1e+30  ;;  %v3256_v50 = vmax.f32 %v8682_v5, %v3240_v2  ;;  %v3257_v58 = vmax.f32 %v8665_v62, %v3241_v10  ;;  %v7112_v3 = vpop.permute.xlu0 %7111  ;;  %v7107_v19 = vpop.permute.xlu1 %7106 }
 0x644   :  { %v7109_v36 = vunpack.i.h.bf16 %v7107_v19  ;;  %v7108_v59 = vunpack.i.l.bf16 %v7107_v19  ;;  %v7114_v30 = vunpack.i.h.bf16 %v7112_v3  ;;  %v7113_v45 = vunpack.i.l.bf16 %v7112_v3 }
 0x645   :  { %v3264_v38 = vmax.f32 %v3256_v50, %v3016_v32  ;;  %v3265_v42 = vmax.f32 %v3257_v58, %v3017_v18  ;;  %v3157_v44 = vsel %vm775_vm3, %v3141_v35, -1e+30  ;;  %v7094_v5 = vunpack.i.h.bf16 %v8728_v25 }
 0x646   :  { %v3048_v62 = vsel %vm211_vm10, %v7068_v53, %v7108_v59  ;;  %v3049_v54 = vsel %vm211_vm10, %v7108_v59, %v7109_v36  ;;  %v3304_v53 = vsel %vm515_vm15, %v7073_v1, %v7113_v45  ;;  %v3305_v22 = vsel %vm515_vm15, %v7113_v45, %v7114_v30 }
 0x647   :  { %v3064_v41 = vsel %vm774_vm2, %v3048_v62, -1e+30  ;;  %v3065_v63 = vsel %vm775_vm3, %v3049_v54, -1e+30  ;;  %v7122_v4 = vpop.permute.xlu0 %7121  ;;  %v7117_v33 = vpop.permute.xlu1 %7116  ;;  %v3325_v25 = vmax.f32 %v8766_v24, %v8749_v57  ;;  %v3332_v59 = vmax.f32 %v3324_v6, %v3156_v37 }
 0x648   :  { %v3272_v56 = vmax.f32 %v3264_v38, %v3064_v41  ;;  %v3273_v60 = vmax.f32 %v3265_v42, %v3065_v63  ;;  %v7124_v28 = vunpack.i.h.bf16 %v7122_v4  ;;  %v7123_v0 = vunpack.i.l.bf16 %v7122_v4 }
 0x649   :  { %v7119_v21 = vunpack.i.h.bf16 %v7117_v33  ;;  %v7118_v12 = vunpack.i.l.bf16 %v7117_v33  ;;  %v7088_v38 = vunpack.i.l.bf16 %v8730_v49 }
 0x64a   :  { %v3320_v35 = vmax.f32 %v3272_v56, %v3304_v53  ;;  %v3321_v13 = vmax.f32 %v3273_v60, %v3305_v22  ;;  %v3144_v46 = vsel %vm9516_vm0, %v7083_v9, %v7123_v0  ;;  %v3145_v2 = vsel %vm9517_vm12, %v7123_v0, %v7124_v28  ;;  %vm9519_vm0 = vmmov %vm9518_vm8 }
 0x64b   :  { %v3096_v10 = vsel %vm224_vm11, %v7078_v55, %v7118_v12  ;;  %v3097_v32 = vsel %vm224_vm11, %v7118_v12, %v7119_v21  ;;  %v7137_v1 = vpop.permute.xlu0 %7136  ;;  %v7127_v18 = vpop.permute.xlu1 %7126  ;;  %v3160_v55 = vsel %vm774_vm2, %v3144_v46, -1e+30  ;;  %v3161_v42 = vsel %vm775_vm3, %v3145_v2, -1e+30  ;;  %v8809_v21 = vld [vmem:[#allocation8 + $0x310] sm:$0xff]  ;;  %vm9520_vm12 = vmmov %vm9519_vm0 }
 0x64c   :  { %v3112_v50 = vsel %vm796_vm5, %v3096_v10, -1e+30  ;;  %v3113_v57 = vsel %vm797_vm7, %v3097_v32, -1e+30  ;;  %v7139_v58 = vunpack.i.h.bf16 %v7137_v1  ;;  %v7138_v3 = vunpack.i.l.bf16 %v7137_v1  ;;  %v8817_v32 = vld [vmem:[#allocation8 + $0x318] sm:$0xff]  ;;  %v8819_v1 = vld [vmem:[#allocation8 + $0x2a0] sm:$0xff] }
 0x64d   :  { %v3328_v19 = vmax.f32 %v3320_v35, %v3112_v50  ;;  %v3329_v24 = vmax.f32 %v3321_v13, %v3113_v57  ;;  %v7129_v36 = vunpack.i.h.bf16 %v7127_v18  ;;  %v7128_v9 = vunpack.i.l.bf16 %v7127_v18  ;;  %v8821_v18 = vld [vmem:[#allocation8 + $0x2a8] sm:$0xff] }
 0x64e   :  { %v3192_v30 = vsel %vm250_vm13, %v7093_v11, %v7138_v3  ;;  %v3193_v45 = vsel %vm250_vm13, %v7138_v3, %v7139_v58  ;;  %v3333_v12 = vmax.f32 %v3325_v25, %v3157_v44 }
 0x64f   :  { %v3336_v62 = vmax.f32 %v3328_v19, %v3160_v55  ;;  %v3337_v54 = vmax.f32 %v3329_v24, %v3161_v42  ;;  %v7142_v41 = vpop.permute.xlu0 %7141  ;;  %v7132_v63 = vpop.permute.xlu1 %7131  ;;  %v3368_v4 = vsel %vm9518_vm8, %v7088_v38, %v7128_v9  ;;  %v3369_v37 = vsel %vm9519_vm0, %v7128_v9, %v7129_v36  ;;  %vm9521_vm8 = vmmov %vm9519_vm0 }
 0x650   :  { %v7144_v49 = vunpack.i.h.bf16 %v7142_v41  ;;  %v7143_v6 = vunpack.i.l.bf16 %v7142_v41  ;;  %v7134_v60 = vunpack.i.h.bf16 %v7132_v63  ;;  %v7133_v28 = vunpack.i.l.bf16 %v7132_v63 }
 0x651   :  { %v3384_v33 = vmax.f32 %v3336_v62, %v3368_v4  ;;  %v3385_v56 = vmax.f32 %v3337_v54, %v3369_v37  ;;  %v3208_v0 = vsel %vm796_vm5, %v3192_v30, -1e+30  ;;  %v3209_v11 = vsel %vm797_vm7, %v3193_v45, -1e+30 }
 0x652   :  { %v3188_v53 = vsel %vm250_vm13, %v7144_v49, %v7094_v5  ;;  %v3189_v22 = vsel %vm250_vm13, %v7094_v5, %v7143_v6  ;;  %v3364_v44 = vsel %vm9520_vm12, %v7134_v60, %v7089_v15  ;;  %v3365_v25 = vsel %vm9521_vm8, %v7089_v15, %v7133_v28 }
 0x653   :  { %v8811_v35 = vmax.f32 %v3384_v33, %v3208_v0  ;;  %v8813_v13 = vmax.f32 %v3385_v56, %v3209_v11  ;;  %v3204_v46 = vsel %vm796_vm5, %v3188_v53, -1e+30  ;;  %v2910_v2 = vpop.permute.xlu0 %2909  ;;  %v2908_v10 = vpop.permute.xlu1 %2907  ;;  %v3205_v5 = vsel %vm797_vm7, %v3189_v22, -1e+30  ;;  %v3633_v53 = vld [vmem:[#allocation8 + $0x220] sm:$0xff]  ;;  %v3634_v22 = vld [vmem:[#allocation8 + $0x228] sm:$0xff] }
 0x654   :  { %2939 = vst.msk [vmem:[#allocation3 + $0x58] sm:$0xff] %vm156_vm4, %v2910_v2  ;;  %v8829_v50 = vsel %vm156_vm4, %v2908_v10, %v2910_v2  ;;  %v3380_v57 = vmax.f32 %v3332_v59, %v3364_v44  ;;  %v3381_v58 = vmax.f32 %v3333_v12, %v3365_v25  ;;  %v6440_v15 = vpack.c.bf16 %v8817_v32, %v8809_v21  ;;  %v3762_v44 = vld [vmem:[#allocation8 + $0x3a8] sm:$0xff]  ;;  %v3747_v32 = vld [vmem:[#allocation8 + $0x330] sm:$0xff] }
 0x655   :  { %2937 = vst.msk [vmem:[#allocation3 + $0x48] sm:$0xff] %vm2927_vm1, %v2908_v10  ;;  %2938 = vst [vmem:[#allocation3 + $0x50] sm:$0xff] %v8829_v50  ;;  %v3443_v3 = vrot.slane %v8813_v13, 7  ;;  %v3440_v19 = vrot.slane %v8811_v35, 7  ;;  %v3665_v24 = vrot.slane %v8813_v13, 1  ;;  %v3777_v36 = vrot.slane %v8813_v13, 2 }
 0x656   :  { %v6410_v9 = vpack.c.bf16 %v8821_v18, %v8819_v1  ;;  %v8841_v38 = vmax.f32 %v3380_v57, %v3204_v46  ;;  %v8843_v59 = vmax.f32 %v3381_v58, %v3205_v5  ;;  %v3662_v30 = vrot.slane %v8811_v35, 1  ;;  %v3761_v5 = vld [vmem:[#allocation8 + $0x3a0] sm:$0xff] }
 0x657   :  { %v2900_v55 = vpop.permute.xlu1 %2899  ;;  %v2902_v42 = vpop.permute.xlu0 %2901  ;;  %v3889_v45 = vrot.slane %v8813_v13, 3  ;;  %v3774_v54 = vrot.slane %v8811_v35, 2  ;;  %v4001_v41 = vrot.slane %v8813_v13, 4  ;;  %v3886_v63 = vrot.slane %v8811_v35, 3  ;;  %v3745_v58 = vld [vmem:[#allocation8 + $0x320] sm:$0xff] }
 0x658   :  { %2931 = vst.msk [vmem:[#allocation3 + $0x18] sm:$0xff] %vm2927_vm1, %v2900_v55  ;;  %v8849_v62 = vsel %vm156_vm4, %v2900_v55, %v2902_v42  ;;  %v3444_v4 = vsel %vm3441_vm6, %v3443_v3, %v8843_v59  ;;  %v3442_v37 = vsel %vm3441_vm6, %v3440_v19, %v8841_v38  ;;  %v3553_v49 = vrot.slane %v8843_v59, 1  ;;  %v3652_v55 = vld [vmem:[#allocation8 + $0x2b8] sm:$0xff] }
 0x659   :  { %2933 = vst.msk [vmem:[#allocation3 + $0x28] sm:$0xff] %vm156_vm4, %v2902_v42  ;;  %2932 = vst [vmem:[#allocation3 + $0x20] sm:$0xff] %v8849_v62  ;;  %v3664_v6 = vrot.slane %v8843_v59, 2  ;;  %3511 = vmatprep.mubr.f32.mxu0 %v3444_v4  ;;  %v3551_v33 = vrot.slane %v8841_v38, 1  ;;  %v3776_v56 = vrot.slane %v8843_v59, 3  ;;  %v3661_v60 = vrot.slane %v8841_v38, 2 }
 0x65a   :  { %v3888_v28 = vrot.slane %v8843_v59, 4  ;;  %3512 = vmatmul.mubr.f32.vlgmr.msra.gmra.mrb[8].mxu0 %v3442_v37  ;;  %v3554_v0 = vsel %vm3441_vm6, %v8813_v13, %v3553_v49  ;;  %v3773_v12 = vrot.slane %v8841_v38, 3  ;;  %v4000_v46 = vrot.slane %v8843_v59, 5  ;;  %v3635_v37 = vld [vmem:[#allocation8 + $0x230] sm:$0xff] }
 0x65b   :  { %v3666_v11 = vsel %vm3441_vm6, %v3665_v24, %v3664_v6  ;;  %6405 = vmatpush3.bf16.msra.mxu0 %v6404_v48  ;;  %3621 = vmatprep.mubr.f32.mxu1 %v3554_v0  ;;  %v3552_v2 = vsel %vm3441_vm6, %v8811_v35, %v3551_v33  ;;  %v3778_v10 = vsel %vm3441_vm6, %v3777_v36, %v3776_v56  ;;  %v3885_v25 = vrot.slane %v8841_v38, 4  ;;  %v3746_v24 = vld [vmem:[#allocation8 + $0x328] sm:$0xff]  ;;  %v3651_v36 = vld [vmem:[#allocation8 + $0x2b0] sm:$0xff]  ;;  %v3765_v6 = vld [vmem:[#allocation8 + $0x3c0] sm:$0xff] }
 0x65c   :  { %v4113_v57 = vrot.slane %v8813_v13, 5  ;;  %3733 = vmatprep.mubr.f32.mxu0 %v3666_v11  ;;  %3622 = vmatmul.mubr.f32.vlgmr.msra.gmra.mrb[4].mxu1 %v3552_v2  ;;  %v8880_v3 = vsel %vm3441_vm6, %v3662_v30, %v3661_v60  ;;  %v8883_v23 = vsel %vm3441_vm6, %v3889_v45, %v3888_v28  ;;  %v8886_v29 = vsel %vm3441_vm6, %v3774_v54, %v3773_v12  ;;  %v3766_v33 = vld [vmem:[#allocation8 + $0x3c8] sm:$0xff]  ;;  %v3637_v28 = vld [vmem:[#allocation8 + $0x240] sm:$0xff] }
 0x65d   :  { %v4112_v48 = vrot.slane %v8843_v59, 6  ;;  %6437 = vmatpush3.bf16.msra.mxu1 %v6436_v39  ;;  %6407 = vmatprep.subr.bf16.mxu0 %v6406_v34  ;;  %v6412_v19 = vpack.c.bf16 %v3634_v22, %v3633_v53  ;;  %v8896_v42 = vsel %vm3441_vm6, %v4001_v41, %v4000_v46  ;;  %v8899_v30 = vsel %vm3441_vm6, %v3886_v63, %v3885_v25  ;;  %v3763_v41 = vld [vmem:[#allocation8 + $0x3b0] sm:$0xff]  ;;  %v3764_v63 = vld [vmem:[#allocation8 + $0x3b8] sm:$0xff]  ;;  %v3749_v12 = vld [vmem:[#allocation8 + $0x340] sm:$0xff] }
 0x65e   :  { %v3997_v45 = vrot.slane %v8841_v38, 5  ;;  %3845 = vmatprep.mubr.f32.mxu1 %v3778_v10  ;;  %6439 = vmatprep.subr.bf16.mxu1 %v6438_v52  ;;  %v6442_v16 = vpack.c.bf16 %v3762_v44, %v3761_v5  ;;  %v3998_v39 = vrot.slane %v8811_v35, 4  ;;  %v4224_v34 = vrot.slane %v8843_v59, 7  ;;  %v3636_v59 = vld [vmem:[#allocation8 + $0x238] sm:$0xff]  ;;  %v3750_v46 = vld [vmem:[#allocation8 + $0x348] sm:$0xff]  ;;  %v3767_v10 = vld [vmem:[#allocation8 + $0x3d0] sm:$0xff] }
 0x65f   :  { %v2943_v51 = vld [vmem:[#allocation3 + $0x18] sm:$0xff]  ;;  %v8906_v40 = vsel %vm3441_vm6, %v4113_v57, %v4112_v48  ;;  %6409 = vmatpush3.bf16.msra.mxu0 %v6408_v31  ;;  %v4225_v43 = vrot.slane %v8813_v13, 6  ;;  %v4109_v61 = vrot.slane %v8841_v38, 6  ;;  %v6444_v52 = vpack.c.bf16 %v3746_v24, %v3745_v58  ;;  %v8946_v58 = vld [vmem:[#allocation3 + $0x48] sm:$0xff] }
 0x660   :  { %v2945_v27 = vld [vmem:[#allocation3 + $0x28] sm:$0xff]  ;;  %6411 = vmatprep.subr.bf16.mxu0 %v6410_v9  ;;  %v6414_v4 = vpack.c.bf16 %v3652_v55, %v3651_v36  ;;  %v8926_v31 = vsel %vm3441_vm6, %v3998_v39, %v3997_v45  ;;  %v4110_v1 = vrot.slane %v8811_v35, 5  ;;  %v4221_v18 = vrot.slane %v8841_v38, 7  ;;  %v3656_v53 = vld [vmem:[#allocation8 + $0x2d8] sm:$0xff]  ;;  %v3639_v25 = vld [vmem:[#allocation8 + $0x250] sm:$0xff] }
 0x661   :  { %v8913_v54 = vpack.i.bf16 %v2943_v51, %v2945_v27  ;;  %6441 = vmatpush3.bf16.msra.mxu1 %v6440_v15  ;;  %v8929_v13 = vsel %vm3441_vm6, %v4225_v43, %v4224_v34  ;;  %v6446_v21 = vpack.c.bf16 %v3764_v63, %v3763_v41  ;;  %v3748_v15 = vld [vmem:[#allocation8 + $0x338] sm:$0xff]  ;;  %v4222_v9 = vrot.slane %v8811_v35, 6  ;;  %v3638_v38 = vld [vmem:[#allocation8 + $0x248] sm:$0xff]  ;;  %v3655_v35 = vld [vmem:[#allocation8 + $0x2d0] sm:$0xff] }
 0x662   :  { %6443 = vmatprep.subr.bf16.mxu1 %v6442_v16  ;;  %v6416_v49 = vpack.c.bf16 %v3636_v59, %v3635_v37  ;;  %v8937_v56 = vsel %vm3441_vm6, %v4110_v1, %v4109_v61  ;;  %v6418_v60 = vpack.c.bf16 %v3654_v14, %v3653_v17  ;;  %v6448_v11 = vpack.c.bf16 %v3748_v15, %v3747_v32  ;;  %v3768_v5 = vld [vmem:[#allocation8 + $0x3d8] sm:$0xff]  ;;  %v3658_v24 = vld [vmem:[#allocation8 + $0x2e8] sm:$0xff]  ;;  %v3751_v55 = vld [vmem:[#allocation8 + $0x350] sm:$0xff] }
 0x663   :  { %7151 = vrot.lane.b32.xlu0 %v8913_v54, %s7463_s4  ;;  %7146 = vrot.lane.b32.xlu1 %v8913_v54, %s7467_s26  ;;  %v8940_v0 = vsel %vm3441_vm6, %v4222_v9, %v4221_v18  ;;  %v6450_v22 = vpack.c.bf16 %v3766_v33, %v3765_v6  ;;  %v6420_v2 = vpack.c.bf16 %v3638_v38, %v3637_v28  ;;  %v3640_v57 = vld [vmem:[#allocation8 + $0x258] sm:$0xff]  ;;  %v3769_v27 = vld [vmem:[#allocation8 + $0x3e0] sm:$0xff]  ;;  %v3770_v39 = vld [vmem:[#allocation8 + $0x3e8] sm:$0xff]  ;;  %vm9522_vm4 = vcmask 785408  }
 0x664   :  { %6413 = vmatpush3.bf16.msra.mxu0 %v6412_v19  ;;  %v6422_v44 = vpack.c.bf16 %v3656_v53, %v3655_v35  ;;  %v6452_v48 = vpack.c.bf16 %v3750_v46, %v3749_v12  ;;  %v3657_v19 = vld [vmem:[#allocation8 + $0x2e0] sm:$0xff]  ;;  %v6454_v36 = vpack.c.bf16 %v3768_v5, %v3767_v10  ;;  %v3752_v45 = vld [vmem:[#allocation8 + $0x358] sm:$0xff]  ;;  %v6424_v16 = vpack.c.bf16 %v3640_v57, %v3639_v25  ;;  %v3642_v63 = vld [vmem:[#allocation8 + $0x268] sm:$0xff] }
 0x665   :  { %6415 = vmatprep.subr.bf16.mxu0 %v6414_v4  ;;  %6445 = vmatpush3.bf16.msra.mxu1 %v6444_v52  ;;  %v8954_v51 = vpack.i.bf16 %v8849_v62, %v8946_v58  ;;  %v6426_v34 = vpack.c.bf16 %v3658_v24, %v3657_v19  ;;  %v3641_v41 = vld [vmem:[#allocation8 + $0x260] sm:$0xff]  ;;  %v6456_v43 = vpack.c.bf16 %v3752_v45, %v3751_v55  ;;  %v3659_v61 = vld [vmem:[#allocation8 + $0x2f0] sm:$0xff]  ;;  %v3660_v52 = vld [vmem:[#allocation8 + $0x2f8] sm:$0xff] }
 0x666   :  { %6447 = vmatprep.subr.bf16.mxu1 %v6446_v21  ;;  %v6458_v4 = vpack.c.bf16 %v3770_v39, %v3769_v27  ;;  %v3753_v62 = vld [vmem:[#allocation8 + $0x360] sm:$0xff]  ;;  %v3754_v37 = vld [vmem:[#allocation8 + $0x368] sm:$0xff]  ;;  %v6428_v59 = vpack.c.bf16 %v3642_v63, %v3641_v41  ;;  %v3771_v17 = vld [vmem:[#allocation8 + $0x3f0] sm:$0xff]  ;;  %v6430_v1 = vpack.c.bf16 %v3660_v52, %v3659_v61 }
 0x667   :  { %7161 = vrot.lane.b32.xlu0 %v8913_v54, %s7468_s29  ;;  %7156 = vrot.lane.b32.xlu1 %v8913_v54, %s7462_s3  ;;  %v3772_v14 = vld [vmem:[#allocation8 + $0x3f8] sm:$0xff]  ;;  %v3643_v18 = vld [vmem:[#allocation8 + $0x270] sm:$0xff]  ;;  %v6460_v32 = vpack.c.bf16 %v3754_v37, %v3753_v62  ;;  %v3869_v15 = vld [vmem:[#allocation8 + $0x480] sm:$0xff] }
 0x668   :  { %6417 = vmatpush3.bf16.msra.mxu0 %v6416_v49  ;;  %v3644_v21 = vld [vmem:[#allocation8 + $0x278] sm:$0xff]  ;;  %v3870_v9 = vld [vmem:[#allocation8 + $0x488] sm:$0xff]  ;;  %v6462_v49 = vpack.c.bf16 %v3772_v14, %v3771_v17  ;;  %v3755_v6 = vld [vmem:[#allocation8 + $0x370] sm:$0xff] }
 0x669   :  { %6419 = vmatprep.subr.bf16.mxu0 %v6418_v60  ;;  %6449 = vmatpush3.bf16.msra.mxu1 %v6448_v11  ;;  %v3756_v33 = vld [vmem:[#allocation8 + $0x378] sm:$0xff]  ;;  %v6432_v60 = vpack.c.bf16 %v3644_v21, %v3643_v18  ;;  %v3981_v28 = vld [vmem:[#allocation8 + $0x580] sm:$0xff]  ;;  %v3982_v38 = vld [vmem:[#allocation8 + $0x588] sm:$0xff]  ;;  %v6466_v11 = vpack.c.bf16 %v3870_v9, %v3869_v15 }
 0x66a   :  { %6451 = vmatprep.subr.bf16.mxu1 %v6450_v22  ;;  %v3853_v35 = vld [vmem:[#allocation8 + $0x400] sm:$0xff]  ;;  %v3854_v53 = vld [vmem:[#allocation8 + $0x408] sm:$0xff]  ;;  %v6464_v22 = vpack.c.bf16 %v3756_v33, %v3755_v6  ;;  %v6498_v12 = vpack.c.bf16 %v3982_v38, %v3981_v28  ;;  %v3871_v10 = vld [vmem:[#allocation8 + $0x490] sm:$0xff] }
 0x66b   :  { %7171 = vrot.lane.b32.xlu0 %v8913_v54, %s7465_s8  ;;  %7166 = vrot.lane.b32.xlu1 %v8913_v54, %s7464_s23  ;;  %v3965_v46 = vld [vmem:[#allocation8 + $0x500] sm:$0xff]  ;;  %v6468_v5 = vpack.c.bf16 %v3854_v53, %v3853_v35  ;;  %v3983_v25 = vld [vmem:[#allocation8 + $0x590] sm:$0xff]  ;;  %v3984_v57 = vld [vmem:[#allocation8 + $0x598] sm:$0xff] }
 0x66c   :  { %6421 = vmatpush3.bf16.msra.mxu0 %v6420_v2  ;;  %v3966_v2 = vld [vmem:[#allocation8 + $0x508] sm:$0xff]  ;;  %v3856_v19 = vld [vmem:[#allocation8 + $0x418] sm:$0xff]  ;;  %v3967_v39 = vld [vmem:[#allocation8 + $0x510] sm:$0xff] }
 0x66d   :  { %6423 = vmatprep.subr.bf16.mxu0 %v6422_v44  ;;  %6453 = vmatpush3.bf16.msra.mxu1 %v6452_v48  ;;  %v3872_v44 = vld [vmem:[#allocation8 + $0x498] sm:$0xff]  ;;  %v3855_v48 = vld [vmem:[#allocation8 + $0x410] sm:$0xff]  ;;  %v6500_v24 = vpack.c.bf16 %v3966_v2, %v3965_v46  ;;  %v3874_v55 = vld [vmem:[#allocation8 + $0x4a8] sm:$0xff] }
 0x66e   :  { %6455 = vmatprep.subr.bf16.mxu1 %v6454_v36  ;;  %v3873_v36 = vld [vmem:[#allocation8 + $0x4a0] sm:$0xff]  ;;  %v6470_v45 = vpack.c.bf16 %v3872_v44, %v3871_v10  ;;  %v2951_v27 = vld [vmem:[#allocation3 + $0x58] sm:$0xff]  ;;  %v6472_v41 = vpack.c.bf16 %v3856_v19, %v3855_v48  ;;  %v3878_v15 = vld [vmem:[#allocation8 + $0x4c8] sm:$0xff] }
 0x66f   :  { %7181 = vrot.lane.b32.xlu0 %v8954_v51, %s7463_s4  ;;  %7176 = vrot.lane.b32.xlu1 %v8954_v51, %s7467_s26  ;;  %v3985_v63 = vld [vmem:[#allocation8 + $0x5a0] sm:$0xff]  ;;  %v6474_v61 = vpack.c.bf16 %v3874_v55, %v3873_v36  ;;  %v3875_v37 = vld [vmem:[#allocation8 + $0x4b0] sm:$0xff]  ;;  %v3860_v18 = vld [vmem:[#allocation8 + $0x438] sm:$0xff] }
 0x670   :  { %6425 = vmatpush3.bf16.msra.mxu0 %v6424_v16  ;;  %v6502_v16 = vpack.c.bf16 %v3984_v57, %v3983_v25  ;;  %v3857_v52 = vld [vmem:[#allocation8 + $0x420] sm:$0xff]  ;;  %v3987_v14 = vld [vmem:[#allocation8 + $0x5b0] sm:$0xff]  ;;  %v3972_v6 = vld [vmem:[#allocation8 + $0x538] sm:$0xff] }
 0x671   :  { %6427 = vmatprep.subr.bf16.mxu0 %v6426_v34  ;;  %6457 = vmatpush3.bf16.msra.mxu1 %v6456_v43  ;;  %v3968_v34 = vld [vmem:[#allocation8 + $0x518] sm:$0xff]  ;;  %v3986_v43 = vld [vmem:[#allocation8 + $0x5a8] sm:$0xff]  ;;  %v3969_v17 = vld [vmem:[#allocation8 + $0x520] sm:$0xff] }
 0x672   :  { %6459 = vmatprep.subr.bf16.mxu1 %v6458_v4  ;;  %v8977_v4 = vpack.i.bf16 %v2951_v27, %v8829_v50  ;;  %v6504_v62 = vpack.c.bf16 %v3968_v34, %v3967_v39  ;;  %v3990_v28 = vld [vmem:[#allocation8 + $0x5c8] sm:$0xff]  ;;  %v3973_v2 = vld [vmem:[#allocation8 + $0x540] sm:$0xff]  ;;  %v3991_v44 = vld [vmem:[#allocation8 + $0x5d0] sm:$0xff] }
 0x673   :  { %7186 = vrot.lane.b32.xlu0 %v8954_v51, %s7462_s3  ;;  %7196 = vrot.lane.b32.xlu1 %v8954_v51, %s7464_s23  ;;  %v3862_v35 = vld [vmem:[#allocation8 + $0x448] sm:$0xff]  ;;  %v3992_v25 = vld [vmem:[#allocation8 + $0x5d8] sm:$0xff]  ;;  %v3863_v48 = vld [vmem:[#allocation8 + $0x450] sm:$0xff] }
 0x674   :  { %6429 = vmatpush3.bf16.msra.mxu0 %v6428_v59  ;;  %v6506_v59 = vpack.c.bf16 %v3986_v43, %v3985_v63  ;;  %v3974_v10 = vld [vmem:[#allocation8 + $0x548] sm:$0xff]  ;;  %v3864_v19 = vld [vmem:[#allocation8 + $0x458] sm:$0xff]  ;;  %v3881_v36 = vld [vmem:[#allocation8 + $0x4e0] sm:$0xff] }
 0x675   :  { %6431 = vmatprep.subr.bf16.mxu0 %v6430_v1  ;;  %6461 = vmatpush3.bf16.msra.mxu1 %v6460_v32  ;;  %v3988_v1 = vld [vmem:[#allocation8 + $0x5b8] sm:$0xff]  ;;  %v3877_v32 = vld [vmem:[#allocation8 + $0x4c0] sm:$0xff]  ;;  %v3882_v55 = vld [vmem:[#allocation8 + $0x4e8] sm:$0xff]  ;;  %v6488_v39 = vpack.c.bf16 %v3864_v19, %v3863_v48 }
 0x676   :  { %6463 = vmatprep.subr.bf16.mxu1 %v6462_v49  ;;  %v6510_v9 = vpack.c.bf16 %v3988_v1, %v3987_v14  ;;  %v3971_v49 = vld [vmem:[#allocation8 + $0x530] sm:$0xff]  ;;  %v6482_v38 = vpack.c.bf16 %v3878_v15, %v3877_v32  ;;  %v3976_v27 = vld [vmem:[#allocation8 + $0x558] sm:$0xff]  ;;  %v3993_v34 = vld [vmem:[#allocation8 + $0x5e0] sm:$0xff]  ;;  %v6490_v63 = vpack.c.bf16 %v3882_v55, %v3881_v36 }
 0x677   :  { %7191 = vrot.lane.b32.xlu0 %v8954_v51, %s7468_s29  ;;  %7201 = vrot.lane.b32.xlu1 %v8954_v51, %s7465_s8  ;;  %v6512_v53 = vpack.c.bf16 %v3972_v6, %v3971_v49  ;;  %v3865_v43 = vld [vmem:[#allocation8 + $0x460] sm:$0xff]  ;;  %v3867_v14 = vld [vmem:[#allocation8 + $0x470] sm:$0xff]  ;;  %v3868_v1 = vld [vmem:[#allocation8 + $0x478] sm:$0xff] }
 0x678   :  { %6433 = vmatpush3.bf16.msra.mxu0 %v6432_v60  ;;  %v3989_v60 = vld [vmem:[#allocation8 + $0x5c0] sm:$0xff]  ;;  %v3979_v32 = vld [vmem:[#allocation8 + $0x570] sm:$0xff]  ;;  %v3980_v15 = vld [vmem:[#allocation8 + $0x578] sm:$0xff] }
 0x679   :  { %6467 = vmatprep.subr.bf16.mxu0 %v6466_v11  ;;  %6465 = vmatpush3.bf16.msra.mxu1 %v6464_v22  ;;  %v3861_v11 = vld [vmem:[#allocation8 + $0x440] sm:$0xff]  ;;  %v3879_v22 = vld [vmem:[#allocation8 + $0x4d0] sm:$0xff]  ;;  %v6514_v46 = vpack.c.bf16 %v3990_v28, %v3989_v60  ;;  %v4206_v6 = vld [vmem:[#allocation8 + $0x788] sm:$0xff]  ;;  %v6528_v28 = vpack.c.bf16 %v3980_v15, %v3979_v32 }
 0x67a   :  { %6499 = vmatprep.subr.bf16.mxu1 %v6498_v12  ;;  %v3880_v12 = vld [vmem:[#allocation8 + $0x4d8] sm:$0xff]  ;;  %v4205_v49 = vld [vmem:[#allocation8 + $0x780] sm:$0xff]  ;;  %v4098_v48 = vld [vmem:[#allocation8 + $0x6a8] sm:$0xff] }
 0x67b   :  { %7211 = vrot.lane.b32.xlu0 %v8954_v51, %s7466_s16  ;;  %3734 = vmatmul.mubr.f32.vlgmr.msra.gmra.mrb[10].mxu0 %v8880_v3  ;;  %v3858_v3 = vld [vmem:[#allocation8 + $0x428] sm:$0xff]  ;;  %v6486_v57 = vpack.c.bf16 %v3880_v12, %v3879_v22  ;;  %v4077_v60 = vld [vmem:[#allocation8 + $0x600] sm:$0xff]  ;;  %v4192_v36 = vld [vmem:[#allocation8 + $0x718] sm:$0xff] }
 0x67c   :  { %6469 = vmatpush3.bf16.msra.mxu0 %v6468_v5  ;;  %3957 = vmatprep.mubr.f32.mxu0 %v8883_v23  ;;  %v3876_v23 = vld [vmem:[#allocation8 + $0x4b8] sm:$0xff]  ;;  %v6484_v5 = vpack.c.bf16 %v3862_v35, %v3861_v11  ;;  %v6562_v35 = vpack.c.bf16 %v4206_v6, %v4205_v49  ;;  %v4190_v22 = vld [vmem:[#allocation8 + $0x708] sm:$0xff]  ;;  %v4103_v15 = vld [vmem:[#allocation8 + $0x6d0] sm:$0xff] }
 0x67d   :  { %3846 = vmatmul.mubr.f32.vlgmr.msra.gmra.mrb[6].mxu1 %v8886_v29  ;;  %7206 = vrot.lane.b32.xlu1 %v8954_v51, %s7469_s0  ;;  %v3970_v29 = vld [vmem:[#allocation8 + $0x528] sm:$0xff]  ;;  %v6476_v51 = vpack.c.bf16 %v3858_v3, %v3857_v52  ;;  %v6478_v50 = vpack.c.bf16 %v3876_v23, %v3875_v37  ;;  %v3883_v3 = vld [vmem:[#allocation8 + $0x4f0] sm:$0xff]  ;;  %v3977_v23 = vld [vmem:[#allocation8 + $0x560] sm:$0xff] }
 0x67e   :  { %6501 = vmatpush3.bf16.msra.mxu1 %v6500_v24  ;;  %4069 = vmatprep.mubr.f32.mxu1 %v8896_v42  ;;  %v3859_v42 = vld [vmem:[#allocation8 + $0x430] sm:$0xff]  ;;  %v6508_v21 = vpack.c.bf16 %v3970_v29, %v3969_v17  ;;  %v6516_v24 = vpack.c.bf16 %v3974_v10, %v3973_v2  ;;  %v4096_v11 = vld [vmem:[#allocation8 + $0x698] sm:$0xff]  ;;  %v4197_v6 = vld [vmem:[#allocation8 + $0x740] sm:$0xff] }
 0x67f   :  { %6471 = vmatprep.subr.bf16.mxu0 %v6470_v45  ;;  %6503 = vmatprep.subr.bf16.mxu1 %v6502_v16  ;;  %v6480_v33 = vpack.c.bf16 %v3860_v18, %v3859_v42  ;;  %v6518_v45 = vpack.c.bf16 %v3992_v25, %v3991_v44  ;;  %v3975_v16 = vld [vmem:[#allocation8 + $0x550] sm:$0xff]  ;;  %v4093_v42 = vld [vmem:[#allocation8 + $0x680] sm:$0xff]  ;;  %v4094_v18 = vld [vmem:[#allocation8 + $0x688] sm:$0xff] }
 0x680   :  { %6473 = vmatpush3.bf16.msra.mxu0 %v6472_v41  ;;  %7221 = vrot.lane.b32.xlu0 %v8977_v4, %s7463_s4  ;;  %v3994_v41 = vld [vmem:[#allocation8 + $0x5e8] sm:$0xff]  ;;  %v6520_v52 = vpack.c.bf16 %v3976_v27, %v3975_v16  ;;  %v3995_v29 = vld [vmem:[#allocation8 + $0x5f0] sm:$0xff]  ;;  %v4208_v2 = vld [vmem:[#allocation8 + $0x798] sm:$0xff] }
 0x681   :  { %7216 = vrot.lane.b32.xlu1 %v8977_v4, %s7467_s26  ;;  %6475 = vmatprep.subr.bf16.mxu0 %v6474_v61  ;;  %v3866_v61 = vld [vmem:[#allocation8 + $0x468] sm:$0xff]  ;;  %v6522_v37 = vpack.c.bf16 %v3994_v41, %v3993_v34  ;;  %v4080_v44 = vld [vmem:[#allocation8 + $0x618] sm:$0xff]  ;;  %v4099_v41 = vld [vmem:[#allocation8 + $0x6b0] sm:$0xff] }
 0x682   :  { %6505 = vmatpush3.bf16.msra.mxu1 %v6504_v62  ;;  %v3884_v62 = vld [vmem:[#allocation8 + $0x4f8] sm:$0xff]  ;;  %v6492_v17 = vpack.c.bf16 %v3866_v61, %v3865_v43  ;;  %v4210_v16 = vld [vmem:[#allocation8 + $0x7a8] sm:$0xff]  ;;  %v4193_v61 = vld [vmem:[#allocation8 + $0x720] sm:$0xff] }
 0x683   :  { %6507 = vmatprep.subr.bf16.mxu1 %v6506_v59  ;;  %v3978_v59 = vld [vmem:[#allocation8 + $0x568] sm:$0xff]  ;;  %vm9523_vm1 = vmmov %vm9522_vm4 }
 0x684   :  { %6477 = vmatpush3.bf16.msra.mxu0 %v6476_v51  ;;  %7231 = vrot.lane.b32.xlu0 %v8977_v4, %s7468_s29  ;;  %v3996_v51 = vld [vmem:[#allocation8 + $0x5f8] sm:$0xff]  ;;  %v4082_v34 = vld [vmem:[#allocation8 + $0x628] sm:$0xff] }
 0x685   :  { %7226 = vrot.lane.b32.xlu1 %v8977_v4, %s7462_s3  ;;  %6479 = vmatprep.subr.bf16.mxu0 %v6478_v50  ;;  %v6524_v50 = vpack.c.bf16 %v3978_v59, %v3977_v23  ;;  %v4084_v23 = vld [vmem:[#allocation8 + $0x638] sm:$0xff]  ;;  %s9530_s3 = sld [smem:[#allocation23_spill]] }
 0x686   :  { %6509 = vmatpush3.bf16.msra.mxu1 %v6508_v21  ;;  %v6526_v21 = vpack.c.bf16 %v3996_v51, %v3995_v29  ;;  %v4102_v29 = vld [vmem:[#allocation8 + $0x6c8] sm:$0xff]  ;;  %v4195_v51 = vld [vmem:[#allocation8 + $0x730] sm:$0xff] }
 0x687   :  { %6511 = vmatprep.subr.bf16.mxu1 %v6510_v9  ;;  %v6496_v9 = vpack.c.bf16 %v3868_v1, %v3867_v14  ;;  %v4213_v1 = vld [vmem:[#allocation8 + $0x7c0] sm:$0xff] }
 0x688   :  { %6481 = vmatpush3.bf16.msra.mxu0 %v6480_v33  ;;  %7241 = vrot.lane.b32.xlu0 %v8977_v4, %s7465_s8  ;;  %v6530_v33 = vpack.c.bf16 %v4094_v18, %v4093_v42  ;;  %v4085_v18 = vld [vmem:[#allocation8 + $0x640] sm:$0xff] }
 0x689   :  { %7236 = vrot.lane.b32.xlu1 %v8977_v4, %s7464_s23  ;;  %6483 = vmatprep.subr.bf16.mxu0 %v6482_v38  ;;  %v4095_v38 = vld [vmem:[#allocation8 + $0x690] sm:$0xff] }
 0x68a   :  { %6513 = vmatpush3.bf16.msra.mxu1 %v6512_v53  ;;  %v4189_v53 = vld [vmem:[#allocation8 + $0x700] sm:$0xff]  ;;  %v6534_v10 = vpack.c.bf16 %v4096_v11, %v4095_v38  ;;  %v4087_v11 = vld [vmem:[#allocation8 + $0x650] sm:$0xff] }
 0x68b   :  { %6515 = vmatprep.subr.bf16.mxu1 %v6514_v46  ;;  %v4207_v46 = vld [vmem:[#allocation8 + $0x790] sm:$0xff]  ;;  %v6564_v25 = vpack.c.bf16 %v4190_v22, %v4189_v53  ;;  %v4105_v22 = vld [vmem:[#allocation8 + $0x6e0] sm:$0xff] }
 0x68c   :  { %6485 = vmatpush3.bf16.msra.mxu0 %v6484_v5  ;;  %7256 = vrot.lane.b32.xlu0 %v8977_v4, %s7466_s16  ;;  %v4079_v5 = vld [vmem:[#allocation8 + $0x610] sm:$0xff]  ;;  %v6566_v19 = vpack.c.bf16 %v4208_v2, %v4207_v46 }
 0x68d   :  { %7246 = vrot.lane.b32.xlu1 %v8977_v4, %s7469_s0  ;;  %6487 = vmatprep.subr.bf16.mxu0 %v6486_v57  ;;  %v6494_v4 = vpack.c.bf16 %v3884_v62, %v3883_v3  ;;  %v4097_v57 = vld [vmem:[#allocation8 + $0x6a0] sm:$0xff]  ;;  %v6536_v55 = vpack.c.bf16 %v4080_v44, %v4079_v5  ;;  %v4211_v3 = vld [vmem:[#allocation8 + $0x7b0] sm:$0xff]  ;;  %v4212_v62 = vld [vmem:[#allocation8 + $0x7b8] sm:$0xff] }
 0x68e   :  { %6517 = vmatpush3.bf16.msra.mxu1 %v6516_v24  ;;  %v4191_v24 = vld [vmem:[#allocation8 + $0x710] sm:$0xff]  ;;  %v6538_v27 = vpack.c.bf16 %v4098_v48, %v4097_v57  ;;  %v4217_v44 = vld [vmem:[#allocation8 + $0x7e0] sm:$0xff] }
 0x68f   :  { %6519 = vmatprep.subr.bf16.mxu1 %v6518_v45  ;;  %v4209_v45 = vld [vmem:[#allocation8 + $0x7a0] sm:$0xff]  ;;  %v4199_v2 = vld [vmem:[#allocation8 + $0x750] sm:$0xff] }
 0x690   :  { %6489 = vmatpush3.bf16.msra.mxu0 %v6488_v39  ;;  %7261 = vrot.lane.b32.xlu0 %v8913_v54, %s7466_s16  ;;  %v4081_v39 = vld [vmem:[#allocation8 + $0x620] sm:$0xff]  ;;  %v6570_v43 = vpack.c.bf16 %v4210_v16, %v4209_v45 }
 0x691   :  { %7251 = vrot.lane.b32.xlu1 %v8913_v54, %s7469_s0  ;;  %6491 = vmatprep.subr.bf16.mxu0 %v6490_v63  ;;  %v4078_v54 = vld [vmem:[#allocation8 + $0x608] sm:$0xff]  ;;  %v4100_v63 = vld [vmem:[#allocation8 + $0x6b8] sm:$0xff]  ;;  %v4089_v48 = vld [vmem:[#allocation8 + $0x660] sm:$0xff] }
 0x692   :  { %6521 = vmatpush3.bf16.msra.mxu1 %v6520_v52  ;;  %v6532_v12 = vpack.c.bf16 %v4078_v54, %v4077_v60  ;;  %v4194_v52 = vld [vmem:[#allocation8 + $0x728] sm:$0xff]  ;;  %v4215_v54 = vld [vmem:[#allocation8 + $0x7d0] sm:$0xff]  ;;  %v4201_v16 = vld [vmem:[#allocation8 + $0x760] sm:$0xff] }
 0x693   :  { %6523 = vmatprep.subr.bf16.mxu1 %v6522_v37  ;;  %v4083_v37 = vld [vmem:[#allocation8 + $0x630] sm:$0xff]  ;;  %v6572_v59 = vpack.c.bf16 %v4194_v52, %v4193_v61  ;;  %v4317_v52 = vld [vmem:[#allocation8 + $0x880] sm:$0xff] }
 0x694   :  { %6493 = vmatpush3.bf16.msra.mxu0 %v6492_v17  ;;  %v4101_v17 = vld [vmem:[#allocation8 + $0x6c0] sm:$0xff]  ;;  %v6544_v14 = vpack.c.bf16 %v4084_v23, %v4083_v37 }
 0x695   :  { %6495 = vmatprep.subr.bf16.mxu0 %v6494_v4  ;;  %v4196_v4 = vld [vmem:[#allocation8 + $0x738] sm:$0xff]  ;;  %v6546_v42 = vpack.c.bf16 %v4102_v29, %v4101_v17  ;;  %v4431_v23 = vld [vmem:[#allocation8 + $0x980] sm:$0xff] }
 0x696   :  { %6525 = vmatpush3.bf16.msra.mxu1 %v6524_v50  ;;  %v4214_v50 = vld [vmem:[#allocation8 + $0x7c8] sm:$0xff]  ;;  %v6576_v32 = vpack.c.bf16 %v4196_v4, %v4195_v51  ;;  %v4301_v29 = vld [vmem:[#allocation8 + $0x800] sm:$0xff]  ;;  %v4319_v4 = vld [vmem:[#allocation8 + $0x890] sm:$0xff] }
 0x697   :  { %6527 = vmatprep.subr.bf16.mxu1 %v6526_v21  ;;  %v4086_v21 = vld [vmem:[#allocation8 + $0x648] sm:$0xff]  ;;  %v6578_v49 = vpack.c.bf16 %v4214_v50, %v4213_v1  ;;  %v4415_v50 = vld [vmem:[#allocation8 + $0x900] sm:$0xff] }
 0x698   :  { %6497 = vmatpush3.bf16.msra.mxu0 %v6496_v9  ;;  %v4104_v9 = vld [vmem:[#allocation8 + $0x6d8] sm:$0xff]  ;;  %v6548_v60 = vpack.c.bf16 %v4086_v21, %v4085_v18  ;;  %v4433_v21 = vld [vmem:[#allocation8 + $0x990] sm:$0xff] }
 0x699   :  { %6531 = vmatprep.subr.bf16.mxu0 %v6530_v33  ;;  %v4198_v33 = vld [vmem:[#allocation8 + $0x748] sm:$0xff]  ;;  %v6550_v38 = vpack.c.bf16 %v4104_v9, %v4103_v15  ;;  %v4303_v9 = vld [vmem:[#allocation8 + $0x810] sm:$0xff] }
 0x69a   :  { %6529 = vmatpush3.bf16.msra.mxu1 %v6528_v28  ;;  %v4216_v28 = vld [vmem:[#allocation8 + $0x7d8] sm:$0xff]  ;;  %v6580_v53 = vpack.c.bf16 %v4198_v33, %v4197_v6  ;;  %v4321_v33 = vld [vmem:[#allocation8 + $0x8a0] sm:$0xff] }
 0x69b   :  { %3958 = vmatmul.mubr.f32.vlgmr.msra.gmra.mrb[12].mxu0 %v8899_v30  ;;  %6563 = vmatprep.subr.bf16.mxu1 %v6562_v35  ;;  %v6568_v30 = vpack.c.bf16 %v4192_v36, %v4191_v24  ;;  %v4088_v35 = vld [vmem:[#allocation8 + $0x658] sm:$0xff]  ;;  %v6582_v46 = vpack.c.bf16 %v4216_v28, %v4215_v54  ;;  %v4107_v36 = vld [vmem:[#allocation8 + $0x6f0] sm:$0xff] }
 0x69c   :  { %6533 = vmatpush3.bf16.msra.mxu0 %v6532_v12  ;;  %4181 = vmatprep.mubr.f32.mxu0 %v8906_v40  ;;  %v6540_v40 = vpack.c.bf16 %v4082_v34, %v4081_v39  ;;  %v4106_v12 = vld [vmem:[#allocation8 + $0x6e8] sm:$0xff]  ;;  %v6552_v5 = vpack.c.bf16 %v4088_v35, %v4087_v11  ;;  %v4219_v34 = vld [vmem:[#allocation8 + $0x7f0] sm:$0xff]  ;;  %v4435_v35 = vld [vmem:[#allocation8 + $0x9a0] sm:$0xff] }
 0x69d   :  { %4070 = vmatmul.mubr.f32.vlgmr.msra.gmra.mrb[8].mxu1 %v8926_v31  ;;  %6535 = vmatprep.subr.bf16.mxu0 %v6534_v10  ;;  %v6542_v31 = vpack.c.bf16 %v4100_v63, %v4099_v41  ;;  %v4200_v10 = vld [vmem:[#allocation8 + $0x758] sm:$0xff]  ;;  %v6554_v57 = vpack.c.bf16 %v4106_v12, %v4105_v22  ;;  %v4091_v63 = vld [vmem:[#allocation8 + $0x670] sm:$0xff]  ;;  %v4305_v12 = vld [vmem:[#allocation8 + $0x820] sm:$0xff] }
 0x69e   :  { %6565 = vmatpush3.bf16.msra.mxu1 %v6564_v25  ;;  %4293 = vmatprep.mubr.f32.mxu1 %v8929_v13  ;;  %v6574_v13 = vpack.c.bf16 %v4212_v62, %v4211_v3  ;;  %v4218_v25 = vld [vmem:[#allocation8 + $0x7e8] sm:$0xff]  ;;  %v6584_v24 = vpack.c.bf16 %v4200_v10, %v4199_v2  ;;  %v4203_v62 = vld [vmem:[#allocation8 + $0x770] sm:$0xff] }
 0x69f   :  { %6567 = vmatprep.subr.bf16.mxu1 %v6566_v19  ;;  %v4090_v19 = vld [vmem:[#allocation8 + $0x668] sm:$0xff]  ;;  %v6586_v45 = vpack.c.bf16 %v4218_v25, %v4217_v44  ;;  %v4417_v28 = vld [vmem:[#allocation8 + $0x910] sm:$0xff]  ;;  %v4419_v44 = vld [vmem:[#allocation8 + $0x920] sm:$0xff] }
 0x6a0   :  { %6537 = vmatpush3.bf16.msra.mxu0 %v6536_v55  ;;  %v4108_v55 = vld [vmem:[#allocation8 + $0x6f8] sm:$0xff]  ;;  %v6556_v39 = vpack.c.bf16 %v4090_v19, %v4089_v48  ;;  %v4323_v10 = vld [vmem:[#allocation8 + $0x8b0] sm:$0xff]  ;;  %v4420_v25 = vld [vmem:[#allocation8 + $0x928] sm:$0xff] }
 0x6a1   :  { %6539 = vmatprep.subr.bf16.mxu0 %v6538_v27  ;;  %v4202_v27 = vld [vmem:[#allocation8 + $0x768] sm:$0xff]  ;;  %v6558_v41 = vpack.c.bf16 %v4108_v55, %v4107_v36  ;;  %v4437_v48 = vld [vmem:[#allocation8 + $0x9b0] sm:$0xff]  ;;  %v4438_v19 = vld [vmem:[#allocation8 + $0x9b8] sm:$0xff]  ;;  %v6636_v55 = vpack.c.bf16 %v4420_v25, %v4419_v44 }
 0x6a2   :  { %6569 = vmatpush3.bf16.msra.mxu1 %v6568_v30  ;;  %v4220_v30 = vld [vmem:[#allocation8 + $0x7f8] sm:$0xff]  ;;  %v6588_v61 = vpack.c.bf16 %v4202_v27, %v4201_v16  ;;  %v4307_v36 = vld [vmem:[#allocation8 + $0x830] sm:$0xff]  ;;  %v4326_v16 = vld [vmem:[#allocation8 + $0x8c8] sm:$0xff]  ;;  %v6638_v27 = vpack.c.bf16 %v4438_v19, %v4437_v48 }
 0x6a3   :  { %6571 = vmatprep.subr.bf16.mxu1 %v6570_v43  ;;  %v4092_v43 = vld [vmem:[#allocation8 + $0x678] sm:$0xff]  ;;  %v6590_v3 = vpack.c.bf16 %v4220_v30, %v4219_v34  ;;  %v4542_v44 = vld [vmem:[#allocation8 + $0xa88] sm:$0xff] }
 0x6a4   :  { %6541 = vmatpush3.bf16.msra.mxu0 %v6540_v40  ;;  %v4318_v40 = vld [vmem:[#allocation8 + $0x888] sm:$0xff]  ;;  %v6560_v37 = vpack.c.bf16 %v4092_v43, %v4091_v63  ;;  %v4422_v34 = vld [vmem:[#allocation8 + $0x938] sm:$0xff] }
 0x6a5   :  { %6543 = vmatprep.subr.bf16.mxu0 %v6542_v31  ;;  %v4204_v31 = vld [vmem:[#allocation8 + $0x778] sm:$0xff]  ;;  %v6594_v17 = vpack.c.bf16 %v4318_v40, %v4317_v52  ;;  %v4440_v63 = vld [vmem:[#allocation8 + $0x9c8] sm:$0xff] }
 0x6a6   :  { %6573 = vmatpush3.bf16.msra.mxu1 %v6572_v59  ;;  %v4432_v59 = vld [vmem:[#allocation8 + $0x988] sm:$0xff]  ;;  %v6592_v51 = vpack.c.bf16 %v4204_v31, %v4203_v62  ;;  %v4328_v62 = vld [vmem:[#allocation8 + $0x8d8] sm:$0xff] }
 0x6a7   :  { %6575 = vmatprep.subr.bf16.mxu1 %v6574_v13  ;;  %v4302_v13 = vld [vmem:[#allocation8 + $0x808] sm:$0xff]  ;;  %v6626_v1 = vpack.c.bf16 %v4432_v59, %v4431_v23  ;;  %v4430_v48 = vld [vmem:[#allocation8 + $0x978] sm:$0xff] }
 0x6a8   :  { %6545 = vmatpush3.bf16.msra.mxu0 %v6544_v14  ;;  %v4320_v14 = vld [vmem:[#allocation8 + $0x898] sm:$0xff]  ;;  %v6596_v18 = vpack.c.bf16 %v4302_v13, %v4301_v29  ;;  %v4310_v52 = vld [vmem:[#allocation8 + $0x848] sm:$0xff] }
 0x6a9   :  { %6547 = vmatprep.subr.bf16.mxu0 %v6546_v42  ;;  %v4416_v42 = vld [vmem:[#allocation8 + $0x908] sm:$0xff]  ;;  %v6598_v15 = vpack.c.bf16 %v4320_v14, %v4319_v4  ;;  %v4442_v29 = vld [vmem:[#allocation8 + $0x9d8] sm:$0xff] }
 0x6aa   :  { %6577 = vmatpush3.bf16.msra.mxu1 %v6576_v32  ;;  %v4434_v32 = vld [vmem:[#allocation8 + $0x998] sm:$0xff]  ;;  %v6628_v6 = vpack.c.bf16 %v4416_v42, %v4415_v50  ;;  %v4424_v23 = vld [vmem:[#allocation8 + $0x948] sm:$0xff] }
 0x6ab   :  { %6579 = vmatprep.subr.bf16.mxu1 %v6578_v49  ;;  %v4304_v49 = vld [vmem:[#allocation8 + $0x818] sm:$0xff]  ;;  %v6630_v54 = vpack.c.bf16 %v4434_v32, %v4433_v21  ;;  %v4330_v50 = vld [vmem:[#allocation8 + $0x8e8] sm:$0xff] }
 0x6ac   :  { %6549 = vmatpush3.bf16.msra.mxu0 %v6548_v60  ;;  %v4322_v60 = vld [vmem:[#allocation8 + $0x8a8] sm:$0xff]  ;;  %v6600_v11 = vpack.c.bf16 %v4304_v49, %v4303_v9  ;;  %v4312_v4 = vld [vmem:[#allocation8 + $0x858] sm:$0xff] }
 0x6ad   :  { %6551 = vmatprep.subr.bf16.mxu0 %v6550_v38  ;;  %v4418_v38 = vld [vmem:[#allocation8 + $0x918] sm:$0xff]  ;;  %v6602_v22 = vpack.c.bf16 %v4322_v60, %v4321_v33  ;;  %v4444_v9 = vld [vmem:[#allocation8 + $0x9e8] sm:$0xff] }
 0x6ae   :  { %6581 = vmatpush3.bf16.msra.mxu1 %v6580_v53  ;;  %v4436_v53 = vld [vmem:[#allocation8 + $0x9a8] sm:$0xff]  ;;  %v6632_v2 = vpack.c.bf16 %v4418_v38, %v4417_v28  ;;  %v4426_v21 = vld [vmem:[#allocation8 + $0x958] sm:$0xff] }
 0x6af   :  { %6583 = vmatprep.subr.bf16.mxu1 %v6582_v46  ;;  %v4306_v46 = vld [vmem:[#allocation8 + $0x828] sm:$0xff]  ;;  %v4332_v28 = vld [vmem:[#allocation8 + $0x8f8] sm:$0xff] }
 0x6b0   :  { %6553 = vmatpush3.bf16.msra.mxu0 %v6552_v5  ;;  %v4324_v5 = vld [vmem:[#allocation8 + $0x8b8] sm:$0xff]  ;;  %v4314_v33 = vld [vmem:[#allocation8 + $0x868] sm:$0xff] }
 0x6b1   :  { %6555 = vmatprep.subr.bf16.mxu0 %v6554_v57  ;;  %v6604_v57 = vpack.c.bf16 %v4306_v46, %v4305_v12  ;;  %v4446_v12 = vld [vmem:[#allocation8 + $0x9f8] sm:$0xff] }
 0x6b2   :  { %6585 = vmatpush3.bf16.msra.mxu1 %v6584_v24  ;;  %v6606_v24 = vpack.c.bf16 %v4324_v5, %v4323_v10  ;;  %v4316_v10 = vld [vmem:[#allocation8 + $0x878] sm:$0xff] }
 0x6b3   :  { %6587 = vmatprep.subr.bf16.mxu1 %v6586_v45  ;;  %v4325_v45 = vld [vmem:[#allocation8 + $0x8c0] sm:$0xff] }
 0x6b4   :  { %6557 = vmatpush3.bf16.msra.mxu0 %v6556_v39  ;;  %v4421_v39 = vld [vmem:[#allocation8 + $0x930] sm:$0xff]  ;;  %v6610_v43 = vpack.c.bf16 %v4326_v16, %v4325_v45 }
 0x6b5   :  { %6559 = vmatprep.subr.bf16.mxu0 %v6558_v41  ;;  %v4439_v41 = vld [vmem:[#allocation8 + $0x9c0] sm:$0xff]  ;;  %v6640_v40 = vpack.c.bf16 %v4422_v34, %v4421_v39 }
 0x6b6   :  { %6589 = vmatpush3.bf16.msra.mxu1 %v6588_v61  ;;  %v4309_v61 = vld [vmem:[#allocation8 + $0x840] sm:$0xff]  ;;  %v6642_v31 = vpack.c.bf16 %v4440_v63, %v4439_v41 }
 0x6b7   :  { %6591 = vmatprep.subr.bf16.mxu1 %v6590_v3  ;;  %v4327_v3 = vld [vmem:[#allocation8 + $0x8d0] sm:$0xff]  ;;  %v6612_v59 = vpack.c.bf16 %v4310_v52, %v4309_v61 }
 0x6b8   :  { %6561 = vmatpush3.bf16.msra.mxu0 %v6560_v37  ;;  %v4423_v37 = vld [vmem:[#allocation8 + $0x940] sm:$0xff]  ;;  %v6614_v13 = vpack.c.bf16 %v4328_v62, %v4327_v3 }
 0x6b9   :  { %6595 = vmatprep.subr.bf16.mxu0 %v6594_v17  ;;  %v4441_v17 = vld [vmem:[#allocation8 + $0x9d0] sm:$0xff]  ;;  %v6644_v14 = vpack.c.bf16 %v4424_v23, %v4423_v37 }
 0x6ba   :  { %6593 = vmatpush3.bf16.msra.mxu1 %v6592_v51  ;;  %v4311_v51 = vld [vmem:[#allocation8 + $0x850] sm:$0xff]  ;;  %v6646_v42 = vpack.c.bf16 %v4442_v29, %v4441_v17 }
 0x6bb   :  { %4182 = vmatmul.mubr.f32.vlgmr.msra.gmra.mrb[14].mxu0 %v8937_v56  ;;  %6627 = vmatprep.subr.bf16.mxu1 %v6626_v1  ;;  %v6634_v56 = vpack.c.bf16 %v4436_v53, %v4435_v35  ;;  %v4329_v1 = vld [vmem:[#allocation8 + $0x8e0] sm:$0xff]  ;;  %v6616_v32 = vpack.c.bf16 %v4312_v4, %v4311_v51  ;;  %v4428_v35 = vld [vmem:[#allocation8 + $0x968] sm:$0xff] }
 0x6bc   :  { %6597 = vmatpush3.bf16.msra.mxu0 %v6596_v18  ;;  %v4425_v18 = vld [vmem:[#allocation8 + $0x950] sm:$0xff]  ;;  %v6618_v49 = vpack.c.bf16 %v4330_v50, %v4329_v1  ;;  %v9025_v51 = vld [vmem:[#allocation8 + $0xa00] sm:$0xff]  ;;  %v9027_v4 = vld [vmem:[#allocation8 + $0xa08] sm:$0xff] }
 0x6bd   :  { %4294 = vmatmul.mubr.f32.vlgmr.msra.gmra.mrb[10].mxu1 %v8940_v0  ;;  %6599 = vmatprep.subr.bf16.mxu0 %v6598_v15  ;;  %v4308_v0 = vld [vmem:[#allocation8 + $0x838] sm:$0xff]  ;;  %v4443_v15 = vld [vmem:[#allocation8 + $0x9e0] sm:$0xff]  ;;  %v6648_v60 = vpack.c.bf16 %v4426_v21, %v4425_v18 }
 0x6be   :  { %6629 = vmatpush3.bf16.msra.mxu1 %v6628_v6  ;;  %v6608_v30 = vpack.c.bf16 %v4308_v0, %v4307_v36  ;;  %v4313_v6 = vld [vmem:[#allocation8 + $0x860] sm:$0xff]  ;;  %v6650_v38 = vpack.c.bf16 %v4444_v9, %v4443_v15  ;;  %v4654_v0 = vld [vmem:[#allocation8 + $0xb88] sm:$0xff]  ;;  %v9038_v15 = vld [vmem:[#allocation8 + $0xa90] sm:$0xff] }
 0x6bf   :  { %6631 = vmatprep.subr.bf16.mxu1 %v6630_v54  ;;  %v4331_v54 = vld [vmem:[#allocation8 + $0x8f0] sm:$0xff]  ;;  %v6620_v53 = vpack.c.bf16 %v4314_v33, %v4313_v6  ;;  %v4653_v36 = vld [vmem:[#allocation8 + $0xb80] sm:$0xff]  ;;  %v9040_v9 = vld [vmem:[#allocation8 + $0xa98] sm:$0xff]  ;;  %v9047_v6 = vsel %vm774_vm2, %v8946_v58, -1e+30 }
 0x6c0   :  { %6601 = vmatpush3.bf16.msra.mxu0 %v6600_v11  ;;  %v4427_v11 = vld [vmem:[#allocation8 + $0x960] sm:$0xff]  ;;  %v6622_v46 = vpack.c.bf16 %v4332_v28, %v4331_v54  ;;  %v9049_v33 = vld [vmem:[#allocation8 + $0xa10] sm:$0xff] }
 0x6c1   :  { %6603 = vmatprep.subr.bf16.mxu0 %v6602_v22  ;;  %v4445_v22 = vld [vmem:[#allocation8 + $0x9f0] sm:$0xff]  ;;  %v6652_v5 = vpack.c.bf16 %v4428_v35, %v4427_v11 }
 0x6c2   :  { %6633 = vmatpush3.bf16.msra.mxu1 %v6632_v2  ;;  %v4315_v2 = vld [vmem:[#allocation8 + $0x870] sm:$0xff]  ;;  %v6654_v25 = vpack.c.bf16 %v4446_v12, %v4445_v22  ;;  %v9057_v22 = vld [vmem:[#allocation8 + $0xb98] sm:$0xff] }
 0x6c3   :  { %6635 = vmatprep.subr.bf16.mxu1 %v6634_v56  ;;  %v4541_v56 = vld [vmem:[#allocation8 + $0xa80] sm:$0xff]  ;;  %v9053_v54 = vld [vmem:[#allocation8 + $0xb90] sm:$0xff] }
 0x6c4   :  { %6605 = vmatpush3.bf16.msra.mxu0 %v6604_v57  ;;  %v4429_v57 = vld [vmem:[#allocation8 + $0x970] sm:$0xff]  ;;  %v6658_v45 = vpack.c.bf16 %v4542_v44, %v4541_v56  ;;  %v6660_v56 = vpack.c.bf16 %v9027_v4, %v9025_v51 }
 0x6c5   :  { %6607 = vmatprep.subr.bf16.mxu0 %v6606_v24  ;;  %v6624_v24 = vpack.c.bf16 %v4316_v10, %v4315_v2  ;;  %v6656_v16 = vpack.c.bf16 %v4430_v48, %v4429_v57  ;;  %v9059_v12 = vld [vmem:[#allocation8 + $0xb10] sm:$0xff] }
 0x6c6   :  { %6637 = vmatpush3.bf16.msra.mxu1 %v6636_v55  ;;  %v7276_v10 = vld [vmem:[#allocation3 + $0x50] sm:$0xff] }
 0x6c7   :  { %6639 = vmatprep.subr.bf16.mxu1 %v6638_v27  ;;  %v6690_v27 = vpack.c.bf16 %v4654_v0, %v4653_v36  ;;  %v6694_v0 = vpack.c.bf16 %v9057_v22, %v9053_v54 }
 0x6c8   :  { %6609 = vmatpush3.bf16.msra.mxu0 %v6608_v30 }
 0x6c9   :  { %6611 = vmatprep.subr.bf16.mxu0 %v6610_v43 }
 0x6ca   :  { %6641 = vmatpush3.bf16.msra.mxu1 %v6640_v40 }
 0x6cb   :  { %6643 = vmatprep.subr.bf16.mxu1 %v6642_v31 }
 0x6cc   :  { %6613 = vmatpush3.bf16.msra.mxu0 %v6612_v59  ;;  %v7274_v59 = vld [vmem:[#allocation3 + $0x18] sm:$0xff] }
 0x6cd   :  { %6615 = vmatprep.subr.bf16.mxu0 %v6614_v13  ;;  %v2954_v17 = vsel %vm774_vm2, %v7274_v59, -1e+30 }
 0x6ce   :  { %6645 = vmatpush3.bf16.msra.mxu1 %v6644_v14  ;;  %v9029_v14 = vld [vmem:[#allocation8 + $0xb00] sm:$0xff] }
 0x6cf   :  { %6647 = vmatprep.subr.bf16.mxu1 %v6646_v42  ;;  %v7275_v42 = vld [vmem:[#allocation3 + $0x20] sm:$0xff] }
 0x6d0   :  { %6617 = vmatpush3.bf16.msra.mxu0 %v6616_v32  ;;  %v2955_v18 = vsel %vm775_vm3, %v7275_v42, -1e+30  ;;  %v9036_v32 = vld [vmem:[#allocation8 + $0xb08] sm:$0xff] }
 0x6d1   :  { %6619 = vmatprep.subr.bf16.mxu0 %v6618_v49  ;;  %v6692_v48 = vpack.c.bf16 %v9036_v32, %v9029_v14  ;;  %v4641_v14 = vld [vmem:[#allocation8 + $0xb20] sm:$0xff]  ;;  %v4642_v32 = vld [vmem:[#allocation8 + $0xb28] sm:$0xff] }
 0x6d2   :  { %6649 = vmatpush3.bf16.msra.mxu1 %v6648_v60  ;;  %v9051_v60 = vld [vmem:[#allocation8 + $0xa18] sm:$0xff] }
 0x6d3   :  { %6651 = vmatprep.subr.bf16.mxu1 %v6650_v38  ;;  %v6664_v36 = vpack.c.bf16 %v9051_v60, %v9049_v33 }
 0x6d4   :  { %6621 = vmatpush3.bf16.msra.mxu0 %v6620_v53 }
 0x6d5   :  { %v7152_v19 = vpop.permute.xlu0 %7151  ;;  %v7147_v55 = vpop.permute.xlu1 %7146  ;;  %6623 = vmatprep.subr.bf16.mxu0 %v6622_v46  ;;  %v9061_v46 = vld [vmem:[#allocation8 + $0xb18] sm:$0xff] }
 0x6d6   :  { %6653 = vmatpush3.bf16.msra.mxu1 %v6652_v5  ;;  %v7149_v40 = vunpack.i.h.bf16 %v7147_v55  ;;  %v7148_v3 = vunpack.i.l.bf16 %v7147_v55  ;;  %v7154_v31 = vunpack.i.h.bf16 %v7152_v19  ;;  %v7153_v37 = vunpack.i.l.bf16 %v7152_v19 }
 0x6d7   :  { %6655 = vmatprep.subr.bf16.mxu1 %v6654_v25  ;;  %v9069_v5 = vsel %vm775_vm3, %v7276_v10, -1e+30  ;;  %v6696_v55 = vpack.c.bf16 %v9061_v46, %v9059_v12  ;;  %v4533_v46 = vld [vmem:[#allocation8 + $0xa40] sm:$0xff] }
 0x6d8   :  { %6625 = vmatpush3.bf16.msra.mxu0 %v6624_v24  ;;  %v6662_v24 = vpack.c.bf16 %v9040_v9, %v9038_v15 }
 0x6d9   :  { %v9005_v39 = vpop.permute.xlu0 %7161  ;;  %v7157_v34 = vpop.permute.xlu1 %7156  ;;  %6659 = vmatprep.subr.bf16.mxu0 %v6658_v45 }
 0x6da   :  { %6657 = vmatpush3.bf16.msra.mxu1 %v6656_v16  ;;  %v7159_v28 = vunpack.i.h.bf16 %v7157_v34  ;;  %v7158_v38 = vunpack.i.l.bf16 %v7157_v34 }
 0x6db   :  { %6691 = vmatprep.subr.bf16.mxu1 %v6690_v27 }
 0x6dd   :  { %v9007_v30 = vpop.permute.xlu0 %7171  ;;  %v9009_v41 = vpop.permute.xlu1 %7166 }
 0x6de   :  { %v7169_v45 = vunpack.i.h.bf16 %v9009_v41  ;;  %v7168_v16 = vunpack.i.l.bf16 %v9009_v41 }
 0x6e1   :  { %v9011_v63 = vpop.permute.xlu0 %7181  ;;  %v9013_v43 = vpop.permute.xlu1 %7176 }
 0x6e2   :  { %v7179_v61 = vunpack.i.h.bf16 %v9013_v43  ;;  %v7184_v52 = vunpack.i.h.bf16 %v9011_v63 }
 0x6e4   :  { %v3238_v29 = vsel %vm374_vm14, %v7149_v40, %v7179_v61  ;;  %v3239_v13 = vsel %vm374_vm14, %v7179_v61, %v7148_v3  ;;  %v2998_v1 = vsel %vm198_vm9, %v7154_v31, %v7184_v52  ;;  %v2999_v50 = vsel %vm198_vm9, %v7184_v52, %v7153_v37 }
 0x6e5   :  { %v9017_v62 = vpop.permute.xlu0 %7186  ;;  %v9019_v23 = vpop.permute.xlu1 %7196  ;;  %v3254_v11 = vmax.f32 %v2954_v17, %v3238_v29  ;;  %v3255_v35 = vmax.f32 %v2955_v18, %v3239_v13  ;;  %v3014_v58 = vsel %vm796_vm5, %v2998_v1, -1e+30  ;;  %v3015_v2 = vsel %vm797_vm7, %v2999_v50, -1e+30 }
 0x6e6   :  { %v7189_v21 = vunpack.i.h.bf16 %v9017_v62  ;;  %v7199_v57 = vunpack.i.h.bf16 %v9019_v23  ;;  %v7164_v61 = vunpack.i.h.bf16 %v9005_v39  ;;  %v7163_v31 = vunpack.i.l.bf16 %v9005_v39 }
 0x6e7   :  { %v3262_v27 = vmax.f32 %v3254_v11, %v3014_v58  ;;  %v3263_v34 = vmax.f32 %v3255_v35, %v3015_v2  ;;  %v7174_v37 = vunpack.i.h.bf16 %v9007_v30  ;;  %v7173_v29 = vunpack.i.l.bf16 %v9007_v30 }
 0x6e8   :  { %v3046_v44 = vsel %vm211_vm10, %v7159_v28, %v7189_v21  ;;  %v3047_v25 = vsel %vm211_vm10, %v7189_v21, %v7158_v38  ;;  %v3094_v59 = vsel %vm224_vm11, %v7169_v45, %v7199_v57  ;;  %v3095_v41 = vsel %vm224_vm11, %v7199_v57, %v7168_v16 }
 0x6e9   :  { %v9042_v49 = vpop.permute.xlu0 %7191  ;;  %v9055_v53 = vpop.permute.xlu1 %7201  ;;  %v3062_v52 = vsel %vm774_vm2, %v3046_v44, -1e+30  ;;  %v3063_v40 = vsel %vm775_vm3, %v3047_v25, -1e+30  ;;  %v7183_v13 = vunpack.i.l.bf16 %v9011_v63  ;;  %v7178_v1 = vunpack.i.l.bf16 %v9013_v43 }
 0x6ea   :  { %v7194_v3 = vunpack.i.h.bf16 %v9042_v49  ;;  %v7204_v50 = vunpack.i.h.bf16 %v9055_v53  ;;  %v7188_v42 = vunpack.i.l.bf16 %v9017_v62  ;;  %v3270_v18 = vmax.f32 %v3262_v27, %v3062_v52 }
 0x6eb   :  { %v3271_v39 = vmax.f32 %v3263_v34, %v3063_v40  ;;  %v7198_v21 = vunpack.i.l.bf16 %v9019_v23  ;;  %v9110_v28 = vsel %vm796_vm5, %v3094_v59, -1e+30  ;;  %v9114_v38 = vsel %vm797_vm7, %v3095_v41, -1e+30 }
 0x6ec   :  { %v3302_v30 = vsel %vm515_vm15, %v7164_v61, %v7194_v3  ;;  %v3303_v63 = vsel %vm515_vm15, %v7194_v3, %v7163_v31  ;;  %v7193_v11 = vunpack.i.l.bf16 %v9042_v49  ;;  %v7203_v62 = vunpack.i.l.bf16 %v9055_v53 }
 0x6ed   :  { %v9078_v19 = vpop.permute.xlu0 %7211  ;;  %v3142_v2 = vsel %vm9522_vm4, %v7174_v37, %v7204_v50  ;;  %v3143_v10 = vsel %vm9523_vm1, %v7204_v50, %v7173_v29  ;;  %v9122_v57 = vmax.f32 %v3270_v18, %v3302_v30  ;;  %v9124_v45 = vmax.f32 %v3271_v39, %v3303_v63 }
 0x6ee   :  { %v3158_v40 = vsel %vm774_vm2, %v3142_v2, -1e+30  ;;  %v3159_v3 = vsel %vm775_vm3, %v3143_v10, -1e+30  ;;  %v7214_v41 = vunpack.i.h.bf16 %v9078_v19  ;;  %v7213_v29 = vunpack.i.l.bf16 %v9078_v19 }
 0x6ef   :  { %v9100_v17 = vpop.permute.xlu1 %7206  ;;  %v3326_v63 = vmax.f32 %v9122_v57, %v9110_v28 }
 0x6f2   :  { %v7222_v43 = vpop.permute.xlu0 %7221 }
 0x6f3   :  { %v7224_v35 = vunpack.i.h.bf16 %v7222_v43  ;;  %v7223_v58 = vunpack.i.l.bf16 %v7222_v43  ;;  %v7217_v23 = vpop.permute.xlu1 %7216  ;;  %v3327_v43 = vmax.f32 %v9124_v45, %v9114_v38  ;;  %v7209_v38 = vunpack.i.h.bf16 %v9100_v17 }
 0x6f4   :  { %v7219_v44 = vunpack.i.h.bf16 %v7217_v23  ;;  %v7218_v25 = vunpack.i.l.bf16 %v7217_v23 }
 0x6f5   :  { %v3002_v16 = vsel %vm198_vm9, %v7183_v13, %v7223_v58  ;;  %v3003_v27 = vsel %vm198_vm9, %v7223_v58, %v7224_v35  ;;  %vm9524_vm9 = vmmov %vm9523_vm1 }
 0x6f6   :  { %v3018_v49 = vsel %vm796_vm5, %v3002_v16, -1e+30  ;;  %v3019_v53 = vsel %vm797_vm7, %v3003_v27, -1e+30  ;;  %v3242_v34 = vsel %vm374_vm14, %v7178_v1, %v7218_v25  ;;  %v3243_v61 = vsel %vm374_vm14, %v7218_v25, %v7219_v44  ;;  %v7232_v52 = vpop.permute.xlu0 %7231  ;;  %vm9527_vm14 = vmmov %vm9519_vm0 }
 0x6f7   :  { %v3258_v31 = vmax.f32 %v9047_v6, %v3242_v34  ;;  %v3259_v37 = vmax.f32 %v9069_v5, %v3243_v61  ;;  %v7227_v59 = vpop.permute.xlu1 %7226  ;;  %v7234_v39 = vunpack.i.h.bf16 %v7232_v52  ;;  %v7233_v30 = vunpack.i.l.bf16 %v7232_v52 }
 0x6f8   :  { %v7229_v13 = vunpack.i.h.bf16 %v7227_v59  ;;  %v7228_v1 = vunpack.i.l.bf16 %v7227_v59 }
 0x6f9   :  { %v3266_v50 = vmax.f32 %v3258_v31, %v3018_v49  ;;  %v3267_v18 = vmax.f32 %v3259_v37, %v3019_v53  ;;  %v3306_v45 = vsel %vm515_vm15, %v7193_v11, %v7233_v30  ;;  %v3307_v27 = vsel %vm515_vm15, %v7233_v30, %v7234_v39  ;;  %vm9528_vm15 = vmmov %vm9519_vm0 }
 0x6fa   :  { %v3050_v6 = vsel %vm211_vm10, %v7188_v42, %v7228_v1  ;;  %v3051_v5 = vsel %vm211_vm10, %v7228_v1, %v7229_v13  ;;  %v7242_v35 = vpop.permute.xlu0 %7241  ;;  %v7208_v42 = vunpack.i.l.bf16 %v9100_v17  ;;  %vm9525_vm10 = vmmov %vm9523_vm1 }
 0x6fb   :  { %v3066_v58 = vsel %vm774_vm2, %v3050_v6, -1e+30  ;;  %v3067_v23 = vsel %vm775_vm3, %v3051_v5, -1e+30  ;;  %v7244_v2 = vunpack.i.h.bf16 %v7242_v35  ;;  %v7243_v10 = vunpack.i.l.bf16 %v7242_v35  ;;  %v7237_v44 = vpop.permute.xlu1 %7236 }
 0x6fc   :  { %v3274_v25 = vmax.f32 %v3266_v50, %v3066_v58  ;;  %v3275_v16 = vmax.f32 %v3267_v18, %v3067_v23  ;;  %v7239_v28 = vunpack.i.h.bf16 %v7237_v44  ;;  %v7238_v57 = vunpack.i.l.bf16 %v7237_v44 }
 0x6fd   :  { %v3146_v49 = vsel %vm9524_vm9, %v7203_v62, %v7243_v10  ;;  %v3147_v53 = vsel %vm9525_vm10, %v7243_v10, %v7244_v2  ;;  %v3334_v2 = vmax.f32 %v3326_v63, %v3158_v40  ;;  %v3335_v10 = vmax.f32 %v3327_v43, %v3159_v3  ;;  %v9180_v3 = vld [vmem:[#allocation8 + $0xba0] sm:$0xff]  ;;  %v9182_v63 = vld [vmem:[#allocation8 + $0xba8] sm:$0xff] }
 0x6fe   :  { %v3098_v34 = vsel %vm224_vm11, %v7198_v21, %v7238_v57  ;;  %v3099_v61 = vsel %vm224_vm11, %v7238_v57, %v7239_v28  ;;  %v7257_v52 = vpop.permute.xlu0 %7256  ;;  %v3322_v17 = vmax.f32 %v3274_v25, %v3306_v45  ;;  %v3323_v59 = vmax.f32 %v3275_v16, %v3307_v27  ;;  %vm9526_vm11 = vmmov %vm9519_vm0  ;;  %v9172_v45 = vld [vmem:[#allocation8 + $0xaa0] sm:$0xff]  ;;  %v9174_v27 = vld [vmem:[#allocation8 + $0xaa8] sm:$0xff] }
 0x6ff   :  { %v3114_v31 = vsel %vm796_vm5, %v3098_v34, -1e+30  ;;  %v3115_v37 = vsel %vm797_vm7, %v3099_v61, -1e+30  ;;  %v7247_v11 = vpop.permute.xlu1 %7246  ;;  %v7259_v13 = vunpack.i.h.bf16 %v7257_v52  ;;  %v7258_v1 = vunpack.i.l.bf16 %v7257_v52 }
 0x700   :  { %v7249_v50 = vunpack.i.h.bf16 %v7247_v11  ;;  %v7248_v62 = vunpack.i.l.bf16 %v7247_v11  ;;  %v3162_v18 = vsel %vm774_vm2, %v3146_v49, -1e+30  ;;  %v3163_v21 = vsel %vm775_vm3, %v3147_v53, -1e+30  ;;  %vm9529_vm2 = vmmov %vm9519_vm0 }
 0x701   :  { %v3330_v39 = vmax.f32 %v3322_v17, %v3114_v31  ;;  %v3331_v30 = vmax.f32 %v3323_v59, %v3115_v37  ;;  %v3194_v6 = vsel %vm250_vm13, %v7213_v29, %v7258_v1  ;;  %v3195_v5 = vsel %vm250_vm13, %v7258_v1, %v7259_v13 }
 0x702   :  { %v3370_v35 = vsel %vm9526_vm11, %v7208_v42, %v7248_v62  ;;  %v3371_v58 = vsel %vm9527_vm14, %v7248_v62, %v7249_v50  ;;  %v7262_v23 = vpop.permute.xlu0 %7261  ;;  %v3210_v29 = vsel %vm796_vm5, %v3194_v6, -1e+30  ;;  %v3211_v42 = vsel %vm797_vm7, %v3195_v5, -1e+30 }
 0x703   :  { %v3338_v44 = vmax.f32 %v3330_v39, %v3162_v18  ;;  %v3339_v25 = vmax.f32 %v3331_v30, %v3163_v21  ;;  %v7252_v7 = vpop.permute.xlu1 %7251  ;;  %v7264_v16 = vunpack.i.h.bf16 %v7262_v23  ;;  %v7263_v28 = vunpack.i.l.bf16 %v7262_v23 }
 0x704   :  { %v7254_v20 = vunpack.i.h.bf16 %v7252_v7  ;;  %v7253_v57 = vunpack.i.l.bf16 %v7252_v7  ;;  %v6666_v19 = vpack.c.bf16 %v9174_v27, %v9172_v45  ;;  %v4643_v27 = vld [vmem:[#allocation8 + $0xb30] sm:$0xff]  ;;  %vm5306_vm3 = vcmask 523264  }
 0x705   :  { %v3386_v49 = vmax.f32 %v3338_v44, %v3370_v35  ;;  %v3387_v40 = vmax.f32 %v3339_v25, %v3371_v58  ;;  %v3190_v43 = vsel %vm250_vm13, %v7264_v16, %v7214_v41  ;;  %v3191_v53 = vsel %vm250_vm13, %v7214_v41, %v7263_v28 }
 0x706   :  { %v3366_v34 = vsel %vm9528_vm15, %v7254_v20, %v7209_v38  ;;  %v3367_v61 = vsel %vm9529_vm2, %v7209_v38, %v7253_v57  ;;  %v3206_v37 = vsel %vm796_vm5, %v3190_v43, -1e+30  ;;  %v3207_v17 = vsel %vm797_vm7, %v3191_v53, -1e+30  ;;  %v4530_v43 = vld [vmem:[#allocation8 + $0xa28] sm:$0xff] }
 0x707   :  { %v9192_v52 = vmax.f32 %v3386_v49, %v3210_v29  ;;  %v9194_v31 = vmax.f32 %v3387_v40, %v3211_v42  ;;  %v3382_v59 = vmax.f32 %v3334_v2, %v3366_v34  ;;  %v3383_v11 = vmax.f32 %v3335_v10, %v3367_v61  ;;  %v4529_v40 = vld [vmem:[#allocation8 + $0xa20] sm:$0xff]  ;;  %v4547_v34 = vld [vmem:[#allocation8 + $0xab0] sm:$0xff]  ;;  %v4548_v61 = vld [vmem:[#allocation8 + $0xab8] sm:$0xff] }
 0x708   :  { %v6698_v41 = vpack.c.bf16 %v9182_v63, %v9180_v3  ;;  %v4646_v3 = vld [vmem:[#allocation8 + $0xb48] sm:$0xff]  ;;  %vm7472_vm13 = vmmov 0   ;;  %vm5498_vm5 = vcmask 1041408   ;;  %vm5482_vm7 = vcmask 517120  }
 0x709   :  { %v4339_v38 = vrot.slane %v9194_v31, 7  ;;  %v4337_v13 = vrot.slane %v9192_v52, 7  ;;  %v4561_v1 = vrot.slane %v9194_v31, 1  ;;  %v4673_v26 = vrot.slane %v9194_v31, 2 }
 0x70a   :  { %v9208_v50 = vmax.f32 %v3382_v59, %v3206_v37  ;;  %v9210_v47 = vmax.f32 %v3383_v11, %v3207_v17  ;;  %v4558_v62 = vrot.slane %v9192_v52, 1  ;;  %v4785_v18 = vrot.slane %v9194_v31, 3 }
 0x70b   :  { %v4670_v21 = vrot.slane %v9192_v52, 2  ;;  %v4897_v39 = vrot.slane %v9194_v31, 4  ;;  %v4782_v30 = vrot.slane %v9192_v52, 3  ;;  %v5009_v6 = vrot.slane %v9194_v31, 5 }
 0x70c   :  { %v4340_v5 = vsel %vm3441_vm6, %v4339_v38, %v9210_v47  ;;  %v4338_v35 = vsel %vm3441_vm6, %v4337_v13, %v9208_v50  ;;  %v4449_v58 = vrot.slane %v9210_v47, 1  ;;  %v4560_v23 = vrot.slane %v9210_v47, 2  ;;  %v4659_v13 = vld [vmem:[#allocation8 + $0xbb0] sm:$0xff] }
 0x70d   :  { %4407 = vmatprep.mubr.f32.mxu0 %v4340_v5  ;;  %v4447_v2 = vrot.slane %v9208_v50, 1  ;;  %v4672_v10 = vrot.slane %v9210_v47, 3  ;;  %v4557_v44 = vrot.slane %v9208_v50, 2  ;;  %v4784_v25 = vrot.slane %v9210_v47, 4  ;;  %v4552_v5 = vld [vmem:[#allocation8 + $0xad8] sm:$0xff] }
 0x70e   :  { %4408 = vmatmul.mubr.f32.vlgmr.msra.gmra.mrb[16].mxu0 %v4338_v35  ;;  %v4450_v7 = vsel %vm3441_vm6, %v9194_v31, %v4449_v58  ;;  %v4562_v16 = vsel %vm3441_vm6, %v4561_v1, %v4560_v23  ;;  %v4669_v28 = vrot.slane %v9208_v50, 3  ;;  %v4896_v20 = vrot.slane %v9210_v47, 5  ;;  %v4660_v1 = vld [vmem:[#allocation8 + $0xbb8] sm:$0xff]  ;;  %v4645_v58 = vld [vmem:[#allocation8 + $0xb40] sm:$0xff] }
 0x70f   :  { %6661 = vmatpush3.bf16.msra.mxu0 %v6660_v56  ;;  %4517 = vmatprep.mubr.f32.mxu1 %v4450_v7  ;;  %v4448_v57 = vsel %vm3441_vm6, %v9192_v52, %v4447_v2  ;;  %v4674_v29 = vsel %vm3441_vm6, %v4673_v26, %v4672_v10  ;;  %v9240_v42 = vsel %vm3441_vm6, %v4558_v62, %v4557_v44  ;;  %v4781_v49 = vrot.slane %v9208_v50, 4  ;;  %v4531_v26 = vld [vmem:[#allocation8 + $0xa30] sm:$0xff]  ;;  %v4664_v23 = vld [vmem:[#allocation8 + $0xbd8] sm:$0xff]  ;;  %v4553_v7 = vld [vmem:[#allocation8 + $0xae0] sm:$0xff] }
 0x710   :  { %4629 = vmatprep.mubr.f32.mxu0 %v4562_v16  ;;  %4518 = vmatmul.mubr.f32.vlgmr.msra.gmra.mrb[12].mxu1 %v4448_v57  ;;  %v9244_v53 = vsel %vm3441_vm6, %v4785_v18, %v4784_v25  ;;  %v9247_v51 = vsel %vm3441_vm6, %v4670_v21, %v4669_v28  ;;  %v9250_v4 = vsel %vm3441_vm6, %v4897_v39, %v4896_v20  ;;  %v5008_v56 = vrot.slane %v9210_v47, 6  ;;  %v4661_v21 = vld [vmem:[#allocation8 + $0xbc0] sm:$0xff]  ;;  %v4662_v39 = vld [vmem:[#allocation8 + $0xbc8] sm:$0xff]  ;;  %v4535_v10 = vld [vmem:[#allocation8 + $0xa50] sm:$0xff] }
 0x711   :  { %6693 = vmatpush3.bf16.msra.mxu1 %v6692_v48  ;;  %6663 = vmatprep.subr.bf16.mxu0 %v6662_v24  ;;  %v9260_v37 = vsel %vm3441_vm6, %v4782_v30, %v4781_v49  ;;  %v4893_v17 = vrot.slane %v9208_v50, 5  ;;  %v4894_v59 = vrot.slane %v9192_v52, 4  ;;  %v5120_v11 = vrot.slane %v9210_v47, 7  ;;  %v4532_v47 = vld [vmem:[#allocation8 + $0xa38] sm:$0xff]  ;;  %v4554_v16 = vld [vmem:[#allocation8 + $0xae8] sm:$0xff]  ;;  %v4647_v20 = vld [vmem:[#allocation8 + $0xb50] sm:$0xff] }
 0x712   :  { %4741 = vmatprep.mubr.f32.mxu1 %v4674_v29  ;;  %6695 = vmatprep.subr.bf16.mxu1 %v6694_v0  ;;  %v9269_v15 = vsel %vm3441_vm6, %v5009_v6, %v5008_v56  ;;  %v5121_v9 = vrot.slane %v9194_v31, 6  ;;  %v5005_v48 = vrot.slane %v9208_v50, 6  ;;  %v5006_v24 = vrot.slane %v9192_v52, 5  ;;  %v4551_v6 = vld [vmem:[#allocation8 + $0xad0] sm:$0xff]  ;;  %v4536_v44 = vld [vmem:[#allocation8 + $0xa58] sm:$0xff]  ;;  %v4665_v49 = vld [vmem:[#allocation8 + $0xbe0] sm:$0xff] }
 0x713   :  { %6665 = vmatpush3.bf16.msra.mxu0 %v6664_v36  ;;  %v6668_v38 = vpack.c.bf16 %v4530_v43, %v4529_v40  ;;  %v9278_v54 = vsel %vm3441_vm6, %v4894_v59, %v4893_v17  ;;  %v5117_v22 = vrot.slane %v9208_v50, 7  ;;  %v5118_v0 = vrot.slane %v9192_v52, 6  ;;  %v4549_v50 = vld [vmem:[#allocation8 + $0xac0] sm:$0xff]  ;;  %v4550_v52 = vld [vmem:[#allocation8 + $0xac8] sm:$0xff]  ;;  %v4648_v57 = vld [vmem:[#allocation8 + $0xb58] sm:$0xff] }
 0x714   :  { %6667 = vmatprep.subr.bf16.mxu0 %v6666_v19  ;;  %v6670_v31 = vpack.c.bf16 %v4548_v61, %v4547_v34  ;;  %v9286_v33 = vsel %vm3441_vm6, %v5121_v9, %v5120_v11  ;;  %v9289_v60 = vsel %vm3441_vm6, %v5006_v24, %v5005_v48  ;;  %v6700_v36 = vpack.c.bf16 %v4642_v32, %v4641_v14  ;;  %v4644_v19 = vld [vmem:[#allocation8 + $0xb38] sm:$0xff]  ;;  %v4666_v40 = vld [vmem:[#allocation8 + $0xbe8] sm:$0xff]  ;;  %v4537_v56 = vld [vmem:[#allocation8 + $0xa60] sm:$0xff] }
 0x715   :  { %6697 = vmatpush3.bf16.msra.mxu1 %v6696_v55  ;;  %v9295_v62 = vsel %vm3441_vm6, %v5118_v0, %v5117_v22  ;;  %v6702_v45 = vpack.c.bf16 %v4660_v1, %v4659_v13  ;;  %v6672_v18 = vpack.c.bf16 %v4532_v47, %v4531_v26  ;;  %v6674_v12 = vpack.c.bf16 %v4550_v52, %v4549_v50  ;;  %v4534_v55 = vld [vmem:[#allocation8 + $0xa48] sm:$0xff]  ;;  %v4555_v17 = vld [vmem:[#allocation8 + $0xaf0] sm:$0xff]  ;;  %v4556_v59 = vld [vmem:[#allocation8 + $0xaf8] sm:$0xff] }
 0x716   :  { %6699 = vmatprep.subr.bf16.mxu1 %v6698_v41  ;;  %v6704_v30 = vpack.c.bf16 %v4644_v19, %v4643_v27  ;;  %v6706_v35 = vpack.c.bf16 %v4662_v39, %v4661_v21  ;;  %v6676_v63 = vpack.c.bf16 %v4534_v55, %v4533_v46  ;;  %v4663_v41 = vld [vmem:[#allocation8 + $0xbd0] sm:$0xff]  ;;  %v6678_v2 = vpack.c.bf16 %v4552_v5, %v4551_v6  ;;  %v4538_v34 = vld [vmem:[#allocation8 + $0xa68] sm:$0xff]  ;;  %v4649_v14 = vld [vmem:[#allocation8 + $0xb60] sm:$0xff] }
 0x717   :  { %6669 = vmatpush3.bf16.msra.mxu0 %v6668_v38  ;;  %v6708_v25 = vpack.c.bf16 %v4646_v3, %v4645_v58  ;;  %v6710_v28 = vpack.c.bf16 %v4664_v23, %v4663_v41  ;;  %v6680_v29 = vpack.c.bf16 %v4536_v44, %v4535_v10  ;;  %v6682_v43 = vpack.c.bf16 %v4554_v16, %v4553_v7  ;;  %v4650_v32 = vld [vmem:[#allocation8 + $0xb68] sm:$0xff]  ;;  %v4667_v48 = vld [vmem:[#allocation8 + $0xbf0] sm:$0xff]  ;;  %v4668_v24 = vld [vmem:[#allocation8 + $0xbf8] sm:$0xff] }
 0x718   :  { %6671 = vmatprep.subr.bf16.mxu0 %v6670_v31  ;;  %v6712_v61 = vpack.c.bf16 %v4648_v57, %v4647_v20  ;;  %v6714_v11 = vpack.c.bf16 %v4666_v40, %v4665_v49  ;;  %v6684_v9 = vpack.c.bf16 %v4538_v34, %v4537_v56  ;;  %v6686_v38 = vpack.c.bf16 %v4556_v59, %v4555_v17  ;;  %v4539_v13 = vld [vmem:[#allocation8 + $0xa70] sm:$0xff]  ;;  %v4540_v1 = vld [vmem:[#allocation8 + $0xa78] sm:$0xff]  ;;  %v4765_v0 = vld [vmem:[#allocation8 + $0xc80] sm:$0xff] }
 0x719   :  { %6701 = vmatpush3.bf16.msra.mxu1 %v6700_v36  ;;  %v6716_v22 = vpack.c.bf16 %v4650_v32, %v4649_v14  ;;  %v4766_v31 = vld [vmem:[#allocation8 + $0xc88] sm:$0xff]  ;;  %v6718_v26 = vpack.c.bf16 %v4668_v24, %v4667_v48  ;;  %v4651_v47 = vld [vmem:[#allocation8 + $0xb70] sm:$0xff]  ;;  %v4652_v36 = vld [vmem:[#allocation8 + $0xb78] sm:$0xff]  ;;  %v6688_v50 = vpack.c.bf16 %v4540_v1, %v4539_v13 }
 0x71a   :  { %6703 = vmatprep.subr.bf16.mxu1 %v6702_v45  ;;  %v4877_v52 = vld [vmem:[#allocation8 + $0xd80] sm:$0xff]  ;;  %v4878_v45 = vld [vmem:[#allocation8 + $0xd88] sm:$0xff]  ;;  %v6722_v27 = vpack.c.bf16 %v4766_v31, %v4765_v0  ;;  %v6720_v21 = vpack.c.bf16 %v4652_v36, %v4651_v47  ;;  %v4767_v39 = vld [vmem:[#allocation8 + $0xc90] sm:$0xff] }
 0x71b   :  { %6673 = vmatpush3.bf16.msra.mxu0 %v6672_v18  ;;  %v4749_v19 = vld [vmem:[#allocation8 + $0xc00] sm:$0xff]  ;;  %v4750_v18 = vld [vmem:[#allocation8 + $0xc08] sm:$0xff]  ;;  %v6754_v46 = vpack.c.bf16 %v4878_v45, %v4877_v52  ;;  %v4879_v5 = vld [vmem:[#allocation8 + $0xd90] sm:$0xff] }
 0x71c   :  { %6675 = vmatprep.subr.bf16.mxu0 %v6674_v12  ;;  %v4768_v12 = vld [vmem:[#allocation8 + $0xc98] sm:$0xff]  ;;  %v4861_v55 = vld [vmem:[#allocation8 + $0xd00] sm:$0xff]  ;;  %v6724_v6 = vpack.c.bf16 %v4750_v18, %v4749_v19  ;;  %v4751_v3 = vld [vmem:[#allocation8 + $0xc10] sm:$0xff] }
 0x71d   :  { %6705 = vmatpush3.bf16.msra.mxu1 %v6704_v30  ;;  %v4862_v30 = vld [vmem:[#allocation8 + $0xd08] sm:$0xff]  ;;  %v6726_v58 = vpack.c.bf16 %v4768_v12, %v4767_v39  ;;  %v4769_v23 = vld [vmem:[#allocation8 + $0xca0] sm:$0xff]  ;;  %v4864_v7 = vld [vmem:[#allocation8 + $0xd18] sm:$0xff] }
 0x71e   :  { %6707 = vmatprep.subr.bf16.mxu1 %v6706_v35  ;;  %v4880_v35 = vld [vmem:[#allocation8 + $0xd98] sm:$0xff]  ;;  %v6756_v41 = vpack.c.bf16 %v4862_v30, %v4861_v55  ;;  %v5639_v16 = vld [vmem:[#allocation10] ss:$0 sm:$0xff]  ;;  %v4754_v56 = vld [vmem:[#allocation8 + $0xc28] sm:$0xff] }
 0x71f   :  { %6677 = vmatpush3.bf16.msra.mxu0 %v6676_v63  ;;  %v4752_v63 = vld [vmem:[#allocation8 + $0xc18] sm:$0xff]  ;;  %v6758_v44 = vpack.c.bf16 %v4880_v35, %v4879_v5  ;;  %v4881_v57 = vld [vmem:[#allocation8 + $0xda0] sm:$0xff]  ;;  %v4771_v17 = vld [vmem:[#allocation8 + $0xcb0] sm:$0xff] }
 0x720   :  { %6679 = vmatprep.subr.bf16.mxu0 %v6678_v2  ;;  %v4770_v2 = vld [vmem:[#allocation8 + $0xca8] sm:$0xff]  ;;  %v6728_v20 = vpack.c.bf16 %v4752_v63, %v4751_v3  ;;  %v4865_v32 = vld [vmem:[#allocation8 + $0xd20] sm:$0xff]  ;;  %v4883_v48 = vld [vmem:[#allocation8 + $0xdb0] sm:$0xff] }
 0x721   :  { %6709 = vmatpush3.bf16.msra.mxu1 %v6708_v25  ;;  %v4863_v25 = vld [vmem:[#allocation8 + $0xd10] sm:$0xff]  ;;  %v4884_v24 = vld [vmem:[#allocation8 + $0xdb8] sm:$0xff]  ;;  %v4773_v0 = vld [vmem:[#allocation8 + $0xcc0] sm:$0xff] }
 0x722   :  { %6711 = vmatprep.subr.bf16.mxu1 %v6710_v28  ;;  %v4755_v1 = vld [vmem:[#allocation8 + $0xc30] sm:$0xff]  ;;  %v4774_v31 = vld [vmem:[#allocation8 + $0xcc8] sm:$0xff]  ;;  %v4868_v36 = vld [vmem:[#allocation8 + $0xd38] sm:$0xff] }
 0x723   :  { %6681 = vmatpush3.bf16.msra.mxu0 %v6680_v29  ;;  %v4882_v29 = vld [vmem:[#allocation8 + $0xda8] sm:$0xff]  ;;  %v4867_v47 = vld [vmem:[#allocation8 + $0xd30] sm:$0xff]  ;;  %v4885_v52 = vld [vmem:[#allocation8 + $0xdc0] sm:$0xff] }
 0x724   :  { %6683 = vmatprep.subr.bf16.mxu0 %v6682_v43  ;;  %v6730_v43 = vpack.c.bf16 %v4770_v2, %v4769_v23  ;;  %v6762_v14 = vpack.c.bf16 %v4882_v29, %v4881_v57  ;;  %v4886_v45 = vld [vmem:[#allocation8 + $0xdc8] sm:$0xff]  ;;  %v4757_v19 = vld [vmem:[#allocation8 + $0xc40] sm:$0xff]  ;;  %v4775_v39 = vld [vmem:[#allocation8 + $0xcd0] sm:$0xff] }
 0x725   :  { %6713 = vmatpush3.bf16.msra.mxu1 %v6712_v61  ;;  %v6760_v61 = vpack.c.bf16 %v4864_v7, %v4863_v25  ;;  %v4758_v18 = vld [vmem:[#allocation8 + $0xc48] sm:$0xff]  ;;  %v4776_v12 = vld [vmem:[#allocation8 + $0xcd8] sm:$0xff]  ;;  %v4869_v55 = vld [vmem:[#allocation8 + $0xd40] sm:$0xff] }
 0x726   :  { %6715 = vmatprep.subr.bf16.mxu1 %v6714_v11  ;;  %v4870_v30 = vld [vmem:[#allocation8 + $0xd48] sm:$0xff]  ;;  %v4887_v5 = vld [vmem:[#allocation8 + $0xdd0] sm:$0xff]  ;;  %v4888_v35 = vld [vmem:[#allocation8 + $0xdd8] sm:$0xff] }
 0x727   :  { %6685 = vmatpush3.bf16.msra.mxu0 %v6684_v9  ;;  %v4866_v9 = vld [vmem:[#allocation8 + $0xd28] sm:$0xff]  ;;  %v4759_v3 = vld [vmem:[#allocation8 + $0xc50] sm:$0xff]  ;;  %v4760_v63 = vld [vmem:[#allocation8 + $0xc58] sm:$0xff] }
 0x728   :  { %6687 = vmatprep.subr.bf16.mxu0 %v6686_v38  ;;  %v4777_v23 = vld [vmem:[#allocation8 + $0xce0] sm:$0xff]  ;;  %v4778_v2 = vld [vmem:[#allocation8 + $0xce8] sm:$0xff]  ;;  %v4872_v25 = vld [vmem:[#allocation8 + $0xd58] sm:$0xff]  ;;  %v6744_v7 = vpack.c.bf16 %v4760_v63, %v4759_v3 }
 0x729   :  { %6717 = vmatpush3.bf16.msra.mxu1 %v6716_v22  ;;  %v6764_v22 = vpack.c.bf16 %v4866_v9, %v4865_v32  ;;  %v4761_v57 = vld [vmem:[#allocation8 + $0xc60] sm:$0xff]  ;;  %v4762_v29 = vld [vmem:[#allocation8 + $0xc68] sm:$0xff]  ;;  %v5088_v3 = vld [vmem:[#allocation8 + $0xf18] sm:$0xff] }
 0x72a   :  { %6719 = vmatprep.subr.bf16.mxu1 %v6718_v26  ;;  %v6766_v26 = vpack.c.bf16 %v4884_v24, %v4883_v48  ;;  %v4989_v9 = vld [vmem:[#allocation8 + $0xe80] sm:$0xff]  ;;  %v4875_v24 = vld [vmem:[#allocation8 + $0xd70] sm:$0xff] }
 0x72b   :  { %6689 = vmatpush3.bf16.msra.mxu0 %v6688_v50 }
 0x72c   :  { %6723 = vmatprep.subr.bf16.mxu0 %v6722_v27  ;;  %v6738_v27 = vpack.c.bf16 %v4774_v31, %v4773_v0  ;;  %v4973_v31 = vld [vmem:[#allocation8 + $0xe00] sm:$0xff] }
 0x72d   :  { %6721 = vmatpush3.bf16.msra.mxu1 %v6720_v21  ;;  %v5678_v10 = vpop.f32.mrb[8].mxu0  ;;  %v6768_v21 = vpack.c.bf16 %v4868_v36, %v4867_v47  ;;  %v4991_v36 = vld [vmem:[#allocation8 + $0xe90] sm:$0xff] }
 0x72e   :  { %4630 = vmatmul.mubr.f32.vlgmr.msra.gmra.mrb[18].mxu0 %v9240_v42  ;;  %6755 = vmatprep.subr.bf16.mxu1 %v6754_v46  ;;  %v5679_v28 = vpop.f32.mrb[9].mxu0  ;;  %v4753_v42 = vld [vmem:[#allocation8 + $0xc20] sm:$0xff]  ;;  %v6770_v46 = vpack.c.bf16 %v4886_v45, %v4885_v52 }
 0x72f   :  { %6725 = vmatpush3.bf16.msra.mxu0 %v6724_v6  ;;  %4853 = vmatprep.mubr.f32.mxu0 %v9244_v53  ;;  %v5680_v49 = vadd.f32 %v5679_v28, %v5678_v10  ;;  %v5713_v40 = vpop.f32.mrb[4].mxu1  ;;  %v4772_v53 = vld [vmem:[#allocation8 + $0xcb8] sm:$0xff]  ;;  %v6740_v6 = vpack.c.bf16 %v4758_v18, %v4757_v19  ;;  %v6774_v10 = vpack.c.bf16 %v4888_v35, %v4887_v5  ;;  %v4890_v28 = vld [vmem:[#allocation8 + $0xde8] sm:$0xff]  ;;  %v5085_v45 = vld [vmem:[#allocation8 + $0xf00] sm:$0xff] }
 0x730   :  { %4742 = vmatmul.mubr.f32.vlgmr.msra.gmra.mrb[14].mxu1 %v9247_v51  ;;  %6727 = vmatprep.subr.bf16.mxu0 %v6726_v58  ;;  %v5714_v34 = vpop.f32.mrb[5].mxu1  ;;  %v6732_v51 = vpack.c.bf16 %v4754_v56, %v4753_v42  ;;  %v6734_v13 = vpack.c.bf16 %v4772_v53, %v4771_v17  ;;  %v6742_v58 = vpack.c.bf16 %v4776_v12, %v4775_v39  ;;  %v4873_v56 = vld [vmem:[#allocation8 + $0xd60] sm:$0xff]  ;;  %v4891_v17 = vld [vmem:[#allocation8 + $0xdf0] sm:$0xff]  ;;  %v4892_v53 = vld [vmem:[#allocation8 + $0xdf8] sm:$0xff] }
 0x731   :  { %6757 = vmatpush3.bf16.msra.mxu1 %v6756_v41  ;;  %4965 = vmatprep.mubr.f32.mxu1 %v9250_v4  ;;  %v3517_v59 = vadd.f32 %v5680_v49, %v5639_v16  ;;  %v5715_v11 = vadd.f32 %v5714_v34, %v5713_v40  ;;  %v4756_v4 = vld [vmem:[#allocation8 + $0xc38] sm:$0xff]  ;;  %v6772_v41 = vpack.c.bf16 %v4870_v30, %v4869_v55  ;;  %v4889_v16 = vld [vmem:[#allocation8 + $0xde0] sm:$0xff]  ;;  %v4779_v40 = vld [vmem:[#allocation8 + $0xcf0] sm:$0xff] }
 0x732   :  { %6759 = vmatprep.subr.bf16.mxu1 %v6758_v44  ;;  %v6736_v50 = vpack.c.bf16 %v4756_v4, %v4755_v1  ;;  %v4871_v44 = vld [vmem:[#allocation8 + $0xd50] sm:$0xff]  ;;  %v6778_v42 = vpack.c.bf16 %v4890_v28, %v4889_v16  ;;  %v4874_v34 = vld [vmem:[#allocation8 + $0xd68] sm:$0xff]  ;;  %v6782_v48 = vpack.c.bf16 %v4892_v53, %v4891_v17  ;;  %v5101_v4 = vld [vmem:[#allocation8 + $0xf80] sm:$0xff] }
 0x733   :  { %6729 = vmatpush3.bf16.msra.mxu0 %v6728_v20  ;;  %v9304_v38 = vadd.f32 %v5715_v11, %v3517_v59  ;;  %v6746_v20 = vpack.c.bf16 %v4778_v2, %v4777_v23  ;;  %v6776_v49 = vpack.c.bf16 %v4872_v25, %v4871_v44  ;;  %v4763_v11 = vld [vmem:[#allocation8 + $0xc70] sm:$0xff]  ;;  %v6780_v32 = vpack.c.bf16 %v4874_v34, %v4873_v56  ;;  %v4993_v30 = vld [vmem:[#allocation8 + $0xea0] sm:$0xff]  ;;  %v5106_v2 = vld [vmem:[#allocation8 + $0xfa8] sm:$0xff] }
 0x734   :  { %6731 = vmatprep.subr.bf16.mxu0 %v6730_v43  ;;  %v4780_v43 = vld [vmem:[#allocation8 + $0xcf8] sm:$0xff]  ;;  %v5103_v18 = vld [vmem:[#allocation8 + $0xf90] sm:$0xff]  ;;  %v5105_v23 = vld [vmem:[#allocation8 + $0xfa0] sm:$0xff] }
 0x735   :  { %6761 = vmatpush3.bf16.msra.mxu1 %v6760_v61  ;;  %v6748_v61 = vpack.c.bf16 %v4762_v29, %v4761_v57  ;;  %v6750_v59 = vpack.c.bf16 %v4780_v43, %v4779_v40  ;;  %v4975_v12 = vld [vmem:[#allocation8 + $0xe10] sm:$0xff]  ;;  %v4996_v57 = vld [vmem:[#allocation8 + $0xeb8] sm:$0xff]  ;;  %v5089_v40 = vld [vmem:[#allocation8 + $0xf20] sm:$0xff] }
 0x736   :  { %6763 = vmatprep.subr.bf16.mxu1 %v6762_v14  ;;  %v4764_v14 = vld [vmem:[#allocation8 + $0xc78] sm:$0xff] }
 0x737   :  { %6733 = vmatpush3.bf16.msra.mxu0 %v6732_v51  ;;  %v4990_v51 = vld [vmem:[#allocation8 + $0xe88] sm:$0xff]  ;;  %v6752_v1 = vpack.c.bf16 %v4764_v14, %v4763_v11  ;;  %v5108_v56 = vld [vmem:[#allocation8 + $0xfb8] sm:$0xff]  ;;  %v5091_v14 = vld [vmem:[#allocation8 + $0xf30] sm:$0xff] }
 0x738   :  { %6735 = vmatprep.subr.bf16.mxu0 %v6734_v13  ;;  %v4876_v13 = vld [vmem:[#allocation8 + $0xd78] sm:$0xff]  ;;  %v6786_v0 = vpack.c.bf16 %v4990_v51, %v4989_v9  ;;  %v4998_v11 = vld [vmem:[#allocation8 + $0xec8] sm:$0xff]  ;;  %v5109_v51 = vld [vmem:[#allocation8 + $0xfc0] sm:$0xff] }
 0x739   :  { %6765 = vmatpush3.bf16.msra.mxu1 %v6764_v22  ;;  %v5102_v22 = vld [vmem:[#allocation8 + $0xf88] sm:$0xff]  ;;  %v6784_v47 = vpack.c.bf16 %v4876_v13, %v4875_v24  ;;  %v4980_v17 = vld [vmem:[#allocation8 + $0xe38] sm:$0xff]  ;;  %v4981_v13 = vld [vmem:[#allocation8 + $0xe40] sm:$0xff] }
 0x73a   :  { %6767 = vmatprep.subr.bf16.mxu1 %v6766_v26  ;;  %v4974_v26 = vld [vmem:[#allocation8 + $0xe08] sm:$0xff]  ;;  %v6818_v52 = vpack.c.bf16 %v5102_v22, %v5101_v4  ;;  %v4999_v22 = vld [vmem:[#allocation8 + $0xed0] sm:$0xff] }
 0x73b   :  { %6737 = vmatpush3.bf16.msra.mxu0 %v6736_v50  ;;  %v4992_v50 = vld [vmem:[#allocation8 + $0xe98] sm:$0xff]  ;;  %v6788_v19 = vpack.c.bf16 %v4974_v26, %v4973_v31  ;;  %v5093_v26 = vld [vmem:[#allocation8 + $0xf40] sm:$0xff] }
 0x73c   :  { %6739 = vmatprep.subr.bf16.mxu0 %v6738_v27  ;;  %v5086_v27 = vld [vmem:[#allocation8 + $0xf08] sm:$0xff]  ;;  %v6790_v39 = vpack.c.bf16 %v4992_v50, %v4991_v36  ;;  %v5111_v50 = vld [vmem:[#allocation8 + $0xfd0] sm:$0xff] }
 0x73d   :  { %6769 = vmatpush3.bf16.msra.mxu1 %v6768_v21  ;;  %v5104_v21 = vld [vmem:[#allocation8 + $0xf98] sm:$0xff]  ;;  %v6820_v55 = vpack.c.bf16 %v5086_v27, %v5085_v45  ;;  %v4983_v27 = vld [vmem:[#allocation8 + $0xe50] sm:$0xff] }
 0x73e   :  { %6771 = vmatprep.subr.bf16.mxu1 %v6770_v46  ;;  %v4976_v46 = vld [vmem:[#allocation8 + $0xe18] sm:$0xff]  ;;  %v6822_v35 = vpack.c.bf16 %v5104_v21, %v5103_v18  ;;  %v5001_v21 = vld [vmem:[#allocation8 + $0xee0] sm:$0xff] }
 0x73f   :  { %6741 = vmatpush3.bf16.msra.mxu0 %v6740_v6  ;;  %v4994_v6 = vld [vmem:[#allocation8 + $0xea8] sm:$0xff] }
 0x740   :  { %6743 = vmatprep.subr.bf16.mxu0 %v6742_v58  ;;  %v5087_v58 = vld [vmem:[#allocation8 + $0xf10] sm:$0xff]  ;;  %v6794_v25 = vpack.c.bf16 %v4994_v6, %v4993_v30  ;;  %v5113_v6 = vld [vmem:[#allocation8 + $0xfe0] sm:$0xff] }
 0x741   :  { %6773 = vmatpush3.bf16.msra.mxu1 %v6772_v41  ;;  %v6792_v41 = vpack.c.bf16 %v4976_v46, %v4975_v12  ;;  %v6824_v28 = vpack.c.bf16 %v5088_v3, %v5087_v58  ;;  %v5095_v46 = vld [vmem:[#allocation8 + $0xf50] sm:$0xff]  ;;  %v4985_v58 = vld [vmem:[#allocation8 + $0xe60] sm:$0xff]  ;;  %v4986_v3 = vld [vmem:[#allocation8 + $0xe68] sm:$0xff] }
 0x742   :  { %6775 = vmatprep.subr.bf16.mxu1 %v6774_v10 }
 0x743   :  { %6745 = vmatpush3.bf16.msra.mxu0 %v6744_v7  ;;  %v4977_v7 = vld [vmem:[#allocation8 + $0xe20] sm:$0xff] }
 0x744   :  { %6747 = vmatprep.subr.bf16.mxu0 %v6746_v20  ;;  %v4995_v20 = vld [vmem:[#allocation8 + $0xeb0] sm:$0xff] }
 0x745   :  { %6777 = vmatpush3.bf16.msra.mxu1 %v6776_v49  ;;  %v6826_v49 = vpack.c.bf16 %v5106_v2, %v5105_v23  ;;  %v5004_v23 = vld [vmem:[#allocation8 + $0xef8] sm:$0xff] }
 0x746   :  { %6779 = vmatprep.subr.bf16.mxu1 %v6778_v42  ;;  %v5107_v42 = vld [vmem:[#allocation8 + $0xfb0] sm:$0xff] }
 0x747   :  { %6749 = vmatpush3.bf16.msra.mxu0 %v6748_v61  ;;  %v6798_v61 = vpack.c.bf16 %v4996_v57, %v4995_v20  ;;  %v4988_v20 = vld [vmem:[#allocation8 + $0xe78] sm:$0xff] }
 0x748   :  { %6751 = vmatprep.subr.bf16.mxu0 %v6750_v59  ;;  %v4997_v59 = vld [vmem:[#allocation8 + $0xec0] sm:$0xff] }
 0x749   :  { %6781 = vmatpush3.bf16.msra.mxu1 %v6780_v32  ;;  %v5092_v32 = vld [vmem:[#allocation8 + $0xf38] sm:$0xff]  ;;  %v6802_v24 = vpack.c.bf16 %v4998_v11, %v4997_v59 }
 0x74a   :  { %6783 = vmatprep.subr.bf16.mxu1 %v6782_v48  ;;  %v5110_v48 = vld [vmem:[#allocation8 + $0xfc8] sm:$0xff]  ;;  %v6832_v4 = vpack.c.bf16 %v5092_v32, %v5091_v14 }
 0x74b   :  { %6753 = vmatpush3.bf16.msra.mxu0 %v6752_v1  ;;  %v4982_v1 = vld [vmem:[#allocation8 + $0xe48] sm:$0xff]  ;;  %v6834_v31 = vpack.c.bf16 %v5110_v48, %v5109_v51 }
 0x74c   :  { %6787 = vmatprep.subr.bf16.mxu0 %v6786_v0  ;;  %v5000_v0 = vld [vmem:[#allocation8 + $0xed8] sm:$0xff]  ;;  %v6804_v36 = vpack.c.bf16 %v4982_v1, %v4981_v13  ;;  %v7471_v13 = vmov 0.0|0.0  }
 0x74d   :  { %6785 = vmatpush3.bf16.msra.mxu1 %v6784_v47  ;;  %v5094_v47 = vld [vmem:[#allocation8 + $0xf48] sm:$0xff]  ;;  %v6806_v45 = vpack.c.bf16 %v5000_v0, %v4999_v22 }
 0x74e   :  { %4854 = vmatmul.mubr.f32.vlgmr.msra.gmra.mrb[20].mxu0 %v9260_v37  ;;  %v5748_v5 = vpop.f32.mrb[10].mxu0  ;;  %6819 = vmatprep.subr.bf16.mxu1 %v6818_v52  ;;  %v4978_v37 = vld [vmem:[#allocation8 + $0xe28] sm:$0xff]  ;;  %v5112_v52 = vld [vmem:[#allocation8 + $0xfd8] sm:$0xff]  ;;  %v6836_v18 = vpack.c.bf16 %v5094_v47, %v5093_v26 }
 0x74f   :  { %6789 = vmatpush3.bf16.msra.mxu0 %v6788_v19  ;;  %5077 = vmatprep.mubr.f32.mxu0 %v9269_v15  ;;  %v5749_v63 = vpop.f32.mrb[11].mxu0  ;;  %v6796_v43 = vpack.c.bf16 %v4978_v37, %v4977_v7  ;;  %v4984_v19 = vld [vmem:[#allocation8 + $0xe58] sm:$0xff]  ;;  %v6838_v12 = vpack.c.bf16 %v5112_v52, %v5111_v50  ;;  %v5115_v7 = vld [vmem:[#allocation8 + $0xff0] sm:$0xff]  ;;  %v5201_v0 = vld [vmem:[%s9496_s9 + $0x20] sm:$0xff] }
 0x750   :  { %4966 = vmatmul.mubr.f32.vlgmr.msra.gmra.mrb[16].mxu1 %v9278_v54  ;;  %v5750_v10 = vadd.f32 %v5749_v63, %v5748_v5  ;;  %v5783_v44 = vpop.f32.mrb[6].mxu1  ;;  %6791 = vmatprep.subr.bf16.mxu0 %v6790_v39  ;;  %v5090_v54 = vld [vmem:[#allocation8 + $0xf28] sm:$0xff]  ;;  %v6808_v30 = vpack.c.bf16 %v4984_v19, %v4983_v27  ;;  %v5116_v37 = vld [vmem:[#allocation8 + $0xff8] sm:$0xff] }
 0x751   :  { %6821 = vmatpush3.bf16.msra.mxu1 %v6820_v55  ;;  %5189 = vmatprep.mubr.f32.mxu1 %v9286_v33  ;;  %v5784_v16 = vpop.f32.mrb[7].mxu1  ;;  %v4979_v33 = vld [vmem:[#allocation8 + $0xe30] sm:$0xff]  ;;  %v6828_v53 = vpack.c.bf16 %v5090_v54, %v5089_v40  ;;  %v5002_v39 = vld [vmem:[#allocation8 + $0xee8] sm:$0xff]  ;;  %v5096_v55 = vld [vmem:[#allocation8 + $0xf58] sm:$0xff] }
 0x752   :  { %v3739_v15 = vadd.f32 %v5750_v10, %v9304_v38  ;;  %v5785_v29 = vadd.f32 %v5784_v16, %v5783_v44  ;;  %6823 = vmatprep.subr.bf16.mxu1 %v6822_v35  ;;  %v6830_v38 = vpack.c.bf16 %v5108_v56, %v5107_v42  ;;  %v6800_v9 = vpack.c.bf16 %v4980_v17, %v4979_v33  ;;  %v5114_v5 = vld [vmem:[#allocation8 + $0xfe8] sm:$0xff]  ;;  %v5097_v10 = vld [vmem:[#allocation8 + $0xf60] sm:$0xff]  ;;  %v5203_v47 = vld [vmem:[%s9496_s9 + $0x30] sm:$0xff] }
 0x753   :  { %6793 = vmatpush3.bf16.msra.mxu0 %v6792_v41  ;;  %v6810_v35 = vpack.c.bf16 %v5002_v39, %v5001_v21  ;;  %v6840_v63 = vpack.c.bf16 %v5096_v55, %v5095_v46  ;;  %v5003_v41 = vld [vmem:[#allocation8 + $0xef0] sm:$0xff]  ;;  %v6842_v2 = vpack.c.bf16 %v5114_v5, %v5113_v6  ;;  %v5098_v44 = vld [vmem:[#allocation8 + $0xf68] sm:$0xff] }
 0x754   :  { %v9311_v34 = vadd.f32 %v5785_v29, %v3739_v15  ;;  %6795 = vmatprep.subr.bf16.mxu0 %v6794_v25  ;;  %v6812_v25 = vpack.c.bf16 %v4986_v3, %v4985_v58  ;;  %v6814_v16 = vpack.c.bf16 %v5004_v23, %v5003_v41  ;;  %v6844_v57 = vpack.c.bf16 %v5098_v44, %v5097_v10  ;;  %v5099_v29 = vld [vmem:[#allocation8 + $0xf70] sm:$0xff]  ;;  %v5205_v52 = vld [vmem:[%s9496_s9 + $0x40] sm:$0xff] }
 0x755   :  { %6825 = vmatpush3.bf16.msra.mxu1 %v6824_v28  ;;  %v4987_v28 = vld [vmem:[#allocation8 + $0xe70] sm:$0xff]  ;;  %v6846_v15 = vpack.c.bf16 %v5116_v37, %v5115_v7  ;;  %v5209_v39 = vld [vmem:[%s9496_s9 + $0x60] sm:$0xff] }
 0x756   :  { %6827 = vmatprep.subr.bf16.mxu1 %v6826_v49  ;;  %v5100_v49 = vld [vmem:[#allocation8 + $0xf78] sm:$0xff]  ;;  %v6816_v40 = vpack.c.bf16 %v4988_v20, %v4987_v28  ;;  %v5291_v6 = vld [vmem:[%s9498_s11] sm:$0xff]  ;;  %v5292_v5 = vld [vmem:[%s9498_s11 + $0x8] sm:$0xff] }
 0x757   :  { %6797 = vmatpush3.bf16.msra.mxu0 %v6796_v43  ;;  %v6848_v54 = vpack.c.bf16 %v5100_v49, %v5099_v29  ;;  %v5207_v19 = vld [vmem:[%s9496_s9 + $0x50] sm:$0xff]  ;;  %v6875_v3 = vpack.c.bf16 %v5292_v5, %v5291_v6  ;;  %v5295_v23 = vld [vmem:[%s9498_s11 + $0x20] sm:$0xff]  ;;  %v5389_v5 = vld [vmem:[%s9500_s13 + $0x48] sm:$0xff] }
 0x758   :  { %6799 = vmatprep.subr.bf16.mxu0 %v6798_v61  ;;  %v5211_v46 = vld [vmem:[%s9496_s9 + $0x70] sm:$0xff]  ;;  %v5388_v6 = vld [vmem:[%s9500_s13 + $0x40] sm:$0xff] }
 0x759   :  { %6829 = vmatpush3.bf16.msra.mxu1 %v6828_v53 }
 0x75a   :  { %6831 = vmatprep.subr.bf16.mxu1 %v6830_v38 }
 0x75b   :  { %6801 = vmatpush3.bf16.msra.mxu0 %v6800_v9 }
 0x75c   :  { %6803 = vmatprep.subr.bf16.mxu0 %v6802_v24 }
 0x75d   :  { %6833 = vmatpush3.bf16.msra.mxu1 %v6832_v4  ;;  %v5200_v4 = vld [vmem:[%s9496_s9 + $0x18] sm:$0xff] }
 0x75e   :  { %6835 = vmatprep.subr.bf16.mxu1 %v6834_v31  ;;  %v5202_v31 = vld [vmem:[%s9496_s9 + $0x28] sm:$0xff] }
 0x75f   :  { %6805 = vmatpush3.bf16.msra.mxu0 %v6804_v36  ;;  %v6857_v26 = vpack.c.bf16 %v5202_v31, %v5201_v0  ;;  %v5204_v36 = vld [vmem:[%s9496_s9 + $0x38] sm:$0xff] }
 0x760   :  { %6807 = vmatprep.subr.bf16.mxu0 %v6806_v45  ;;  %v6860_v50 = vpack.c.bf16 %v5204_v36, %v5203_v47  ;;  %v5206_v45 = vld [vmem:[%s9496_s9 + $0x48] sm:$0xff]  ;;  %v5640_v31 = vld [vmem:[#allocation11] ss:$0 sm:$0xff] }
 0x761   :  { %6837 = vmatpush3.bf16.msra.mxu1 %v6836_v18  ;;  %v6863_v27 = vpack.c.bf16 %v5206_v45, %v5205_v52  ;;  %v5208_v18 = vld [vmem:[%s9496_s9 + $0x58] sm:$0xff]  ;;  %v5381_v47 = vld [vmem:[%s9500_s13 + $0x8] sm:$0xff] }
 0x762   :  { %6839 = vmatprep.subr.bf16.mxu1 %v6838_v12  ;;  %v6866_v21 = vpack.c.bf16 %v5208_v18, %v5207_v19  ;;  %v5210_v12 = vld [vmem:[%s9496_s9 + $0x68] sm:$0xff]  ;;  %v5382_v19 = vld [vmem:[%s9500_s13 + $0x10] sm:$0xff]  ;;  %v5383_v18 = vld [vmem:[%s9500_s13 + $0x18] sm:$0xff] }
 0x763   :  { %6809 = vmatpush3.bf16.msra.mxu0 %v6808_v30  ;;  %v6869_v55 = vpack.c.bf16 %v5210_v12, %v5209_v39  ;;  %v5212_v30 = vld [vmem:[%s9496_s9 + $0x78] sm:$0xff]  ;;  %v5384_v39 = vld [vmem:[%s9500_s13 + $0x20] sm:$0xff]  ;;  %v5385_v12 = vld [vmem:[%s9500_s13 + $0x28] sm:$0xff] }
 0x764   :  { %6811 = vmatprep.subr.bf16.mxu0 %v6810_v35  ;;  %v5293_v35 = vld [vmem:[%s9498_s11 + $0x10] sm:$0xff]  ;;  %v6872_v58 = vpack.c.bf16 %v5212_v30, %v5211_v46  ;;  %v6893_v46 = vpack.c.bf16 %v5385_v12, %v5384_v39 }
 0x765   :  { %6841 = vmatpush3.bf16.msra.mxu1 %v6840_v63  ;;  %v5294_v63 = vld [vmem:[%s9498_s11 + $0x18] sm:$0xff] }
 0x766   :  { %6843 = vmatprep.subr.bf16.mxu1 %v6842_v2  ;;  %v6878_v41 = vpack.c.bf16 %v5294_v63, %v5293_v35  ;;  %v5296_v2 = vld [vmem:[%s9498_s11 + $0x28] sm:$0xff]  ;;  %v6899_v35 = vpack.c.bf16 %v5389_v5, %v5388_v6 }
 0x767   :  { %6813 = vmatpush3.bf16.msra.mxu0 %v6812_v25  ;;  %v6881_v10 = vpack.c.bf16 %v5296_v2, %v5295_v23  ;;  %v5393_v23 = vld [vmem:[%s9500_s13 + $0x68] sm:$0xff] }
 0x768   :  { %6815 = vmatprep.subr.bf16.mxu0 %v6814_v16 }
 0x769   :  { %6845 = vmatpush3.bf16.msra.mxu1 %v6844_v57 }
 0x76a   :  { %6847 = vmatprep.subr.bf16.mxu1 %v6846_v15 }
 0x76b   :  { %6817 = vmatpush3.bf16.msra.mxu0 %v6816_v40 }
 0x76c   :  { %6850 = vmatprep.subr.bf16.mxu0 %v7471_v13 }
 0x76d   :  { %6849 = vmatpush3.bf16.msra.mxu1 %v6848_v54 }
 0x76e   :  { %5078 = vmatmul.mubr.f32.vlgmr.msra.gmra.mrb[22].mxu0 %v9289_v60  ;;  %v5818_v43 = vpop.f32.mrb[12].mxu0  ;;  %v5197_v60 = vld [vmem:[%s9496_s9] sm:$0xff]  ;;  %6874 = vmatprep.subr.bf16.mxu1 %v7471_v13 }
 0x76f   :  { %v5819_v42 = vpop.f32.mrb[13].mxu0  ;;  %6281 = vmatprep.mubr.msk.f32.mxu0 %vm7472_vm13, %v7452_v8 }
 0x770   :  { %5190 = vmatmul.mubr.f32.vlgmr.msra.gmra.mrb[18].mxu1 %v9295_v62  ;;  %v5820_v56 = vadd.f32 %v5819_v42, %v5818_v43  ;;  %v5853_v61 = vpop.f32.mrb[8].mxu1  ;;  %v5198_v62 = vld [vmem:[%s9496_s9 + $0x8] sm:$0xff] }
 0x771   :  { %v5854_v33 = vpop.f32.mrb[9].mxu1  ;;  %v6851_v1 = vpack.c.bf16 %v5198_v62, %v5197_v60  ;;  %6300 = vmatprep.mubr.msk.f32.mxu1 %vm7472_vm13, %v7452_v8  ;;  %6876 = vmatpush3.bf16.msra.mxu1 %v6875_v3  ;;  %v5391_v3 = vld [vmem:[%s9500_s13 + $0x58] sm:$0xff] }
 0x772   :  { %v3963_v17 = vadd.f32 %v5820_v56, %v9311_v34  ;;  %v5855_v53 = vadd.f32 %v5854_v33, %v5853_v61  ;;  %v5199_v34 = vld [vmem:[%s9496_s9 + $0x10] sm:$0xff]  ;;  %6877 = vmatprep.subr.bf16.mxu1 %v7471_v13 }
 0x773   :  { %6852 = vmatpush3.bf16.msra.mxu0 %v6851_v1  ;;  %v6854_v22 = vpack.c.bf16 %v5200_v4, %v5199_v34  ;;  %v5297_v4 = vld [vmem:[%s9498_s11 + $0x30] sm:$0xff] }
 0x774   :  { %v4075_v59 = vadd.f32 %v5855_v53, %v3963_v17  ;;  %6853 = vmatprep.subr.bf16.mxu0 %v7471_v13 }
 0x775   :  { %6879 = vmatpush3.bf16.msra.mxu1 %v6878_v41  ;;  %v5392_v41 = vld [vmem:[%s9500_s13 + $0x60] sm:$0xff] }
 0x776   :  { %6880 = vmatprep.subr.bf16.mxu1 %v7471_v13  ;;  %v6905_v2 = vpack.c.bf16 %v5393_v23, %v5392_v41 }
 0x777   :  { %6855 = vmatpush3.bf16.msra.mxu0 %v6854_v22  ;;  %v5298_v22 = vld [vmem:[%s9498_s11 + $0x38] sm:$0xff] }
 0x778   :  { %6856 = vmatprep.subr.bf16.mxu0 %v7471_v13  ;;  %v6884_v0 = vpack.c.bf16 %v5298_v22, %v5297_v4 }
 0x779   :  { %6882 = vmatpush3.bf16.msra.mxu1 %v6881_v10  ;;  %v5394_v10 = vld [vmem:[%s9500_s13 + $0x70] sm:$0xff] }
 0x77a   :  { %6883 = vmatprep.subr.bf16.mxu1 %v7471_v13 }
 0x77b   :  { %6858 = vmatpush3.bf16.msra.mxu0 %v6857_v26  ;;  %v5380_v26 = vld [vmem:[%s9500_s13] sm:$0xff] }
 0x77c   :  { %6859 = vmatprep.subr.bf16.mxu0 %v7471_v13  ;;  %v6887_v45 = vpack.c.bf16 %v5381_v47, %v5380_v26 }
 0x77d   :  { %6885 = vmatpush3.bf16.msra.mxu1 %v6884_v0 }
 0x77e   :  { %6886 = vmatprep.subr.bf16.mxu1 %v7471_v13 }
 0x77f   :  { %6861 = vmatpush3.bf16.msra.mxu0 %v6860_v50 }
 0x780   :  { %6862 = vmatprep.subr.bf16.mxu0 %v7471_v13 }
 0x783   :  { %6864 = vmatpush3.bf16.msra.mxu0 %v6863_v27 }
 0x784   :  { %6865 = vmatprep.subr.bf16.mxu0 %v7471_v13 }
 0x787   :  { %6867 = vmatpush3.bf16.msra.mxu0 %v6866_v21  ;;  %v6890_v21 = vpack.c.bf16 %v5383_v18, %v5382_v19 }
 0x788   :  { %6868 = vmatprep.subr.bf16.mxu0 %v7471_v13 }
 0x78b   :  { %6870 = vmatpush3.bf16.msra.mxu0 %v6869_v55  ;;  %v5386_v55 = vld [vmem:[%s9500_s13 + $0x30] sm:$0xff] }
 0x78c   :  { %6871 = vmatprep.subr.bf16.mxu0 %v7471_v13 }
 0x78e   :  { %v5888_v11 = vpop.f32.mrb[14].mxu0 }
 0x78f   :  { %v5889_v38 = vpop.f32.mrb[15].mxu0  ;;  %6873 = vmatpush3.bf16.msra.mxu0 %v6872_v58  ;;  %v5390_v58 = vld [vmem:[%s9500_s13 + $0x50] sm:$0xff] }
 0x790   :  { %v5890_v14 = vadd.f32 %v5889_v38, %v5888_v11  ;;  %v5923_v32 = vpop.f32.mrb[10].mxu1  ;;  %v6902_v63 = vpack.c.bf16 %v5391_v3, %v5390_v58 }
 0x791   :  { %v5924_v9 = vpop.f32.mrb[11].mxu1 }
 0x792   :  { %v4187_v51 = vadd.f32 %v5890_v14, %v4075_v59  ;;  %v5925_v48 = vadd.f32 %v5924_v9, %v5923_v32 }
 0x794   :  { %v9316_v24 = vadd.f32 %v5925_v48, %v4187_v51 }
 0x7e1   :  { %v5958_v44 = vpop.f32.mrb[16].mxu0 }
 0x7e2   :  { %v5959_v25 = vpop.f32.mrb[17].mxu0 }
 0x7e3   :  { %v5960_v7 = vadd.f32 %v5959_v25, %v5958_v44  ;;  %v5993_v37 = vpop.f32.mrb[12].mxu1  ;;  %v5395_v44 = vld [vmem:[%s9500_s13 + $0x78] sm:$0xff] }
 0x7e4   :  { %v5994_v16 = vpop.f32.mrb[13].mxu1  ;;  %v6908_v25 = vpack.c.bf16 %v5395_v44, %v5394_v10 }
 0x7e5   :  { %v4413_v28 = vadd.f32 %v5960_v7, %v9316_v24  ;;  %v5995_v20 = vadd.f32 %v5994_v16, %v5993_v37  ;;  %v5641_v7 = vld [vmem:[%s9499_s12] ss:$0 sm:$0xff]  ;;  %s7473_s12 = smov [#allocation16]  }
 0x7e7   :  { %v4523_v57 = vadd.f32 %v5995_v20, %v4413_v28 }
 0x801   :  { %v6028_v15 = vpop.f32.mrb[18].mxu0 }
 0x802   :  { %v6029_v29 = vpop.f32.mrb[19].mxu0 }
 0x803   :  { %v6030_v49 = vadd.f32 %v6029_v29, %v6028_v15  ;;  %v6063_v40 = vpop.f32.mrb[14].mxu1 }
 0x804   :  { %v6064_v54 = vpop.f32.mrb[15].mxu1 }
 0x805   :  { %v4635_v43 = vadd.f32 %v6030_v49, %v4523_v57  ;;  %v6065_v42 = vadd.f32 %v6064_v54, %v6063_v40  ;;  %v5494_v57 = vld [vmem:[%s9530_s3] sm:$0x3] }
 0x806   :  { %v5643_v49 = vld [vmem:[#allocation13] ss:$0 sm:$0xff] }
 0x807   :  { %v4747_v56 = vadd.f32 %v6065_v42, %v4635_v43  ;;  %v5644_v42 = vld [vmem:[#allocation14] ss:$0 sm:$0xff] }
 0x821   :  { %v6098_v61 = vpop.f32.mrb[20].mxu0 }
 0x822   :  { %v6099_v33 = vpop.f32.mrb[21].mxu0 }
 0x823   :  { %v6100_v17 = vadd.f32 %v6099_v33, %v6098_v61  ;;  %v6133_v53 = vpop.f32.mrb[16].mxu1 }
 0x824   :  { %v6134_v59 = vpop.f32.mrb[17].mxu1 }
 0x825   :  { %v4859_v11 = vadd.f32 %v6100_v17, %v4747_v56  ;;  %v6135_v38 = vadd.f32 %v6134_v59, %v6133_v53  ;;  %v5645_v17 = vld [vmem:[#allocation4] ss:$0 sm:$0xff] }
 0x827   :  { %v4971_v14 = vadd.f32 %v6135_v38, %v4859_v11 }
 0x841   :  { %v6168_v32 = vpop.f32.mrb[22].mxu0 }
 0x842   :  { %v6169_v9 = vpop.f32.mrb[23].mxu0 }
 0x843   :  { %v6170_v51 = vadd.f32 %v6169_v9, %v6168_v32  ;;  %v6203_v48 = vpop.f32.mrb[18].mxu1 }
 0x844   :  { %v6204_v24 = vpop.f32.mrb[19].mxu1 }
 0x845   :  { %v5083_v60 = vadd.f32 %v6170_v51, %v4971_v14  ;;  %v6205_v62 = vadd.f32 %v6204_v24, %v6203_v48 }
 0x847   :  { %v5195_v34 = vadd.f32 %v6205_v62, %v5083_v60 }
 0x849   :  { %v5196_v1 = vmax.f32 %v5195_v34, 0.0 }
 0x84b   :  { %6282 = vmatmul.mubr.f32.vlgmr.msra.gmra.mrb[24].mxu0 %v5196_v1 }
 0x91e   :  { %v5286_v36 = vpop.f32.mrb[24].mxu0 }
 0x91f   :  { %v5287_v50 = vadd.f32 %v5640_v31, %v5286_v36  ;;  %v6283_v52 = vpop.f32.mrb[25].mxu0 }
 0x921   :  { %v5290_v27 = vmax.f32 %v5287_v50, 0.0 }
 0x923   :  { %6301 = vmatmul.mubr.msk.f32.vlgmr.msra.gmra.mrb[20].mxu1 %vm5306_vm3, %v5290_v27 }
 0x924   :  { %6888 = vmatpush3.bf16.msra.mxu1 %v6887_v45  ;;  %6335 = vmatprep.mubr.msk.f32.mxu1 %vm7472_vm13, %v7452_v8  ;;  %v5387_v8 = vld [vmem:[%s9500_s13 + $0x38] sm:$0xff]  ;;  %s5539_s13 = sshll.u32 %s7473_s12, 4  ;;  %s5540_s13 = int_to_ptr.vmem [resolvable:$true] %s5539_s13 }
 0x925   :  { %6889 = vmatprep.subr.bf16.mxu1 %v7471_v13  ;;  %v6896_v30 = vpack.c.bf16 %v5387_v8, %v5386_v55  ;;  %s7409_s4 = scalar_lea.vmem %s5540_s13, 32  ;;  %p7414_p7 = scmp.lt.s32.totalorder %s5540_s13, %s5540_s13 }
 0x926   :  { %p7410_p6 = scmp.ne.s32.totalorder %s5540_s13, %s7409_s4  ;;  %p7415_p8 = scmp.lt.s32.totalorder %s7409_s4, %s7409_s4 }
 0x928   :  { %6891 = vmatpush3.bf16.msra.mxu1 %v6890_v21  ;;  %p7416_p9 = por %p7415_p8, %p7414_p7 }
 0x929   :  { %6892 = vmatprep.subr.bf16.mxu1 %v7471_v13 }
 0x92a   :  { %p7417_p10 = pnand %p7416_p9, %p7410_p6 }
 0x92c   :  { %6894 = vmatpush3.bf16.msra.mxu1 %v6893_v46 }
 0x92d   :  { %6895 = vmatprep.subr.bf16.mxu1 %v7471_v13 }
 0x930   :  { %6897 = vmatpush3.bf16.msra.mxu1 %v6896_v30 }
 0x931   :  { %6898 = vmatprep.subr.bf16.mxu1 %v7471_v13 }
 0x934   :  { %6900 = vmatpush3.bf16.msra.mxu1 %v6899_v35 }
 0x935   :  { %6901 = vmatprep.subr.bf16.mxu1 %v7471_v13 }
 0x938   :  { %6903 = vmatpush3.bf16.msra.mxu1 %v6902_v63 }
 0x939   :  { %6904 = vmatprep.subr.bf16.mxu1 %v7471_v13 }
 0x93c   :  { %6906 = vmatpush3.bf16.msra.mxu1 %v6905_v2 }
 0x93d   :  { %6907 = vmatprep.subr.bf16.mxu1 %v7471_v13 }
 0x940   :  { %6909 = vmatpush3.bf16.msra.mxu1 %v6908_v25 }
 0x943   :  { %6336 = vmatmul.mubr.f32.vlgmr.msra.gmra.mrb[22].mxu1 %v5196_v1 }
 0x9f6   :  { %v5376_v37 = vpop.f32.mrb[20].mxu1 }
 0x9f7   :  { %v5377_v16 = vadd.f32 %v5641_v7, %v5376_v37  ;;  %v6302_v28 = vpop.f32.mrb[21].mxu1 }
 0x9f9   :  { %v5495_v20 = vmul.f32 1.442695, %v5377_v16 }
 0x9fb   :  { %7266 = vpow2.f32 %v5495_v20 }
 0xa05   :  { %v7267_v15 = vpop.eup %7266 }
 0xa06   :  { %v5497_v29 = vmul.f32 %v7267_v15, %v5494_v57 }
 0xa08   :  { %v5499_v13 = vsel %vm5498_vm5, %v5497_v29, 0.0 }
 0xa09   :  { %5500 = vadd.xlane.f32.xlu0 %v5499_v13 }
 0xa16   :  { %v5469_v40 = vpop.f32.mrb[22].mxu1 }
 0xa17   :  { %v5470_v54 = vadd.f32 %v5643_v49, %v5469_v40  ;;  %v6337_v43 = vpop.f32.mrb[23].mxu1 }
 0xa19   :  { %v5473_v56 = vmax.f32 %v5470_v54, 0.0 }
 0xa1b   :  { %v5481_v61 = vmul.f32 %v5644_v42, %v5473_v56 }
 0xa1d   :  { %v5483_v33 = vsel %vm5482_vm7, %v5481_v61, 0.0 }
 0xa1e   :  { %5484 = vadd.xlane.f32.xlu1 %v5483_v33 }
 0xa96   :  { %v5501_v14 = vpop.xlane.xlu0 %5500 }
 0xa97   :  { %v5502_v32 = vadd.f32 1e-05, %v5501_v14 }
 0xaab   :  { %v5485_v53 = vpop.xlane.xlu1 %5484 }
 0xaac   :  { %v5493_v59 = vadd.f32 %v5645_v17, %v5485_v53 }
 0xaae   :  { %v5505_v11 = vmul.f32 1.442695, %v5493_v59 }
 0xab0   :  { %7268 = vpow2.f32 %v5505_v11 }
 0xab1   :  { %7270 = vrcp.f32 %v5502_v32 }
 0xaba   :  { %v7269_v38 = vpop.eup %7268 }
 0xabb   :  { %5509 = vperm.xlu0 %7024, %v7269_v38   ;;  %v7271_v9 = vpop.eup %7270 }
 0xabc   :  { %v5504_v60 = vmul.f32 %v7271_v9, %v5497_v29 }
 0xabe   :  { %v5519_v62 = vsel %vm5498_vm5, %v5504_v60, 0.0 }
 0xb3a   :  { %v5510_v51 = vpop.permute.xlu0 %5509 }
 0xb3b   :  { %v5512_v48 = vmul.f32 %v5510_v51, %v5494_v57 }
 0xb3d   :  { %v5513_v24 = vsel %vm5498_vm5, %v5512_v48, 0.0 }
 0xb3e   :  { %5514 = vadd.xlane.f32.xlu1 %v5513_v24 }
 0xb42   :  { %5520 = vadd.xlane.f32.xlu1 %v5519_v62 }
 0xbcb   :  { %v5515_v34 = vpop.xlane.xlu1 %5514 }
 0xbcc   :  { %v5516_v1 = vadd.f32 1e-05, %v5515_v34 }
 0xbce   :  { %7272 = vrcp.f32 %v5516_v1 }
 0xbcf   :  { %v5521_v4 = vpop.xlane.xlu1 %5520 }
 0xbd0   :  { %v5522_v22 = vsel %vm5498_vm5, %v5521_v4, 0.0 }
 0xbd1   :  { %v5523_v0 = vrot.slane %v5522_v22, 4 }
 0xbd3   :  { %v5524_v31 = vadd.f32 %v5523_v0, %v5522_v22 }
 0xbd5   :  { %v5525_v26 = vrot.slane %v5524_v31, 2 }
 0xbd7   :  { %v5526_v47 = vadd.f32 %v5525_v26, %v5524_v31 }
 0xbd8   :  { %v7273_v36 = vpop.eup %7272 }
 0xbd9   :  { %v5527_v50 = vrot.slane %v5526_v47, 1  ;;  %v5518_v52 = vmul.f32 %v7273_v36, %v5512_v48 }
 0xbdb   :  { %v5528_v45 = vadd.f32 %v5527_v50, %v5526_v47  ;;  %v5530_v19 = vadd.f32 %v5518_v52, %v5504_v60 }
 0xbdd   :  { %v5529_v27 = vmul.f32 0.125, %v5528_v45 }
 0xbdf   :  { %v5531_v18 = vsub.f32 %v5530_v19, %v5529_v27 }
 0xbe1   :  { %5532 = vst [vmem:[#allocation16] sm:$0x3] %v5531_v18 }
 0xbe2   :  { %7420 = shalt.err (!%p7417_p10)
}
 0xbe3   :  { %s7421_s16 = scalar_lea.hbm %s9504_s17, 32 }
 0xbe4   :  { %p7422_p11 = scmp.ne.s32.totalorder %s9504_s17, %s7421_s16  ;;  %p7425_p12 = scmp.lt.u32.totalorder %s7421_s16, %s9504_s17 }
 0xbe6   :  { %p7427_p13 = pnand %p7425_p12, %p7422_p11 }
 0xbe8   :  { %7430 = shalt.err (!%p7427_p13)
}
 0xbe9   :  { %5542 = dma.vmem_to_hbm [thread:$0]  %s5540_s13, 32, %s9504_s17, [#allocation7]  }
 0xbea   :  { %7439 = dma.done.wait [#allocation7], 32  }
 0xbeb   :  { %7440 = vsyncadd [#allocation7], 4294967264 }
 0xbec   :  { %5546 = vsyncpa [#allocation6], 1 }
 0xbed   :  { %5547 = vsyncpa [#allocation9], 1 }
 0xbee   :  { %5548 = vsyncpa [#allocation12], 1 }
 0xbef   :  { %5549 = vsyncpa [#allocation15], 1 }
 0xbf0   :  { %5550 = vsyncpa [#allocation7], 1 }

</bundles_post_ra>
